<compile_context>
chip_gen: v7x
topology: tpu7x:2x2x1
jax: 0.10.0
libtpu: 0.0.40
codegen_flags: <defaults>
</compile_context>

<pallas_src>
import math
import jax
import jax.numpy as jnp
from jax.experimental import pallas as pl
from jax.experimental.pallas import tpu as pltpu

# ---------------------------------------------------------------------------
# CUBA neuron parameters (quantized the way lava-dl does: p_scale = 1 << 12)
# ---------------------------------------------------------------------------
P_SCALE = 1 << 12
THRESHOLD = 1.25
CURRENT_DECAY = round(0.25 * P_SCALE) / P_SCALE   # 0.25
VOLTAGE_DECAY = round(0.03 * P_SCALE) / P_SCALE   # ~0.030029
DC = 1.0 - CURRENT_DECAY
DV = 1.0 - VOLTAGE_DECAY
POOL_WEIGHT = 1.1
SPIKE_DTYPE = jnp.bfloat16                         # spikes are {0,1} -> lossless


def _round_up(x, m):
    return ((x + m - 1) // m) * m


def _pick_tile(L):
    """Largest lane-tile <= 512 that divides L, preferring grid >= 2."""
    for t in (512, 256, 128):
        if L % t == 0 and L // t >= 2:
            return t
    for t in (512, 256, 128):
        if L % t == 0:
            return t
    return L                                       # full dim is always legal


# ---------------------------------------------------------------------------
# Shared CUBA recurrence (fully unrolled over the small static T)
#   current[t] = (1-cd)*current[t-1] + z[t]
#   voltage[t] = (1-vd)*voltage[t-1] + current[t]
#   spike[t]   = voltage[t] >= threshold ; voltage reset to 0 where it spiked
# The delayed (shifted-by-1) spikes are written to s_ref; the scalar count of the
# spikes that survive the shift (raw t < T-1) is returned for the per-block mean.
# ---------------------------------------------------------------------------
def _cuba_recurrence(get_z, s_ref, state_shape, T):
    cur = jnp.zeros(state_shape, jnp.float32)
    vol = jnp.zeros(state_shape, jnp.float32)
    count = jnp.float32(0.0)
    s_ref[0] = jnp.zeros(state_shape, s_ref.dtype)   # delay_shift: t=0 output is 0
    for t in range(T):
        cur = cur * DC + get_z(t)
        vol = vol * DV + cur
        spk = vol >= THRESHOLD
        vol = jnp.where(spk, 0.0, vol)
        if t + 1 < T:
            spk_f = spk.astype(jnp.float32)
            s_ref[t + 1] = spk_f.astype(s_ref.dtype)
            count = count + jnp.sum(spk_f)            # scalar XLU reduce per step
    return count


def _write_count(cnt_ref, count):
    cnt_ref[...] = jnp.zeros(cnt_ref.shape, jnp.float32) + count


# ---------------------------------------------------------------------------
# Kernel 1: fused CUBA + delay-shift + spike-count (pool blocks feed this).
#   z_ref: [T, 8, tile] f32   s_ref: [T, 8, tile] bf16   cnt_ref: [1, 8, 128] f32
# ---------------------------------------------------------------------------
def _cuba_kernel(z_ref, s_ref, cnt_ref):
    T = z_ref.shape[0]
    count = _cuba_recurrence(lambda t: z_ref[t], s_ref, z_ref.shape[1:], T)
    _write_count(cnt_ref, count)


def cuba_block(z_tp):
    """z_tp: [T, P] f32 synaptic drive -> (delayed spikes [T, P] bf16, spike count)."""
    T, P = z_tp.shape
    Pp = _round_up(P, 8 * 128)
    if Pp != P:                         # never triggered for this network's shapes
        z_tp = jnp.pad(z_tp, ((0, 0), (0, Pp - P)))
    L = Pp // 8
    tile = _pick_tile(L)
    G = L // tile
    z3 = z_tp.reshape(T, 8, L)
    s3, cnt = pl.pallas_call(
        _cuba_kernel,
        out_shape=(jax.ShapeDtypeStruct((T, 8, L), SPIKE_DTYPE),
                   jax.ShapeDtypeStruct((G, 8, 128), jnp.float32)),
        grid=(G,),
        in_specs=[pl.BlockSpec((T, 8, tile), lambda i: (0, 0, i))],
        out_specs=[pl.BlockSpec((T, 8, tile), lambda i: (0, 0, i)),
                   pl.BlockSpec((1, 8, 128), lambda i: (i, 0, 0))],
        compiler_params=pltpu.CompilerParams(
            dimension_semantics=("parallel",)),
    )(z3)
    spikes = s3.reshape(T, Pp)[:, :P]
    return spikes, jnp.sum(cnt[:, 0, 0])


# ---------------------------------------------------------------------------
# Kernel 2: fused Conv synapse (transposed matmul on im2col patches) + CUBA.
#   p_ref: [T, F, rows] bf16   w_ref: [Co, F] bf16
#   s_ref: [T, Co, rows] bf16  cnt_ref: [1, 8, 128] f32
# State is (Co, rows): lane-dense along rows.
# ---------------------------------------------------------------------------
def _conv_cuba_kernel(p_ref, w_ref, s_ref, cnt_ref):
    T = p_ref.shape[0]
    Co = w_ref.shape[0]
    R = p_ref.shape[2]
    w = w_ref[...]

    def get_z(t):
        return jnp.dot(w, p_ref[t], preferred_element_type=jnp.float32)

    count = _cuba_recurrence(get_z, s_ref, (Co, R), T)
    _write_count(cnt_ref, count)


def conv_cuba_block(patches_tfr, w_cof):
    """patches: [T, F, rows] bf16, weight: [Co, F] bf16 -> ([T, Co, rows] bf16, count)."""
    T, F, NR = patches_tfr.shape
    Co = w_cof.shape[0]
    tr = _pick_tile(NR)
    G = NR // tr
    s, cnt = pl.pallas_call(
        _conv_cuba_kernel,
        out_shape=(jax.ShapeDtypeStruct((T, Co, NR), SPIKE_DTYPE),
                   jax.ShapeDtypeStruct((G, 8, 128), jnp.float32)),
        grid=(G,),
        in_specs=[pl.BlockSpec((T, F, tr), lambda i: (0, 0, i)),
                  pl.BlockSpec((Co, F), lambda i: (0, 0))],
        out_specs=[pl.BlockSpec((T, Co, tr), lambda i: (0, 0, i)),
                   pl.BlockSpec((1, 8, 128), lambda i: (i, 0, 0))],
        compiler_params=pltpu.CompilerParams(
            dimension_semantics=("parallel",)),
    )(patches_tfr, w_cof)
    return s, jnp.sum(cnt[:, 0, 0])


# ---------------------------------------------------------------------------
# Kernel 3: fused Dense synapse + CUBA, tiled over output features.
#   x_ref: [T*N, Fin] bf16   w_ref: [Fin, fo_tile] bf16
#   s_ref: [T, N, fo_tile] bf16   cnt_ref: [1, 8, 128] f32
# ---------------------------------------------------------------------------
def _dense_cuba_kernel(x_ref, w_ref, s_ref, cnt_ref):
    T, N, Fo = s_ref.shape
    z = jnp.dot(x_ref[...], w_ref[...], preferred_element_type=jnp.float32)

    def get_z(t):
        return z[t * N:(t + 1) * N, :]

    count = _cuba_recurrence(get_z, s_ref, (N, Fo), T)
    _write_count(cnt_ref, count)


def dense_cuba_block(x_tnf, w_in_out, fo_tile=128):
    """x: [T, N, Fin] bf16, w: [Fin, Fout] bf16 -> ([T, N, Fout] bf16, count)."""
    T, N, Fin = x_tnf.shape
    Fout = w_in_out.shape[1]
    if Fout % fo_tile != 0:
        fo_tile = Fout
    G = Fout // fo_tile
    x2 = x_tnf.reshape(T * N, Fin)
    s, cnt = pl.pallas_call(
        _dense_cuba_kernel,
        out_shape=(jax.ShapeDtypeStruct((T, N, Fout), SPIKE_DTYPE),
                   jax.ShapeDtypeStruct((G, 8, 128), jnp.float32)),
        grid=(G,),
        in_specs=[pl.BlockSpec((T * N, Fin), lambda i: (0, 0)),
                  pl.BlockSpec((Fin, fo_tile), lambda i: (0, i))],
        out_specs=[pl.BlockSpec((T, N, fo_tile), lambda i: (0, 0, i)),
                   pl.BlockSpec((1, 8, 128), lambda i: (i, 0, 0))],
        compiler_params=pltpu.CompilerParams(
            dimension_semantics=("parallel",)),
    )(x2, w_in_out)
    return s, jnp.sum(cnt[:, 0, 0])


# ---------------------------------------------------------------------------
# Synapse glue (tiny XLA ops). Activation layout between blocks: [T, C, N, H, W]
# so every conv patch slice and pool reshape is contiguous.
# ---------------------------------------------------------------------------
def pool_to_z(x_tcnhw, k):
    T, C, N, H, W = x_tcnhw.shape
    Ho, Wo = H // k, W // k
    xr = x_tcnhw.astype(jnp.float32).reshape(T, C, N, Ho, k, Wo, k)
    z = POOL_WEIGHT * xr.sum(axis=(4, 6))            # [T, C, N, Ho, Wo] f32
    return z.reshape(T, C * N * Ho * Wo), (C, N, Ho, Wo)


def conv_patches(x_tcnhw, K, pad):
    """Channels-leading im2col: [T, Ci, N, H, W] -> [T, K*K*Ci, N*H*W] bf16."""
    T, Ci, N, H, W = x_tcnhw.shape
    xp = jnp.pad(x_tcnhw, ((0, 0), (0, 0), (0, 0), (pad, pad), (pad, pad)))
    cols = [xp[:, :, :, a:a + H, b:b + W] for a in range(K) for b in range(K)]
    p = jnp.stack(cols, axis=1)                      # [T, K*K, Ci, N, H, W]
    return p.reshape(T, K * K * Ci, N * H * W).astype(SPIKE_DTYPE)


def conv_weight_matrix(w):
    """(Co, Ci, K, K) -> (Co, K*K*Ci) bf16, matching the patch (kh, kw, ci) order."""
    Co, Ci, K, _ = w.shape
    return jnp.transpose(w, (0, 2, 3, 1)).reshape(Co, K * K * Ci).astype(SPIKE_DTYPE)


# ---------------------------------------------------------------------------
# Full network forward (mirrors Network.forward: returns (spike, count))
# ---------------------------------------------------------------------------
def network_forward(spike, params):
    # spike: [N, C, H, W, T] (SLAYER NCHWT) -> [T, C, N, H, W]
    N, C, H, W, T = spike.shape
    x = jnp.transpose(spike, (4, 1, 0, 2, 3))
    counts = []

    # block 0: Pool(4, 4) + CUBA
    z, (c, n, h, w) = pool_to_z(x, 4)
    spikes, cnt = cuba_block(z)
    counts.append(cnt / (z.shape[1] * T))
    x = spikes.reshape(T, c, n, h, w)                        # [T, 2, N, 32, 32]

    # block 1: Conv 2 -> 16, k=5, p=2 + CUBA (fused)
    p1 = conv_patches(x, 5, 2)                               # [T, 50, N*32*32]
    spikes, cnt = conv_cuba_block(p1, conv_weight_matrix(params["conv1"]))
    counts.append(cnt / (spikes.shape[1] * spikes.shape[2] * T))
    x = spikes.reshape(T, 16, n, h, w)

    # block 2: Pool(2, 2) + CUBA
    z, (c, n, h, w) = pool_to_z(x, 2)
    spikes, cnt = cuba_block(z)
    counts.append(cnt / (z.shape[1] * T))
    x = spikes.reshape(T, c, n, h, w)                        # [T, 16, N, 16, 16]

    # block 3: Conv 16 -> 32, k=3, p=1 + CUBA (fused)
    p2 = conv_patches(x, 3, 1)                               # [T, 144, N*16*16]
    spikes, cnt = conv_cuba_block(p2, conv_weight_matrix(params["conv2"]))
    counts.append(cnt / (spikes.shape[1] * spikes.shape[2] * T))
    x = spikes.reshape(T, 32, n, h, w)

    # block 4: Pool(2, 2) + CUBA
    z, (c, n, h, w) = pool_to_z(x, 2)
    spikes, cnt = cuba_block(z)
    counts.append(cnt / (z.shape[1] * T))
    x = spikes.reshape(T, c, n, h, w)                        # [T, 32, N, 8, 8]

    # block 5: Flatten (features ordered (c, h, w), matching PyTorch flatten)
    counts.append(counts[-1])
    x = jnp.transpose(x, (0, 2, 1, 3, 4)).reshape(T, n, c * h * w)

    # block 6: Dense 2048 -> 512 + CUBA (fused, Fout-tiled)
    s, cnt = dense_cuba_block(x, params["dense1"].astype(SPIKE_DTYPE))
    counts.append(cnt / (n * 512 * T))
    # block 7: Dense 512 -> 4 + CUBA (fused)
    s, cnt = dense_cuba_block(s, params["dense2"].astype(SPIKE_DTYPE))
    counts.append(cnt / (n * 4 * T))

    out = jnp.transpose(s, (1, 2, 0)).astype(jnp.float32)    # [N, 4, T]
    count = jnp.stack(counts).astype(jnp.float32).reshape(1, -1)
    return out, count


# ---------------------------------------------------------------------------
# Deterministic parameter init (weight_norm at init == raw weight)
# ---------------------------------------------------------------------------
def init_params(key):
    k1, k2, k3, k4 = jax.random.split(key, 4)

    def winit(k, shape, fan_in):
        return jax.random.normal(k, shape, jnp.float32) / math.sqrt(fan_in)

    return {
        "conv1":  winit(k1, (16, 2, 5, 5), 2 * 5 * 5),
        "conv2":  winit(k2, (32, 16, 3, 3), 16 * 3 * 3),
        # Dense weights stored as (in_features, out_features); input features are
        # ordered (c, h, w) like PyTorch's flatten.
        "dense1": winit(k3, (8 * 8 * 32, 512), 8 * 8 * 32),
        "dense2": winit(k4, (512, 4), 512),
    }


if __name__ == "__main__":
    key = jax.random.PRNGKey(0)
    pkey, xkey = jax.random.split(key)
    params = init_params(pkey)

    # DVS-style input spikes, NCHWT. Spatial 128x128 is implied by the module
    # (Dense in_neurons = 8*8*32 after 4x,2x,2x pooling). Small batch & T.
    N, C, H, W, T = 2, 2, 128, 128, 4
    spike_in = jax.random.bernoulli(xkey, 0.3, (N, C, H, W, T)).astype(jnp.float32)

    fwd = jax.jit(network_forward)
    out_spike, count = fwd(spike_in, params)
    jax.block_until_ready((out_spike, count))

    assert out_spike.shape == (N, 4, T)
    assert count.shape == (1, 8)
    print("KERNEL_OK")
</pallas_src>

<mosaic_0001>
module attributes {stable_mosaic.version = 11 : i64} {
  func.func @_cuba_kernel(%arg0: i32, %arg1: memref<4x8x256xf32, #tpu.memory_space<vmem>>, %arg2: memref<4x8x256xbf16, #tpu.memory_space<vmem>>, %arg3: memref<1x8x128xf32, #tpu.memory_space<vmem>>) attributes {dimension_semantics = [#tpu.dimension_semantics<parallel>], iteration_bounds = array<i64: 2>, scalar_prefetch = 0 : i64, scratch_operands = 0 : i64, tpu.core_type = #tpu.core_type<tc>, window_params = [{transform_indices = @transform_0, window_bounds = array<i64: 4, 8, 256>}, {transform_indices = @transform_1, window_bounds = array<i64: 4, 8, 256>}, {transform_indices = @transform_2, window_bounds = array<i64: 1, 8, 128>}]} {
    %cst = arith.constant 0.000000e+00 : f32
    %0 = vector.broadcast %cst : f32 to vector<8x256xf32>
    %cst_0 = arith.constant 0.000000e+00 : f32
    %1 = vector.broadcast %cst_0 : f32 to vector<8x256xf32>
    %cst_1 = arith.constant 0.000000e+00 : bf16
    %2 = vector.broadcast %cst_1 : bf16 to vector<8x256xbf16>
    %c0 = arith.constant 0 : index
    %c0_2 = arith.constant 0 : index
    %c0_3 = arith.constant 0 : index
    %3 = vector.load %arg2[%c0, %c0_2, %c0_3] : memref<4x8x256xbf16, #tpu.memory_space<vmem>>, vector<1x8x256xbf16>
    %4 = vector.shape_cast %3 : vector<1x8x256xbf16> to vector<8x256xbf16>
    %5 = vector.shape_cast %2 : vector<8x256xbf16> to vector<1x8x256xbf16>
    tpu.vector_store %arg2[%c0, %c0_2, %c0_3], %5 {strides = array<i32>} : memref<4x8x256xbf16, #tpu.memory_space<vmem>>, vector<1x8x256xbf16>,
    %cst_4 = arith.constant 7.500000e-01 : f32
    %6 = vector.broadcast %cst_4 : f32 to vector<8x256xf32>
    %7 = arith.mulf %0, %6 : vector<8x256xf32>
    %c0_5 = arith.constant 0 : index
    %c0_6 = arith.constant 0 : index
    %c0_7 = arith.constant 0 : index
    %8 = vector.load %arg1[%c0_5, %c0_6, %c0_7] : memref<4x8x256xf32, #tpu.memory_space<vmem>>, vector<1x8x256xf32>
    %9 = vector.shape_cast %8 : vector<1x8x256xf32> to vector<8x256xf32>
    %10 = arith.addf %7, %9 : vector<8x256xf32>
    %cst_8 = arith.constant 0.969970703 : f32
    %11 = vector.broadcast %cst_8 : f32 to vector<8x256xf32>
    %12 = arith.mulf %1, %11 : vector<8x256xf32>
    %13 = arith.addf %12, %10 : vector<8x256xf32>
    %cst_9 = arith.constant 1.250000e+00 : f32
    %14 = vector.broadcast %cst_9 : f32 to vector<8x256xf32>
    %15 = arith.cmpf oge, %13, %14 : vector<8x256xf32>
    %cst_10 = arith.constant 0.000000e+00 : f32
    %16 = vector.broadcast %cst_10 : f32 to vector<8x256xf32>
    %17 = arith.select %15, %16, %13 : vector<8x256xi1>, vector<8x256xf32>
    %18 = arith.extui %15 : vector<8x256xi1> to vector<8x256xi32>
    %19 = arith.sitofp %18 : vector<8x256xi32> to vector<8x256xf32>
    %20 = arith.truncf %19 : vector<8x256xf32> to vector<8x256xbf16>
    %c1 = arith.constant 1 : index
    %c0_11 = arith.constant 0 : index
    %c0_12 = arith.constant 0 : index
    %21 = vector.load %arg2[%c1, %c0_11, %c0_12] : memref<4x8x256xbf16, #tpu.memory_space<vmem>>, vector<1x8x256xbf16>
    %22 = vector.shape_cast %21 : vector<1x8x256xbf16> to vector<8x256xbf16>
    %23 = vector.shape_cast %20 : vector<8x256xbf16> to vector<1x8x256xbf16>
    tpu.vector_store %arg2[%c1, %c0_11, %c0_12], %23 {strides = array<i32>} : memref<4x8x256xbf16, #tpu.memory_space<vmem>>, vector<1x8x256xbf16>,
    %24 = vector.shape_cast %19 : vector<8x256xf32> to vector<1x8x256xf32>
    %cst_13 = arith.constant dense<0.000000e+00> : vector<1xf32>
    %25 = vector.multi_reduction <add>, %24, %cst_13 [1, 2] : vector<1x8x256xf32> to vector<1xf32>
    %26 = vector.shape_cast %25 : vector<1xf32> to vector<1x1x1xf32>
    %27 = vector.extract %26[0, 0, 0] : f32 from vector<1x1x1xf32>
    %cst_14 = arith.constant 0.000000e+00 : f32
    %28 = arith.addf %cst_14, %27 : f32
    %cst_15 = arith.constant 7.500000e-01 : f32
    %29 = vector.broadcast %cst_15 : f32 to vector<8x256xf32>
    %30 = arith.mulf %10, %29 : vector<8x256xf32>
    %c1_16 = arith.constant 1 : index
    %c0_17 = arith.constant 0 : index
    %c0_18 = arith.constant 0 : index
    %31 = vector.load %arg1[%c1_16, %c0_17, %c0_18] : memref<4x8x256xf32, #tpu.memory_space<vmem>>, vector<1x8x256xf32>
    %32 = vector.shape_cast %31 : vector<1x8x256xf32> to vector<8x256xf32>
    %33 = arith.addf %30, %32 : vector<8x256xf32>
    %cst_19 = arith.constant 0.969970703 : f32
    %34 = vector.broadcast %cst_19 : f32 to vector<8x256xf32>
    %35 = arith.mulf %17, %34 : vector<8x256xf32>
    %36 = arith.addf %35, %33 : vector<8x256xf32>
    %cst_20 = arith.constant 1.250000e+00 : f32
    %37 = vector.broadcast %cst_20 : f32 to vector<8x256xf32>
    %38 = arith.cmpf oge, %36, %37 : vector<8x256xf32>
    %cst_21 = arith.constant 0.000000e+00 : f32
    %39 = vector.broadcast %cst_21 : f32 to vector<8x256xf32>
    %40 = arith.select %38, %39, %36 : vector<8x256xi1>, vector<8x256xf32>
    %41 = arith.extui %38 : vector<8x256xi1> to vector<8x256xi32>
    %42 = arith.sitofp %41 : vector<8x256xi32> to vector<8x256xf32>
    %43 = arith.truncf %42 : vector<8x256xf32> to vector<8x256xbf16>
    %c2 = arith.constant 2 : index
    %c0_22 = arith.constant 0 : index
    %c0_23 = arith.constant 0 : index
    %44 = vector.load %arg2[%c2, %c0_22, %c0_23] : memref<4x8x256xbf16, #tpu.memory_space<vmem>>, vector<1x8x256xbf16>
    %45 = vector.shape_cast %44 : vector<1x8x256xbf16> to vector<8x256xbf16>
    %46 = vector.shape_cast %43 : vector<8x256xbf16> to vector<1x8x256xbf16>
    tpu.vector_store %arg2[%c2, %c0_22, %c0_23], %46 {strides = array<i32>} : memref<4x8x256xbf16, #tpu.memory_space<vmem>>, vector<1x8x256xbf16>,
    %47 = vector.shape_cast %42 : vector<8x256xf32> to vector<1x8x256xf32>
    %cst_24 = arith.constant dense<0.000000e+00> : vector<1xf32>
    %48 = vector.multi_reduction <add>, %47, %cst_24 [1, 2] : vector<1x8x256xf32> to vector<1xf32>
    %49 = vector.shape_cast %48 : vector<1xf32> to vector<1x1x1xf32>
    %50 = vector.extract %49[0, 0, 0] : f32 from vector<1x1x1xf32>
    %51 = arith.addf %28, %50 : f32
    %cst_25 = arith.constant 7.500000e-01 : f32
    %52 = vector.broadcast %cst_25 : f32 to vector<8x256xf32>
    %53 = arith.mulf %33, %52 : vector<8x256xf32>
    %c2_26 = arith.constant 2 : index
    %c0_27 = arith.constant 0 : index
    %c0_28 = arith.constant 0 : index
    %54 = vector.load %arg1[%c2_26, %c0_27, %c0_28] : memref<4x8x256xf32, #tpu.memory_space<vmem>>, vector<1x8x256xf32>
    %55 = vector.shape_cast %54 : vector<1x8x256xf32> to vector<8x256xf32>
    %56 = arith.addf %53, %55 : vector<8x256xf32>
    %cst_29 = arith.constant 0.969970703 : f32
    %57 = vector.broadcast %cst_29 : f32 to vector<8x256xf32>
    %58 = arith.mulf %40, %57 : vector<8x256xf32>
    %59 = arith.addf %58, %56 : vector<8x256xf32>
    %cst_30 = arith.constant 1.250000e+00 : f32
    %60 = vector.broadcast %cst_30 : f32 to vector<8x256xf32>
    %61 = arith.cmpf oge, %59, %60 : vector<8x256xf32>
    %62 = arith.extui %61 : vector<8x256xi1> to vector<8x256xi32>
    %63 = arith.sitofp %62 : vector<8x256xi32> to vector<8x256xf32>
    %64 = arith.truncf %63 : vector<8x256xf32> to vector<8x256xbf16>
    %c3 = arith.constant 3 : index
    %c0_31 = arith.constant 0 : index
    %c0_32 = arith.constant 0 : index
    %65 = vector.load %arg2[%c3, %c0_31, %c0_32] : memref<4x8x256xbf16, #tpu.memory_space<vmem>>, vector<1x8x256xbf16>
    %66 = vector.shape_cast %65 : vector<1x8x256xbf16> to vector<8x256xbf16>
    %67 = vector.shape_cast %64 : vector<8x256xbf16> to vector<1x8x256xbf16>
    tpu.vector_store %arg2[%c3, %c0_31, %c0_32], %67 {strides = array<i32>} : memref<4x8x256xbf16, #tpu.memory_space<vmem>>, vector<1x8x256xbf16>,
    %68 = vector.shape_cast %63 : vector<8x256xf32> to vector<1x8x256xf32>
    %cst_33 = arith.constant dense<0.000000e+00> : vector<1xf32>
    %69 = vector.multi_reduction <add>, %68, %cst_33 [1, 2] : vector<1x8x256xf32> to vector<1xf32>
    %70 = vector.shape_cast %69 : vector<1xf32> to vector<1x1x1xf32>
    %71 = vector.extract %70[0, 0, 0] : f32 from vector<1x1x1xf32>
    %72 = arith.addf %51, %71 : f32
    %cst_34 = arith.constant 0.000000e+00 : f32
    %73 = vector.broadcast %cst_34 : f32 to vector<1x8x128xf32>
    %74 = vector.broadcast %72 : f32 to vector<1x8x128xf32>
    %75 = arith.addf %73, %74 : vector<1x8x128xf32>
    %c0_35 = arith.constant 0 : index
    %c0_36 = arith.constant 0 : index
    %c0_37 = arith.constant 0 : index
    %76 = vector.load %arg3[%c0_35, %c0_36, %c0_37] : memref<1x8x128xf32, #tpu.memory_space<vmem>>, vector<1x8x128xf32>
    tpu.vector_store %arg3[%c0_35, %c0_36, %c0_37], %75 {strides = array<i32>} : memref<1x8x128xf32, #tpu.memory_space<vmem>>, vector<1x8x128xf32>,
    return
  }
  func.func @transform_0(%arg0: i32) -> (i32, i32, i32) {
    %c0_i32 = arith.constant 0 : i32
    %c0_i32_0 = arith.constant 0 : i32
    %c0_i32_1 = arith.constant 0 : i32
    return %c0_i32, %c0_i32_0, %arg0 : i32, i32, i32
  }
  func.func @transform_1(%arg0: i32) -> (i32, i32, i32) {
    %c0_i32 = arith.constant 0 : i32
    %c0_i32_0 = arith.constant 0 : i32
    %c0_i32_1 = arith.constant 0 : i32
    return %c0_i32, %c0_i32_0, %arg0 : i32, i32, i32
  }
  func.func @transform_2(%arg0: i32) -> (i32, i32, i32) {
    %c0_i32 = arith.constant 0 : i32
    %c0_i32_0 = arith.constant 0 : i32
    %c0_i32_1 = arith.constant 0 : i32
    return %arg0, %c0_i32, %c0_i32_0 : i32, i32, i32
  }
}

module attributes {stable_mosaic.version = 11 : i64} {
  func.func @_conv_cuba_kernel(%arg0: i32, %arg1: memref<4x50x512xbf16, #tpu.memory_space<vmem>>, %arg2: memref<16x50xbf16, #tpu.memory_space<vmem>>, %arg3: memref<4x16x512xbf16, #tpu.memory_space<vmem>>, %arg4: memref<1x8x128xf32, #tpu.memory_space<vmem>>) attributes {dimension_semantics = [#tpu.dimension_semantics<parallel>], iteration_bounds = array<i64: 4>, scalar_prefetch = 0 : i64, scratch_operands = 0 : i64, tpu.core_type = #tpu.core_type<tc>, window_params = [{transform_indices = @transform_0, window_bounds = array<i64: 4, 50, 512>}, {pipeline_mode = #tpu.pipeline_mode<synchronous>, transform_indices = @transform_1, window_bounds = array<i64: 16, 50>}, {transform_indices = @transform_2, window_bounds = array<i64: 4, 16, 512>}, {transform_indices = @transform_3, window_bounds = array<i64: 1, 8, 128>}]} {
    %c0 = arith.constant 0 : index
    %c0_0 = arith.constant 0 : index
    %0 = vector.load %arg2[%c0, %c0_0] : memref<16x50xbf16, #tpu.memory_space<vmem>>, vector<16x50xbf16>
    %cst = arith.constant 0.000000e+00 : f32
    %1 = vector.broadcast %cst : f32 to vector<16x512xf32>
    %cst_1 = arith.constant 0.000000e+00 : f32
    %2 = vector.broadcast %cst_1 : f32 to vector<16x512xf32>
    %cst_2 = arith.constant 0.000000e+00 : bf16
    %3 = vector.broadcast %cst_2 : bf16 to vector<16x512xbf16>
    %c0_3 = arith.constant 0 : index
    %c0_4 = arith.constant 0 : index
    %c0_5 = arith.constant 0 : index
    %4 = vector.load %arg3[%c0_3, %c0_4, %c0_5] : memref<4x16x512xbf16, #tpu.memory_space<vmem>>, vector<1x16x512xbf16>
    %5 = vector.shape_cast %4 : vector<1x16x512xbf16> to vector<16x512xbf16>
    %6 = vector.shape_cast %3 : vector<16x512xbf16> to vector<1x16x512xbf16>
    tpu.vector_store %arg3[%c0_3, %c0_4, %c0_5], %6 {strides = array<i32>} : memref<4x16x512xbf16, #tpu.memory_space<vmem>>, vector<1x16x512xbf16>,
    %cst_6 = arith.constant 7.500000e-01 : f32
    %7 = vector.broadcast %cst_6 : f32 to vector<16x512xf32>
    %8 = arith.mulf %1, %7 : vector<16x512xf32>
    %c0_7 = arith.constant 0 : index
    %c0_8 = arith.constant 0 : index
    %c0_9 = arith.constant 0 : index
    %9 = vector.load %arg1[%c0_7, %c0_8, %c0_9] : memref<4x50x512xbf16, #tpu.memory_space<vmem>>, vector<1x50x512xbf16>
    %10 = vector.shape_cast %9 : vector<1x50x512xbf16> to vector<50x512xbf16>
    %cst_10 = arith.constant dense<0.000000e+00> : vector<16x512xf32>
    %11 = tpu.matmul %0, %10, %cst_10 {dimension_numbers = #tpu.dot_dimension_numbers<[1], [0], [0], [1], [0, 0, 1, 1], [], []>} : vector<16x50xbf16>, vector<50x512xbf16>, vector<16x512xf32> -> vector<16x512xf32>
    %12 = arith.addf %8, %11 : vector<16x512xf32>
    %cst_11 = arith.constant 0.969970703 : f32
    %13 = vector.broadcast %cst_11 : f32 to vector<16x512xf32>
    %14 = arith.mulf %2, %13 : vector<16x512xf32>
    %15 = arith.addf %14, %12 : vector<16x512xf32>
    %cst_12 = arith.constant 1.250000e+00 : f32
    %16 = vector.broadcast %cst_12 : f32 to vector<16x512xf32>
    %17 = arith.cmpf oge, %15, %16 : vector<16x512xf32>
    %cst_13 = arith.constant 0.000000e+00 : f32
    %18 = vector.broadcast %cst_13 : f32 to vector<16x512xf32>
    %19 = arith.select %17, %18, %15 : vector<16x512xi1>, vector<16x512xf32>
    %20 = arith.extui %17 : vector<16x512xi1> to vector<16x512xi32>
    %21 = arith.sitofp %20 : vector<16x512xi32> to vector<16x512xf32>
    %22 = arith.truncf %21 : vector<16x512xf32> to vector<16x512xbf16>
    %c1 = arith.constant 1 : index
    %c0_14 = arith.constant 0 : index
    %c0_15 = arith.constant 0 : index
    %23 = vector.load %arg3[%c1, %c0_14, %c0_15] : memref<4x16x512xbf16, #tpu.memory_space<vmem>>, vector<1x16x512xbf16>
    %24 = vector.shape_cast %23 : vector<1x16x512xbf16> to vector<16x512xbf16>
    %25 = vector.shape_cast %22 : vector<16x512xbf16> to vector<1x16x512xbf16>
    tpu.vector_store %arg3[%c1, %c0_14, %c0_15], %25 {strides = array<i32>} : memref<4x16x512xbf16, #tpu.memory_space<vmem>>, vector<1x16x512xbf16>,
    %26 = vector.shape_cast %21 : vector<16x512xf32> to vector<1x16x512xf32>
    %cst_16 = arith.constant dense<0.000000e+00> : vector<1xf32>
    %27 = vector.multi_reduction <add>, %26, %cst_16 [1, 2] : vector<1x16x512xf32> to vector<1xf32>
    %28 = vector.shape_cast %27 : vector<1xf32> to vector<1x1x1xf32>
    %29 = vector.extract %28[0, 0, 0] : f32 from vector<1x1x1xf32>
    %cst_17 = arith.constant 0.000000e+00 : f32
    %30 = arith.addf %cst_17, %29 : f32
    %cst_18 = arith.constant 7.500000e-01 : f32
    %31 = vector.broadcast %cst_18 : f32 to vector<16x512xf32>
    %32 = arith.mulf %12, %31 : vector<16x512xf32>
    %c1_19 = arith.constant 1 : index
    %c0_20 = arith.constant 0 : index
    %c0_21 = arith.constant 0 : index
    %33 = vector.load %arg1[%c1_19, %c0_20, %c0_21] : memref<4x50x512xbf16, #tpu.memory_space<vmem>>, vector<1x50x512xbf16>
    %34 = vector.shape_cast %33 : vector<1x50x512xbf16> to vector<50x512xbf16>
    %cst_22 = arith.constant dense<0.000000e+00> : vector<16x512xf32>
    %35 = tpu.matmul %0, %34, %cst_22 {dimension_numbers = #tpu.dot_dimension_numbers<[1], [0], [0], [1], [0, 0, 1, 1], [], []>} : vector<16x50xbf16>, vector<50x512xbf16>, vector<16x512xf32> -> vector<16x512xf32>
    %36 = arith.addf %32, %35 : vector<16x512xf32>
    %cst_23 = arith.constant 0.969970703 : f32
    %37 = vector.broadcast %cst_23 : f32 to vector<16x512xf32>
    %38 = arith.mulf %19, %37 : vector<16x512xf32>
    %39 = arith.addf %38, %36 : vector<16x512xf32>
    %cst_24 = arith.constant 1.250000e+00 : f32
    %40 = vector.broadcast %cst_24 : f32 to vector<16x512xf32>
    %41 = arith.cmpf oge, %39, %40 : vector<16x512xf32>
    %cst_25 = arith.constant 0.000000e+00 : f32
    %42 = vector.broadcast %cst_25 : f32 to vector<16x512xf32>
    %43 = arith.select %41, %42, %39 : vector<16x512xi1>, vector<16x512xf32>
    %44 = arith.extui %41 : vector<16x512xi1> to vector<16x512xi32>
    %45 = arith.sitofp %44 : vector<16x512xi32> to vector<16x512xf32>
    %46 = arith.truncf %45 : vector<16x512xf32> to vector<16x512xbf16>
    %c2 = arith.constant 2 : index
    %c0_26 = arith.constant 0 : index
    %c0_27 = arith.constant 0 : index
    %47 = vector.load %arg3[%c2, %c0_26, %c0_27] : memref<4x16x512xbf16, #tpu.memory_space<vmem>>, vector<1x16x512xbf16>
    %48 = vector.shape_cast %47 : vector<1x16x512xbf16> to vector<16x512xbf16>
    %49 = vector.shape_cast %46 : vector<16x512xbf16> to vector<1x16x512xbf16>
    tpu.vector_store %arg3[%c2, %c0_26, %c0_27], %49 {strides = array<i32>} : memref<4x16x512xbf16, #tpu.memory_space<vmem>>, vector<1x16x512xbf16>,
    %50 = vector.shape_cast %45 : vector<16x512xf32> to vector<1x16x512xf32>
    %cst_28 = arith.constant dense<0.000000e+00> : vector<1xf32>
    %51 = vector.multi_reduction <add>, %50, %cst_28 [1, 2] : vector<1x16x512xf32> to vector<1xf32>
    %52 = vector.shape_cast %51 : vector<1xf32> to vector<1x1x1xf32>
    %53 = vector.extract %52[0, 0, 0] : f32 from vector<1x1x1xf32>
    %54 = arith.addf %30, %53 : f32
    %cst_29 = arith.constant 7.500000e-01 : f32
    %55 = vector.broadcast %cst_29 : f32 to vector<16x512xf32>
    %56 = arith.mulf %36, %55 : vector<16x512xf32>
    %c2_30 = arith.constant 2 : index
    %c0_31 = arith.constant 0 : index
    %c0_32 = arith.constant 0 : index
    %57 = vector.load %arg1[%c2_30, %c0_31, %c0_32] : memref<4x50x512xbf16, #tpu.memory_space<vmem>>, vector<1x50x512xbf16>
    %58 = vector.shape_cast %57 : vector<1x50x512xbf16> to vector<50x512xbf16>
    %cst_33 = arith.constant dense<0.000000e+00> : vector<16x512xf32>
    %59 = tpu.matmul %0, %58, %cst_33 {dimension_numbers = #tpu.dot_dimension_numbers<[1], [0], [0], [1], [0, 0, 1, 1], [], []>} : vector<16x50xbf16>, vector<50x512xbf16>, vector<16x512xf32> -> vector<16x512xf32>
    %60 = arith.addf %56, %59 : vector<16x512xf32>
    %cst_34 = arith.constant 0.969970703 : f32
    %61 = vector.broadcast %cst_34 : f32 to vector<16x512xf32>
    %62 = arith.mulf %43, %61 : vector<16x512xf32>
    %63 = arith.addf %62, %60 : vector<16x512xf32>
    %cst_35 = arith.constant 1.250000e+00 : f32
    %64 = vector.broadcast %cst_35 : f32 to vector<16x512xf32>
    %65 = arith.cmpf oge, %63, %64 : vector<16x512xf32>
    %66 = arith.extui %65 : vector<16x512xi1> to vector<16x512xi32>
    %67 = arith.sitofp %66 : vector<16x512xi32> to vector<16x512xf32>
    %68 = arith.truncf %67 : vector<16x512xf32> to vector<16x512xbf16>
    %c3 = arith.constant 3 : index
    %c0_36 = arith.constant 0 : index
    %c0_37 = arith.constant 0 : index
    %69 = vector.load %arg3[%c3, %c0_36, %c0_37] : memref<4x16x512xbf16, #tpu.memory_space<vmem>>, vector<1x16x512xbf16>
    %70 = vector.shape_cast %69 : vector<1x16x512xbf16> to vector<16x512xbf16>
    %71 = vector.shape_cast %68 : vector<16x512xbf16> to vector<1x16x512xbf16>
    tpu.vector_store %arg3[%c3, %c0_36, %c0_37], %71 {strides = array<i32>} : memref<4x16x512xbf16, #tpu.memory_space<vmem>>, vector<1x16x512xbf16>,
    %72 = vector.shape_cast %67 : vector<16x512xf32> to vector<1x16x512xf32>
    %cst_38 = arith.constant dense<0.000000e+00> : vector<1xf32>
    %73 = vector.multi_reduction <add>, %72, %cst_38 [1, 2] : vector<1x16x512xf32> to vector<1xf32>
    %74 = vector.shape_cast %73 : vector<1xf32> to vector<1x1x1xf32>
    %75 = vector.extract %74[0, 0, 0] : f32 from vector<1x1x1xf32>
    %76 = arith.addf %54, %75 : f32
    %cst_39 = arith.constant 0.000000e+00 : f32
    %77 = vector.broadcast %cst_39 : f32 to vector<1x8x128xf32>
    %78 = vector.broadcast %76 : f32 to vector<1x8x128xf32>
    %79 = arith.addf %77, %78 : vector<1x8x128xf32>
    %c0_40 = arith.constant 0 : index
    %c0_41 = arith.constant 0 : index
    %c0_42 = arith.constant 0 : index
    %80 = vector.load %arg4[%c0_40, %c0_41, %c0_42] : memref<1x8x128xf32, #tpu.memory_space<vmem>>, vector<1x8x128xf32>
    tpu.vector_store %arg4[%c0_40, %c0_41, %c0_42], %79 {strides = array<i32>} : memref<1x8x128xf32, #tpu.memory_space<vmem>>, vector<1x8x128xf32>,
    return
  }
  func.func @transform_0(%arg0: i32) -> (i32, i32, i32) {
    %c0_i32 = arith.constant 0 : i32
    %c0_i32_0 = arith.constant 0 : i32
    %c0_i32_1 = arith.constant 0 : i32
    return %c0_i32, %c0_i32_0, %arg0 : i32, i32, i32
  }
  func.func @transform_1(%arg0: i32) -> (i32, i32) {
    %c0_i32 = arith.constant 0 : i32
    %c0_i32_0 = arith.constant 0 : i32
    %c0_i32_1 = arith.constant 0 : i32
    return %c0_i32, %c0_i32_0 : i32, i32
  }
  func.func @transform_2(%arg0: i32) -> (i32, i32, i32) {
    %c0_i32 = arith.constant 0 : i32
    %c0_i32_0 = arith.constant 0 : i32
    %c0_i32_1 = arith.constant 0 : i32
    return %c0_i32, %c0_i32_0, %arg0 : i32, i32, i32
  }
  func.func @transform_3(%arg0: i32) -> (i32, i32, i32) {
    %c0_i32 = arith.constant 0 : i32
    %c0_i32_0 = arith.constant 0 : i32
    %c0_i32_1 = arith.constant 0 : i32
    return %arg0, %c0_i32, %c0_i32_0 : i32, i32, i32
  }
}

module attributes {stable_mosaic.version = 11 : i64} {
  func.func @_cuba_kernel(%arg0: i32, %arg1: memref<4x8x512xf32, #tpu.memory_space<vmem>>, %arg2: memref<4x8x512xbf16, #tpu.memory_space<vmem>>, %arg3: memref<1x8x128xf32, #tpu.memory_space<vmem>>) attributes {dimension_semantics = [#tpu.dimension_semantics<parallel>], iteration_bounds = array<i64: 2>, scalar_prefetch = 0 : i64, scratch_operands = 0 : i64, tpu.core_type = #tpu.core_type<tc>, window_params = [{transform_indices = @transform_0, window_bounds = array<i64: 4, 8, 512>}, {transform_indices = @transform_1, window_bounds = array<i64: 4, 8, 512>}, {transform_indices = @transform_2, window_bounds = array<i64: 1, 8, 128>}]} {
    %cst = arith.constant 0.000000e+00 : f32
    %0 = vector.broadcast %cst : f32 to vector<8x512xf32>
    %cst_0 = arith.constant 0.000000e+00 : f32
    %1 = vector.broadcast %cst_0 : f32 to vector<8x512xf32>
    %cst_1 = arith.constant 0.000000e+00 : bf16
    %2 = vector.broadcast %cst_1 : bf16 to vector<8x512xbf16>
    %c0 = arith.constant 0 : index
    %c0_2 = arith.constant 0 : index
    %c0_3 = arith.constant 0 : index
    %3 = vector.load %arg2[%c0, %c0_2, %c0_3] : memref<4x8x512xbf16, #tpu.memory_space<vmem>>, vector<1x8x512xbf16>
    %4 = vector.shape_cast %3 : vector<1x8x512xbf16> to vector<8x512xbf16>
    %5 = vector.shape_cast %2 : vector<8x512xbf16> to vector<1x8x512xbf16>
    tpu.vector_store %arg2[%c0, %c0_2, %c0_3], %5 {strides = array<i32>} : memref<4x8x512xbf16, #tpu.memory_space<vmem>>, vector<1x8x512xbf16>,
    %cst_4 = arith.constant 7.500000e-01 : f32
    %6 = vector.broadcast %cst_4 : f32 to vector<8x512xf32>
    %7 = arith.mulf %0, %6 : vector<8x512xf32>
    %c0_5 = arith.constant 0 : index
    %c0_6 = arith.constant 0 : index
    %c0_7 = arith.constant 0 : index
    %8 = vector.load %arg1[%c0_5, %c0_6, %c0_7] : memref<4x8x512xf32, #tpu.memory_space<vmem>>, vector<1x8x512xf32>
    %9 = vector.shape_cast %8 : vector<1x8x512xf32> to vector<8x512xf32>
    %10 = arith.addf %7, %9 : vector<8x512xf32>
    %cst_8 = arith.constant 0.969970703 : f32
    %11 = vector.broadcast %cst_8 : f32 to vector<8x512xf32>
    %12 = arith.mulf %1, %11 : vector<8x512xf32>
    %13 = arith.addf %12, %10 : vector<8x512xf32>
    %cst_9 = arith.constant 1.250000e+00 : f32
    %14 = vector.broadcast %cst_9 : f32 to vector<8x512xf32>
    %15 = arith.cmpf oge, %13, %14 : vector<8x512xf32>
    %cst_10 = arith.constant 0.000000e+00 : f32
    %16 = vector.broadcast %cst_10 : f32 to vector<8x512xf32>
    %17 = arith.select %15, %16, %13 : vector<8x512xi1>, vector<8x512xf32>
    %18 = arith.extui %15 : vector<8x512xi1> to vector<8x512xi32>
    %19 = arith.sitofp %18 : vector<8x512xi32> to vector<8x512xf32>
    %20 = arith.truncf %19 : vector<8x512xf32> to vector<8x512xbf16>
    %c1 = arith.constant 1 : index
    %c0_11 = arith.constant 0 : index
    %c0_12 = arith.constant 0 : index
    %21 = vector.load %arg2[%c1, %c0_11, %c0_12] : memref<4x8x512xbf16, #tpu.memory_space<vmem>>, vector<1x8x512xbf16>
    %22 = vector.shape_cast %21 : vector<1x8x512xbf16> to vector<8x512xbf16>
    %23 = vector.shape_cast %20 : vector<8x512xbf16> to vector<1x8x512xbf16>
    tpu.vector_store %arg2[%c1, %c0_11, %c0_12], %23 {strides = array<i32>} : memref<4x8x512xbf16, #tpu.memory_space<vmem>>, vector<1x8x512xbf16>,
    %24 = vector.shape_cast %19 : vector<8x512xf32> to vector<1x8x512xf32>
    %cst_13 = arith.constant dense<0.000000e+00> : vector<1xf32>
    %25 = vector.multi_reduction <add>, %24, %cst_13 [1, 2] : vector<1x8x512xf32> to vector<1xf32>
    %26 = vector.shape_cast %25 : vector<1xf32> to vector<1x1x1xf32>
    %27 = vector.extract %26[0, 0, 0] : f32 from vector<1x1x1xf32>
    %cst_14 = arith.constant 0.000000e+00 : f32
    %28 = arith.addf %cst_14, %27 : f32
    %cst_15 = arith.constant 7.500000e-01 : f32
    %29 = vector.broadcast %cst_15 : f32 to vector<8x512xf32>
    %30 = arith.mulf %10, %29 : vector<8x512xf32>
    %c1_16 = arith.constant 1 : index
    %c0_17 = arith.constant 0 : index
    %c0_18 = arith.constant 0 : index
    %31 = vector.load %arg1[%c1_16, %c0_17, %c0_18] : memref<4x8x512xf32, #tpu.memory_space<vmem>>, vector<1x8x512xf32>
    %32 = vector.shape_cast %31 : vector<1x8x512xf32> to vector<8x512xf32>
    %33 = arith.addf %30, %32 : vector<8x512xf32>
    %cst_19 = arith.constant 0.969970703 : f32
    %34 = vector.broadcast %cst_19 : f32 to vector<8x512xf32>
    %35 = arith.mulf %17, %34 : vector<8x512xf32>
    %36 = arith.addf %35, %33 : vector<8x512xf32>
    %cst_20 = arith.constant 1.250000e+00 : f32
    %37 = vector.broadcast %cst_20 : f32 to vector<8x512xf32>
    %38 = arith.cmpf oge, %36, %37 : vector<8x512xf32>
    %cst_21 = arith.constant 0.000000e+00 : f32
    %39 = vector.broadcast %cst_21 : f32 to vector<8x512xf32>
    %40 = arith.select %38, %39, %36 : vector<8x512xi1>, vector<8x512xf32>
    %41 = arith.extui %38 : vector<8x512xi1> to vector<8x512xi32>
    %42 = arith.sitofp %41 : vector<8x512xi32> to vector<8x512xf32>
    %43 = arith.truncf %42 : vector<8x512xf32> to vector<8x512xbf16>
    %c2 = arith.constant 2 : index
    %c0_22 = arith.constant 0 : index
    %c0_23 = arith.constant 0 : index
    %44 = vector.load %arg2[%c2, %c0_22, %c0_23] : memref<4x8x512xbf16, #tpu.memory_space<vmem>>, vector<1x8x512xbf16>
    %45 = vector.shape_cast %44 : vector<1x8x512xbf16> to vector<8x512xbf16>
    %46 = vector.shape_cast %43 : vector<8x512xbf16> to vector<1x8x512xbf16>
    tpu.vector_store %arg2[%c2, %c0_22, %c0_23], %46 {strides = array<i32>} : memref<4x8x512xbf16, #tpu.memory_space<vmem>>, vector<1x8x512xbf16>,
    %47 = vector.shape_cast %42 : vector<8x512xf32> to vector<1x8x512xf32>
    %cst_24 = arith.constant dense<0.000000e+00> : vector<1xf32>
    %48 = vector.multi_reduction <add>, %47, %cst_24 [1, 2] : vector<1x8x512xf32> to vector<1xf32>
    %49 = vector.shape_cast %48 : vector<1xf32> to vector<1x1x1xf32>
    %50 = vector.extract %49[0, 0, 0] : f32 from vector<1x1x1xf32>
    %51 = arith.addf %28, %50 : f32
    %cst_25 = arith.constant 7.500000e-01 : f32
    %52 = vector.broadcast %cst_25 : f32 to vector<8x512xf32>
    %53 = arith.mulf %33, %52 : vector<8x512xf32>
    %c2_26 = arith.constant 2 : index
    %c0_27 = arith.constant 0 : index
    %c0_28 = arith.constant 0 : index
    %54 = vector.load %arg1[%c2_26, %c0_27, %c0_28] : memref<4x8x512xf32, #tpu.memory_space<vmem>>, vector<1x8x512xf32>
    %55 = vector.shape_cast %54 : vector<1x8x512xf32> to vector<8x512xf32>
    %56 = arith.addf %53, %55 : vector<8x512xf32>
    %cst_29 = arith.constant 0.969970703 : f32
    %57 = vector.broadcast %cst_29 : f32 to vector<8x512xf32>
    %58 = arith.mulf %40, %57 : vector<8x512xf32>
    %59 = arith.addf %58, %56 : vector<8x512xf32>
    %cst_30 = arith.constant 1.250000e+00 : f32
    %60 = vector.broadcast %cst_30 : f32 to vector<8x512xf32>
    %61 = arith.cmpf oge, %59, %60 : vector<8x512xf32>
    %62 = arith.extui %61 : vector<8x512xi1> to vector<8x512xi32>
    %63 = arith.sitofp %62 : vector<8x512xi32> to vector<8x512xf32>
    %64 = arith.truncf %63 : vector<8x512xf32> to vector<8x512xbf16>
    %c3 = arith.constant 3 : index
    %c0_31 = arith.constant 0 : index
    %c0_32 = arith.constant 0 : index
    %65 = vector.load %arg2[%c3, %c0_31, %c0_32] : memref<4x8x512xbf16, #tpu.memory_space<vmem>>, vector<1x8x512xbf16>
    %66 = vector.shape_cast %65 : vector<1x8x512xbf16> to vector<8x512xbf16>
    %67 = vector.shape_cast %64 : vector<8x512xbf16> to vector<1x8x512xbf16>
    tpu.vector_store %arg2[%c3, %c0_31, %c0_32], %67 {strides = array<i32>} : memref<4x8x512xbf16, #tpu.memory_space<vmem>>, vector<1x8x512xbf16>,
    %68 = vector.shape_cast %63 : vector<8x512xf32> to vector<1x8x512xf32>
    %cst_33 = arith.constant dense<0.000000e+00> : vector<1xf32>
    %69 = vector.multi_reduction <add>, %68, %cst_33 [1, 2] : vector<1x8x512xf32> to vector<1xf32>
    %70 = vector.shape_cast %69 : vector<1xf32> to vector<1x1x1xf32>
    %71 = vector.extract %70[0, 0, 0] : f32 from vector<1x1x1xf32>
    %72 = arith.addf %51, %71 : f32
    %cst_34 = arith.constant 0.000000e+00 : f32
    %73 = vector.broadcast %cst_34 : f32 to vector<1x8x128xf32>
    %74 = vector.broadcast %72 : f32 to vector<1x8x128xf32>
    %75 = arith.addf %73, %74 : vector<1x8x128xf32>
    %c0_35 = arith.constant 0 : index
    %c0_36 = arith.constant 0 : index
    %c0_37 = arith.constant 0 : index
    %76 = vector.load %arg3[%c0_35, %c0_36, %c0_37] : memref<1x8x128xf32, #tpu.memory_space<vmem>>, vector<1x8x128xf32>
    tpu.vector_store %arg3[%c0_35, %c0_36, %c0_37], %75 {strides = array<i32>} : memref<1x8x128xf32, #tpu.memory_space<vmem>>, vector<1x8x128xf32>,
    return
  }
  func.func @transform_0(%arg0: i32) -> (i32, i32, i32) {
    %c0_i32 = arith.constant 0 : i32
    %c0_i32_0 = arith.constant 0 : i32
    %c0_i32_1 = arith.constant 0 : i32
    return %c0_i32, %c0_i32_0, %arg0 : i32, i32, i32
  }
  func.func @transform_1(%arg0: i32) -> (i32, i32, i32) {
    %c0_i32 = arith.constant 0 : i32
    %c0_i32_0 = arith.constant 0 : i32
    %c0_i32_1 = arith.constant 0 : i32
    return %c0_i32, %c0_i32_0, %arg0 : i32, i32, i32
  }
  func.func @transform_2(%arg0: i32) -> (i32, i32, i32) {
    %c0_i32 = arith.constant 0 : i32
    %c0_i32_0 = arith.constant 0 : i32
    %c0_i32_1 = arith.constant 0 : i32
    return %arg0, %c0_i32, %c0_i32_0 : i32, i32, i32
  }
}

module attributes {stable_mosaic.version = 11 : i64} {
  func.func @_conv_cuba_kernel(%arg0: i32, %arg1: memref<4x144x256xbf16, #tpu.memory_space<vmem>>, %arg2: memref<32x144xbf16, #tpu.memory_space<vmem>>, %arg3: memref<4x32x256xbf16, #tpu.memory_space<vmem>>, %arg4: memref<1x8x128xf32, #tpu.memory_space<vmem>>) attributes {dimension_semantics = [#tpu.dimension_semantics<parallel>], iteration_bounds = array<i64: 2>, scalar_prefetch = 0 : i64, scratch_operands = 0 : i64, tpu.core_type = #tpu.core_type<tc>, window_params = [{transform_indices = @transform_0, window_bounds = array<i64: 4, 144, 256>}, {pipeline_mode = #tpu.pipeline_mode<synchronous>, transform_indices = @transform_1, window_bounds = array<i64: 32, 144>}, {transform_indices = @transform_2, window_bounds = array<i64: 4, 32, 256>}, {transform_indices = @transform_3, window_bounds = array<i64: 1, 8, 128>}]} {
    %c0 = arith.constant 0 : index
    %c0_0 = arith.constant 0 : index
    %0 = vector.load %arg2[%c0, %c0_0] : memref<32x144xbf16, #tpu.memory_space<vmem>>, vector<32x144xbf16>
    %cst = arith.constant 0.000000e+00 : f32
    %1 = vector.broadcast %cst : f32 to vector<32x256xf32>
    %cst_1 = arith.constant 0.000000e+00 : f32
    %2 = vector.broadcast %cst_1 : f32 to vector<32x256xf32>
    %cst_2 = arith.constant 0.000000e+00 : bf16
    %3 = vector.broadcast %cst_2 : bf16 to vector<32x256xbf16>
    %c0_3 = arith.constant 0 : index
    %c0_4 = arith.constant 0 : index
    %c0_5 = arith.constant 0 : index
    %4 = vector.load %arg3[%c0_3, %c0_4, %c0_5] : memref<4x32x256xbf16, #tpu.memory_space<vmem>>, vector<1x32x256xbf16>
    %5 = vector.shape_cast %4 : vector<1x32x256xbf16> to vector<32x256xbf16>
    %6 = vector.shape_cast %3 : vector<32x256xbf16> to vector<1x32x256xbf16>
    tpu.vector_store %arg3[%c0_3, %c0_4, %c0_5], %6 {strides = array<i32>} : memref<4x32x256xbf16, #tpu.memory_space<vmem>>, vector<1x32x256xbf16>,
    %cst_6 = arith.constant 7.500000e-01 : f32
    %7 = vector.broadcast %cst_6 : f32 to vector<32x256xf32>
    %8 = arith.mulf %1, %7 : vector<32x256xf32>
    %c0_7 = arith.constant 0 : index
    %c0_8 = arith.constant 0 : index
    %c0_9 = arith.constant 0 : index
    %9 = vector.load %arg1[%c0_7, %c0_8, %c0_9] : memref<4x144x256xbf16, #tpu.memory_space<vmem>>, vector<1x144x256xbf16>
    %10 = vector.shape_cast %9 : vector<1x144x256xbf16> to vector<144x256xbf16>
    %cst_10 = arith.constant dense<0.000000e+00> : vector<32x256xf32>
    %11 = tpu.matmul %0, %10, %cst_10 {dimension_numbers = #tpu.dot_dimension_numbers<[1], [0], [0], [1], [0, 0, 1, 1], [], []>} : vector<32x144xbf16>, vector<144x256xbf16>, vector<32x256xf32> -> vector<32x256xf32>
    %12 = arith.addf %8, %11 : vector<32x256xf32>
    %cst_11 = arith.constant 0.969970703 : f32
    %13 = vector.broadcast %cst_11 : f32 to vector<32x256xf32>
    %14 = arith.mulf %2, %13 : vector<32x256xf32>
    %15 = arith.addf %14, %12 : vector<32x256xf32>
    %cst_12 = arith.constant 1.250000e+00 : f32
    %16 = vector.broadcast %cst_12 : f32 to vector<32x256xf32>
    %17 = arith.cmpf oge, %15, %16 : vector<32x256xf32>
    %cst_13 = arith.constant 0.000000e+00 : f32
    %18 = vector.broadcast %cst_13 : f32 to vector<32x256xf32>
    %19 = arith.select %17, %18, %15 : vector<32x256xi1>, vector<32x256xf32>
    %20 = arith.extui %17 : vector<32x256xi1> to vector<32x256xi32>
    %21 = arith.sitofp %20 : vector<32x256xi32> to vector<32x256xf32>
    %22 = arith.truncf %21 : vector<32x256xf32> to vector<32x256xbf16>
    %c1 = arith.constant 1 : index
    %c0_14 = arith.constant 0 : index
    %c0_15 = arith.constant 0 : index
    %23 = vector.load %arg3[%c1, %c0_14, %c0_15] : memref<4x32x256xbf16, #tpu.memory_space<vmem>>, vector<1x32x256xbf16>
    %24 = vector.shape_cast %23 : vector<1x32x256xbf16> to vector<32x256xbf16>
    %25 = vector.shape_cast %22 : vector<32x256xbf16> to vector<1x32x256xbf16>
    tpu.vector_store %arg3[%c1, %c0_14, %c0_15], %25 {strides = array<i32>} : memref<4x32x256xbf16, #tpu.memory_space<vmem>>, vector<1x32x256xbf16>,
    %26 = vector.shape_cast %21 : vector<32x256xf32> to vector<1x32x256xf32>
    %cst_16 = arith.constant dense<0.000000e+00> : vector<1xf32>
    %27 = vector.multi_reduction <add>, %26, %cst_16 [1, 2] : vector<1x32x256xf32> to vector<1xf32>
    %28 = vector.shape_cast %27 : vector<1xf32> to vector<1x1x1xf32>
    %29 = vector.extract %28[0, 0, 0] : f32 from vector<1x1x1xf32>
    %cst_17 = arith.constant 0.000000e+00 : f32
    %30 = arith.addf %cst_17, %29 : f32
    %cst_18 = arith.constant 7.500000e-01 : f32
    %31 = vector.broadcast %cst_18 : f32 to vector<32x256xf32>
    %32 = arith.mulf %12, %31 : vector<32x256xf32>
    %c1_19 = arith.constant 1 : index
    %c0_20 = arith.constant 0 : index
    %c0_21 = arith.constant 0 : index
    %33 = vector.load %arg1[%c1_19, %c0_20, %c0_21] : memref<4x144x256xbf16, #tpu.memory_space<vmem>>, vector<1x144x256xbf16>
    %34 = vector.shape_cast %33 : vector<1x144x256xbf16> to vector<144x256xbf16>
    %cst_22 = arith.constant dense<0.000000e+00> : vector<32x256xf32>
    %35 = tpu.matmul %0, %34, %cst_22 {dimension_numbers = #tpu.dot_dimension_numbers<[1], [0], [0], [1], [0, 0, 1, 1], [], []>} : vector<32x144xbf16>, vector<144x256xbf16>, vector<32x256xf32> -> vector<32x256xf32>
    %36 = arith.addf %32, %35 : vector<32x256xf32>
    %cst_23 = arith.constant 0.969970703 : f32
    %37 = vector.broadcast %cst_23 : f32 to vector<32x256xf32>
    %38 = arith.mulf %19, %37 : vector<32x256xf32>
    %39 = arith.addf %38, %36 : vector<32x256xf32>
    %cst_24 = arith.constant 1.250000e+00 : f32
    %40 = vector.broadcast %cst_24 : f32 to vector<32x256xf32>
    %41 = arith.cmpf oge, %39, %40 : vector<32x256xf32>
    %cst_25 = arith.constant 0.000000e+00 : f32
    %42 = vector.broadcast %cst_25 : f32 to vector<32x256xf32>
    %43 = arith.select %41, %42, %39 : vector<32x256xi1>, vector<32x256xf32>
    %44 = arith.extui %41 : vector<32x256xi1> to vector<32x256xi32>
    %45 = arith.sitofp %44 : vector<32x256xi32> to vector<32x256xf32>
    %46 = arith.truncf %45 : vector<32x256xf32> to vector<32x256xbf16>
    %c2 = arith.constant 2 : index
    %c0_26 = arith.constant 0 : index
    %c0_27 = arith.constant 0 : index
    %47 = vector.load %arg3[%c2, %c0_26, %c0_27] : memref<4x32x256xbf16, #tpu.memory_space<vmem>>, vector<1x32x256xbf16>
    %48 = vector.shape_cast %47 : vector<1x32x256xbf16> to vector<32x256xbf16>
    %49 = vector.shape_cast %46 : vector<32x256xbf16> to vector<1x32x256xbf16>
    tpu.vector_store %arg3[%c2, %c0_26, %c0_27], %49 {strides = array<i32>} : memref<4x32x256xbf16, #tpu.memory_space<vmem>>, vector<1x32x256xbf16>,
    %50 = vector.shape_cast %45 : vector<32x256xf32> to vector<1x32x256xf32>
    %cst_28 = arith.constant dense<0.000000e+00> : vector<1xf32>
    %51 = vector.multi_reduction <add>, %50, %cst_28 [1, 2] : vector<1x32x256xf32> to vector<1xf32>
    %52 = vector.shape_cast %51 : vector<1xf32> to vector<1x1x1xf32>
    %53 = vector.extract %52[0, 0, 0] : f32 from vector<1x1x1xf32>
    %54 = arith.addf %30, %53 : f32
    %cst_29 = arith.constant 7.500000e-01 : f32
    %55 = vector.broadcast %cst_29 : f32 to vector<32x256xf32>
    %56 = arith.mulf %36, %55 : vector<32x256xf32>
    %c2_30 = arith.constant 2 : index
    %c0_31 = arith.constant 0 : index
    %c0_32 = arith.constant 0 : index
    %57 = vector.load %arg1[%c2_30, %c0_31, %c0_32] : memref<4x144x256xbf16, #tpu.memory_space<vmem>>, vector<1x144x256xbf16>
    %58 = vector.shape_cast %57 : vector<1x144x256xbf16> to vector<144x256xbf16>
    %cst_33 = arith.constant dense<0.000000e+00> : vector<32x256xf32>
    %59 = tpu.matmul %0, %58, %cst_33 {dimension_numbers = #tpu.dot_dimension_numbers<[1], [0], [0], [1], [0, 0, 1, 1], [], []>} : vector<32x144xbf16>, vector<144x256xbf16>, vector<32x256xf32> -> vector<32x256xf32>
    %60 = arith.addf %56, %59 : vector<32x256xf32>
    %cst_34 = arith.constant 0.969970703 : f32
    %61 = vector.broadcast %cst_34 : f32 to vector<32x256xf32>
    %62 = arith.mulf %43, %61 : vector<32x256xf32>
    %63 = arith.addf %62, %60 : vector<32x256xf32>
    %cst_35 = arith.constant 1.250000e+00 : f32
    %64 = vector.broadcast %cst_35 : f32 to vector<32x256xf32>
    %65 = arith.cmpf oge, %63, %64 : vector<32x256xf32>
    %66 = arith.extui %65 : vector<32x256xi1> to vector<32x256xi32>
    %67 = arith.sitofp %66 : vector<32x256xi32> to vector<32x256xf32>
    %68 = arith.truncf %67 : vector<32x256xf32> to vector<32x256xbf16>
    %c3 = arith.constant 3 : index
    %c0_36 = arith.constant 0 : index
    %c0_37 = arith.constant 0 : index
    %69 = vector.load %arg3[%c3, %c0_36, %c0_37] : memref<4x32x256xbf16, #tpu.memory_space<vmem>>, vector<1x32x256xbf16>
    %70 = vector.shape_cast %69 : vector<1x32x256xbf16> to vector<32x256xbf16>
    %71 = vector.shape_cast %68 : vector<32x256xbf16> to vector<1x32x256xbf16>
    tpu.vector_store %arg3[%c3, %c0_36, %c0_37], %71 {strides = array<i32>} : memref<4x32x256xbf16, #tpu.memory_space<vmem>>, vector<1x32x256xbf16>,
    %72 = vector.shape_cast %67 : vector<32x256xf32> to vector<1x32x256xf32>
    %cst_38 = arith.constant dense<0.000000e+00> : vector<1xf32>
    %73 = vector.multi_reduction <add>, %72, %cst_38 [1, 2] : vector<1x32x256xf32> to vector<1xf32>
    %74 = vector.shape_cast %73 : vector<1xf32> to vector<1x1x1xf32>
    %75 = vector.extract %74[0, 0, 0] : f32 from vector<1x1x1xf32>
    %76 = arith.addf %54, %75 : f32
    %cst_39 = arith.constant 0.000000e+00 : f32
    %77 = vector.broadcast %cst_39 : f32 to vector<1x8x128xf32>
    %78 = vector.broadcast %76 : f32 to vector<1x8x128xf32>
    %79 = arith.addf %77, %78 : vector<1x8x128xf32>
    %c0_40 = arith.constant 0 : index
    %c0_41 = arith.constant 0 : index
    %c0_42 = arith.constant 0 : index
    %80 = vector.load %arg4[%c0_40, %c0_41, %c0_42] : memref<1x8x128xf32, #tpu.memory_space<vmem>>, vector<1x8x128xf32>
    tpu.vector_store %arg4[%c0_40, %c0_41, %c0_42], %79 {strides = array<i32>} : memref<1x8x128xf32, #tpu.memory_space<vmem>>, vector<1x8x128xf32>,
    return
  }
  func.func @transform_0(%arg0: i32) -> (i32, i32, i32) {
    %c0_i32 = arith.constant 0 : i32
    %c0_i32_0 = arith.constant 0 : i32
    %c0_i32_1 = arith.constant 0 : i32
    return %c0_i32, %c0_i32_0, %arg0 : i32, i32, i32
  }
  func.func @transform_1(%arg0: i32) -> (i32, i32) {
    %c0_i32 = arith.constant 0 : i32
    %c0_i32_0 = arith.constant 0 : i32
    %c0_i32_1 = arith.constant 0 : i32
    return %c0_i32, %c0_i32_0 : i32, i32
  }
  func.func @transform_2(%arg0: i32) -> (i32, i32, i32) {
    %c0_i32 = arith.constant 0 : i32
    %c0_i32_0 = arith.constant 0 : i32
    %c0_i32_1 = arith.constant 0 : i32
    return %c0_i32, %c0_i32_0, %arg0 : i32, i32, i32
  }
  func.func @transform_3(%arg0: i32) -> (i32, i32, i32) {
    %c0_i32 = arith.constant 0 : i32
    %c0_i32_0 = arith.constant 0 : i32
    %c0_i32_1 = arith.constant 0 : i32
    return %arg0, %c0_i32, %c0_i32_0 : i32, i32, i32
  }
}

module attributes {stable_mosaic.version = 11 : i64} {
  func.func @_dense_cuba_kernel(%arg0: i32, %arg1: memref<8x2048xbf16, #tpu.memory_space<vmem>>, %arg2: memref<2048x128xbf16, #tpu.memory_space<vmem>>, %arg3: memref<4x2x128xbf16, #tpu.memory_space<vmem>>, %arg4: memref<1x8x128xf32, #tpu.memory_space<vmem>>) attributes {dimension_semantics = [#tpu.dimension_semantics<parallel>], iteration_bounds = array<i64: 4>, scalar_prefetch = 0 : i64, scratch_operands = 0 : i64, tpu.core_type = #tpu.core_type<tc>, window_params = [{pipeline_mode = #tpu.pipeline_mode<synchronous>, transform_indices = @transform_0, window_bounds = array<i64: 8, 2048>}, {transform_indices = @transform_1, window_bounds = array<i64: 2048, 128>}, {transform_indices = @transform_2, window_bounds = array<i64: 4, 2, 128>}, {transform_indices = @transform_3, window_bounds = array<i64: 1, 8, 128>}]} {
    %c0 = arith.constant 0 : index
    %c0_0 = arith.constant 0 : index
    %0 = vector.load %arg1[%c0, %c0_0] : memref<8x2048xbf16, #tpu.memory_space<vmem>>, vector<8x2048xbf16>
    %c0_1 = arith.constant 0 : index
    %c0_2 = arith.constant 0 : index
    %1 = vector.load %arg2[%c0_1, %c0_2] : memref<2048x128xbf16, #tpu.memory_space<vmem>>, vector<2048x128xbf16>
    %cst = arith.constant dense<0.000000e+00> : vector<8x128xf32>
    %2 = tpu.matmul %0, %1, %cst {dimension_numbers = #tpu.dot_dimension_numbers<[1], [0], [0], [1], [0, 0, 1, 1], [], []>} : vector<8x2048xbf16>, vector<2048x128xbf16>, vector<8x128xf32> -> vector<8x128xf32>
    %cst_3 = arith.constant 0.000000e+00 : f32
    %3 = vector.broadcast %cst_3 : f32 to vector<2x128xf32>
    %cst_4 = arith.constant 0.000000e+00 : f32
    %4 = vector.broadcast %cst_4 : f32 to vector<2x128xf32>
    %cst_5 = arith.constant 0.000000e+00 : bf16
    %5 = vector.broadcast %cst_5 : bf16 to vector<2x128xbf16>
    %c0_6 = arith.constant 0 : index
    %c0_7 = arith.constant 0 : index
    %c0_8 = arith.constant 0 : index
    %6 = vector.load %arg3[%c0_6, %c0_7, %c0_8] : memref<4x2x128xbf16, #tpu.memory_space<vmem>>, vector<1x2x128xbf16>
    %7 = vector.shape_cast %6 : vector<1x2x128xbf16> to vector<2x128xbf16>
    %8 = vector.shape_cast %5 : vector<2x128xbf16> to vector<1x2x128xbf16>
    tpu.vector_store %arg3[%c0_6, %c0_7, %c0_8], %8 {strides = array<i32>} : memref<4x2x128xbf16, #tpu.memory_space<vmem>>, vector<1x2x128xbf16>,
    %cst_9 = arith.constant 7.500000e-01 : f32
    %9 = vector.broadcast %cst_9 : f32 to vector<2x128xf32>
    %10 = arith.mulf %3, %9 : vector<2x128xf32>
    %11 = vector.extract_strided_slice %2 {offsets = [0, 0], sizes = [2, 128], strides = [1, 1]} : vector<8x128xf32> to vector<2x128xf32>
    %12 = arith.addf %10, %11 : vector<2x128xf32>
    %cst_10 = arith.constant 0.969970703 : f32
    %13 = vector.broadcast %cst_10 : f32 to vector<2x128xf32>
    %14 = arith.mulf %4, %13 : vector<2x128xf32>
    %15 = arith.addf %14, %12 : vector<2x128xf32>
    %cst_11 = arith.constant 1.250000e+00 : f32
    %16 = vector.broadcast %cst_11 : f32 to vector<2x128xf32>
    %17 = arith.cmpf oge, %15, %16 : vector<2x128xf32>
    %cst_12 = arith.constant 0.000000e+00 : f32
    %18 = vector.broadcast %cst_12 : f32 to vector<2x128xf32>
    %19 = arith.select %17, %18, %15 : vector<2x128xi1>, vector<2x128xf32>
    %20 = arith.extui %17 : vector<2x128xi1> to vector<2x128xi32>
    %21 = arith.sitofp %20 : vector<2x128xi32> to vector<2x128xf32>
    %22 = arith.truncf %21 : vector<2x128xf32> to vector<2x128xbf16>
    %c1 = arith.constant 1 : index
    %c0_13 = arith.constant 0 : index
    %c0_14 = arith.constant 0 : index
    %23 = vector.load %arg3[%c1, %c0_13, %c0_14] : memref<4x2x128xbf16, #tpu.memory_space<vmem>>, vector<1x2x128xbf16>
    %24 = vector.shape_cast %23 : vector<1x2x128xbf16> to vector<2x128xbf16>
    %25 = vector.shape_cast %22 : vector<2x128xbf16> to vector<1x2x128xbf16>
    tpu.vector_store %arg3[%c1, %c0_13, %c0_14], %25 {strides = array<i32>} : memref<4x2x128xbf16, #tpu.memory_space<vmem>>, vector<1x2x128xbf16>,
    %26 = vector.shape_cast %21 : vector<2x128xf32> to vector<1x2x128xf32>
    %cst_15 = arith.constant dense<0.000000e+00> : vector<1xf32>
    %27 = vector.multi_reduction <add>, %26, %cst_15 [1, 2] : vector<1x2x128xf32> to vector<1xf32>
    %28 = vector.shape_cast %27 : vector<1xf32> to vector<1x1x1xf32>
    %29 = vector.extract %28[0, 0, 0] : f32 from vector<1x1x1xf32>
    %cst_16 = arith.constant 0.000000e+00 : f32
    %30 = arith.addf %cst_16, %29 : f32
    %cst_17 = arith.constant 7.500000e-01 : f32
    %31 = vector.broadcast %cst_17 : f32 to vector<2x128xf32>
    %32 = arith.mulf %12, %31 : vector<2x128xf32>
    %33 = vector.extract_strided_slice %2 {offsets = [2, 0], sizes = [2, 128], strides = [1, 1]} : vector<8x128xf32> to vector<2x128xf32>
    %34 = arith.addf %32, %33 : vector<2x128xf32>
    %cst_18 = arith.constant 0.969970703 : f32
    %35 = vector.broadcast %cst_18 : f32 to vector<2x128xf32>
    %36 = arith.mulf %19, %35 : vector<2x128xf32>
    %37 = arith.addf %36, %34 : vector<2x128xf32>
    %cst_19 = arith.constant 1.250000e+00 : f32
    %38 = vector.broadcast %cst_19 : f32 to vector<2x128xf32>
    %39 = arith.cmpf oge, %37, %38 : vector<2x128xf32>
    %cst_20 = arith.constant 0.000000e+00 : f32
    %40 = vector.broadcast %cst_20 : f32 to vector<2x128xf32>
    %41 = arith.select %39, %40, %37 : vector<2x128xi1>, vector<2x128xf32>
    %42 = arith.extui %39 : vector<2x128xi1> to vector<2x128xi32>
    %43 = arith.sitofp %42 : vector<2x128xi32> to vector<2x128xf32>
    %44 = arith.truncf %43 : vector<2x128xf32> to vector<2x128xbf16>
    %c2 = arith.constant 2 : index
    %c0_21 = arith.constant 0 : index
    %c0_22 = arith.constant 0 : index
    %45 = vector.load %arg3[%c2, %c0_21, %c0_22] : memref<4x2x128xbf16, #tpu.memory_space<vmem>>, vector<1x2x128xbf16>
    %46 = vector.shape_cast %45 : vector<1x2x128xbf16> to vector<2x128xbf16>
    %47 = vector.shape_cast %44 : vector<2x128xbf16> to vector<1x2x128xbf16>
    tpu.vector_store %arg3[%c2, %c0_21, %c0_22], %47 {strides = array<i32>} : memref<4x2x128xbf16, #tpu.memory_space<vmem>>, vector<1x2x128xbf16>,
    %48 = vector.shape_cast %43 : vector<2x128xf32> to vector<1x2x128xf32>
    %cst_23 = arith.constant dense<0.000000e+00> : vector<1xf32>
    %49 = vector.multi_reduction <add>, %48, %cst_23 [1, 2] : vector<1x2x128xf32> to vector<1xf32>
    %50 = vector.shape_cast %49 : vector<1xf32> to vector<1x1x1xf32>
    %51 = vector.extract %50[0, 0, 0] : f32 from vector<1x1x1xf32>
    %52 = arith.addf %30, %51 : f32
    %cst_24 = arith.constant 7.500000e-01 : f32
    %53 = vector.broadcast %cst_24 : f32 to vector<2x128xf32>
    %54 = arith.mulf %34, %53 : vector<2x128xf32>
    %55 = vector.extract_strided_slice %2 {offsets = [4, 0], sizes = [2, 128], strides = [1, 1]} : vector<8x128xf32> to vector<2x128xf32>
    %56 = arith.addf %54, %55 : vector<2x128xf32>
    %cst_25 = arith.constant 0.969970703 : f32
    %57 = vector.broadcast %cst_25 : f32 to vector<2x128xf32>
    %58 = arith.mulf %41, %57 : vector<2x128xf32>
    %59 = arith.addf %58, %56 : vector<2x128xf32>
    %cst_26 = arith.constant 1.250000e+00 : f32
    %60 = vector.broadcast %cst_26 : f32 to vector<2x128xf32>
    %61 = arith.cmpf oge, %59, %60 : vector<2x128xf32>
    %62 = arith.extui %61 : vector<2x128xi1> to vector<2x128xi32>
    %63 = arith.sitofp %62 : vector<2x128xi32> to vector<2x128xf32>
    %64 = arith.truncf %63 : vector<2x128xf32> to vector<2x128xbf16>
    %c3 = arith.constant 3 : index
    %c0_27 = arith.constant 0 : index
    %c0_28 = arith.constant 0 : index
    %65 = vector.load %arg3[%c3, %c0_27, %c0_28] : memref<4x2x128xbf16, #tpu.memory_space<vmem>>, vector<1x2x128xbf16>
    %66 = vector.shape_cast %65 : vector<1x2x128xbf16> to vector<2x128xbf16>
    %67 = vector.shape_cast %64 : vector<2x128xbf16> to vector<1x2x128xbf16>
    tpu.vector_store %arg3[%c3, %c0_27, %c0_28], %67 {strides = array<i32>} : memref<4x2x128xbf16, #tpu.memory_space<vmem>>, vector<1x2x128xbf16>,
    %68 = vector.shape_cast %63 : vector<2x128xf32> to vector<1x2x128xf32>
    %cst_29 = arith.constant dense<0.000000e+00> : vector<1xf32>
    %69 = vector.multi_reduction <add>, %68, %cst_29 [1, 2] : vector<1x2x128xf32> to vector<1xf32>
    %70 = vector.shape_cast %69 : vector<1xf32> to vector<1x1x1xf32>
    %71 = vector.extract %70[0, 0, 0] : f32 from vector<1x1x1xf32>
    %72 = arith.addf %52, %71 : f32
    %cst_30 = arith.constant 0.000000e+00 : f32
    %73 = vector.broadcast %cst_30 : f32 to vector<1x8x128xf32>
    %74 = vector.broadcast %72 : f32 to vector<1x8x128xf32>
    %75 = arith.addf %73, %74 : vector<1x8x128xf32>
    %c0_31 = arith.constant 0 : index
    %c0_32 = arith.constant 0 : index
    %c0_33 = arith.constant 0 : index
    %76 = vector.load %arg4[%c0_31, %c0_32, %c0_33] : memref<1x8x128xf32, #tpu.memory_space<vmem>>, vector<1x8x128xf32>
    tpu.vector_store %arg4[%c0_31, %c0_32, %c0_33], %75 {strides = array<i32>} : memref<1x8x128xf32, #tpu.memory_space<vmem>>, vector<1x8x128xf32>,
    return
  }
  func.func @transform_0(%arg0: i32) -> (i32, i32) {
    %c0_i32 = arith.constant 0 : i32
    %c0_i32_0 = arith.constant 0 : i32
    %c0_i32_1 = arith.constant 0 : i32
    return %c0_i32, %c0_i32_0 : i32, i32
  }
  func.func @transform_1(%arg0: i32) -> (i32, i32) {
    %c0_i32 = arith.constant 0 : i32
    %c0_i32_0 = arith.constant 0 : i32
    return %c0_i32, %arg0 : i32, i32
  }
  func.func @transform_2(%arg0: i32) -> (i32, i32, i32) {
    %c0_i32 = arith.constant 0 : i32
    %c0_i32_0 = arith.constant 0 : i32
    %c0_i32_1 = arith.constant 0 : i32
    return %c0_i32, %c0_i32_0, %arg0 : i32, i32, i32
  }
  func.func @transform_3(%arg0: i32) -> (i32, i32, i32) {
    %c0_i32 = arith.constant 0 : i32
    %c0_i32_0 = arith.constant 0 : i32
    %c0_i32_1 = arith.constant 0 : i32
    return %arg0, %c0_i32, %c0_i32_0 : i32, i32, i32
  }
}

module attributes {stable_mosaic.version = 11 : i64} {
  func.func @_dense_cuba_kernel(%arg0: i32, %arg1: memref<8x512xbf16, #tpu.memory_space<vmem>>, %arg2: memref<512x4xbf16, #tpu.memory_space<vmem>>, %arg3: memref<4x2x4xbf16, #tpu.memory_space<vmem>>, %arg4: memref<1x8x128xf32, #tpu.memory_space<vmem>>) attributes {dimension_semantics = [#tpu.dimension_semantics<parallel>], iteration_bounds = array<i64: 1>, scalar_prefetch = 0 : i64, scratch_operands = 0 : i64, tpu.core_type = #tpu.core_type<tc>, window_params = [{pipeline_mode = #tpu.pipeline_mode<synchronous>, transform_indices = @transform_0, window_bounds = array<i64: 8, 512>}, {transform_indices = @transform_1, window_bounds = array<i64: 512, 4>}, {transform_indices = @transform_2, window_bounds = array<i64: 4, 2, 4>}, {transform_indices = @transform_3, window_bounds = array<i64: 1, 8, 128>}]} {
    %c0 = arith.constant 0 : index
    %c0_0 = arith.constant 0 : index
    %0 = vector.load %arg1[%c0, %c0_0] : memref<8x512xbf16, #tpu.memory_space<vmem>>, vector<8x512xbf16>
    %c0_1 = arith.constant 0 : index
    %c0_2 = arith.constant 0 : index
    %1 = vector.load %arg2[%c0_1, %c0_2] : memref<512x4xbf16, #tpu.memory_space<vmem>>, vector<512x4xbf16>
    %cst = arith.constant dense<0.000000e+00> : vector<8x4xf32>
    %2 = tpu.matmul %0, %1, %cst {dimension_numbers = #tpu.dot_dimension_numbers<[1], [0], [0], [1], [0, 0, 1, 1], [], []>} : vector<8x512xbf16>, vector<512x4xbf16>, vector<8x4xf32> -> vector<8x4xf32>
    %cst_3 = arith.constant 0.000000e+00 : f32
    %3 = vector.broadcast %cst_3 : f32 to vector<2x4xf32>
    %cst_4 = arith.constant 0.000000e+00 : f32
    %4 = vector.broadcast %cst_4 : f32 to vector<2x4xf32>
    %cst_5 = arith.constant 0.000000e+00 : bf16
    %5 = vector.broadcast %cst_5 : bf16 to vector<2x4xbf16>
    %c0_6 = arith.constant 0 : index
    %c0_7 = arith.constant 0 : index
    %c0_8 = arith.constant 0 : index
    %6 = vector.load %arg3[%c0_6, %c0_7, %c0_8] : memref<4x2x4xbf16, #tpu.memory_space<vmem>>, vector<1x2x4xbf16>
    %7 = vector.shape_cast %6 : vector<1x2x4xbf16> to vector<2x4xbf16>
    %8 = vector.shape_cast %5 : vector<2x4xbf16> to vector<1x2x4xbf16>
    tpu.vector_store %arg3[%c0_6, %c0_7, %c0_8], %8 {strides = array<i32>} : memref<4x2x4xbf16, #tpu.memory_space<vmem>>, vector<1x2x4xbf16>,
    %cst_9 = arith.constant 7.500000e-01 : f32
    %9 = vector.broadcast %cst_9 : f32 to vector<2x4xf32>
    %10 = arith.mulf %3, %9 : vector<2x4xf32>
    %11 = vector.extract_strided_slice %2 {offsets = [0, 0], sizes = [2, 4], strides = [1, 1]} : vector<8x4xf32> to vector<2x4xf32>
    %12 = arith.addf %10, %11 : vector<2x4xf32>
    %cst_10 = arith.constant 0.969970703 : f32
    %13 = vector.broadcast %cst_10 : f32 to vector<2x4xf32>
    %14 = arith.mulf %4, %13 : vector<2x4xf32>
    %15 = arith.addf %14, %12 : vector<2x4xf32>
    %cst_11 = arith.constant 1.250000e+00 : f32
    %16 = vector.broadcast %cst_11 : f32 to vector<2x4xf32>
    %17 = arith.cmpf oge, %15, %16 : vector<2x4xf32>
    %cst_12 = arith.constant 0.000000e+00 : f32
    %18 = vector.broadcast %cst_12 : f32 to vector<2x4xf32>
    %19 = arith.select %17, %18, %15 : vector<2x4xi1>, vector<2x4xf32>
    %20 = arith.extui %17 : vector<2x4xi1> to vector<2x4xi32>
    %21 = arith.sitofp %20 : vector<2x4xi32> to vector<2x4xf32>
    %22 = arith.truncf %21 : vector<2x4xf32> to vector<2x4xbf16>
    %c1 = arith.constant 1 : index
    %c0_13 = arith.constant 0 : index
    %c0_14 = arith.constant 0 : index
    %23 = vector.load %arg3[%c1, %c0_13, %c0_14] : memref<4x2x4xbf16, #tpu.memory_space<vmem>>, vector<1x2x4xbf16>
    %24 = vector.shape_cast %23 : vector<1x2x4xbf16> to vector<2x4xbf16>
    %25 = vector.shape_cast %22 : vector<2x4xbf16> to vector<1x2x4xbf16>
    tpu.vector_store %arg3[%c1, %c0_13, %c0_14], %25 {strides = array<i32>} : memref<4x2x4xbf16, #tpu.memory_space<vmem>>, vector<1x2x4xbf16>,
    %26 = vector.shape_cast %21 : vector<2x4xf32> to vector<1x2x4xf32>
    %cst_15 = arith.constant dense<0.000000e+00> : vector<1xf32>
    %27 = vector.multi_reduction <add>, %26, %cst_15 [1, 2] : vector<1x2x4xf32> to vector<1xf32>
    %28 = vector.shape_cast %27 : vector<1xf32> to vector<1x1x1xf32>
    %29 = vector.extract %28[0, 0, 0] : f32 from vector<1x1x1xf32>
    %cst_16 = arith.constant 0.000000e+00 : f32
    %30 = arith.addf %cst_16, %29 : f32
    %cst_17 = arith.constant 7.500000e-01 : f32
    %31 = vector.broadcast %cst_17 : f32 to vector<2x4xf32>
    %32 = arith.mulf %12, %31 : vector<2x4xf32>
    %33 = vector.extract_strided_slice %2 {offsets = [2, 0], sizes = [2, 4], strides = [1, 1]} : vector<8x4xf32> to vector<2x4xf32>
    %34 = arith.addf %32, %33 : vector<2x4xf32>
    %cst_18 = arith.constant 0.969970703 : f32
    %35 = vector.broadcast %cst_18 : f32 to vector<2x4xf32>
    %36 = arith.mulf %19, %35 : vector<2x4xf32>
    %37 = arith.addf %36, %34 : vector<2x4xf32>
    %cst_19 = arith.constant 1.250000e+00 : f32
    %38 = vector.broadcast %cst_19 : f32 to vector<2x4xf32>
    %39 = arith.cmpf oge, %37, %38 : vector<2x4xf32>
    %cst_20 = arith.constant 0.000000e+00 : f32
    %40 = vector.broadcast %cst_20 : f32 to vector<2x4xf32>
    %41 = arith.select %39, %40, %37 : vector<2x4xi1>, vector<2x4xf32>
    %42 = arith.extui %39 : vector<2x4xi1> to vector<2x4xi32>
    %43 = arith.sitofp %42 : vector<2x4xi32> to vector<2x4xf32>
    %44 = arith.truncf %43 : vector<2x4xf32> to vector<2x4xbf16>
    %c2 = arith.constant 2 : index
    %c0_21 = arith.constant 0 : index
    %c0_22 = arith.constant 0 : index
    %45 = vector.load %arg3[%c2, %c0_21, %c0_22] : memref<4x2x4xbf16, #tpu.memory_space<vmem>>, vector<1x2x4xbf16>
    %46 = vector.shape_cast %45 : vector<1x2x4xbf16> to vector<2x4xbf16>
    %47 = vector.shape_cast %44 : vector<2x4xbf16> to vector<1x2x4xbf16>
    tpu.vector_store %arg3[%c2, %c0_21, %c0_22], %47 {strides = array<i32>} : memref<4x2x4xbf16, #tpu.memory_space<vmem>>, vector<1x2x4xbf16>,
    %48 = vector.shape_cast %43 : vector<2x4xf32> to vector<1x2x4xf32>
    %cst_23 = arith.constant dense<0.000000e+00> : vector<1xf32>
    %49 = vector.multi_reduction <add>, %48, %cst_23 [1, 2] : vector<1x2x4xf32> to vector<1xf32>
    %50 = vector.shape_cast %49 : vector<1xf32> to vector<1x1x1xf32>
    %51 = vector.extract %50[0, 0, 0] : f32 from vector<1x1x1xf32>
    %52 = arith.addf %30, %51 : f32
    %cst_24 = arith.constant 7.500000e-01 : f32
    %53 = vector.broadcast %cst_24 : f32 to vector<2x4xf32>
    %54 = arith.mulf %34, %53 : vector<2x4xf32>
    %55 = vector.extract_strided_slice %2 {offsets = [4, 0], sizes = [2, 4], strides = [1, 1]} : vector<8x4xf32> to vector<2x4xf32>
    %56 = arith.addf %54, %55 : vector<2x4xf32>
    %cst_25 = arith.constant 0.969970703 : f32
    %57 = vector.broadcast %cst_25 : f32 to vector<2x4xf32>
    %58 = arith.mulf %41, %57 : vector<2x4xf32>
    %59 = arith.addf %58, %56 : vector<2x4xf32>
    %cst_26 = arith.constant 1.250000e+00 : f32
    %60 = vector.broadcast %cst_26 : f32 to vector<2x4xf32>
    %61 = arith.cmpf oge, %59, %60 : vector<2x4xf32>
    %62 = arith.extui %61 : vector<2x4xi1> to vector<2x4xi32>
    %63 = arith.sitofp %62 : vector<2x4xi32> to vector<2x4xf32>
    %64 = arith.truncf %63 : vector<2x4xf32> to vector<2x4xbf16>
    %c3 = arith.constant 3 : index
    %c0_27 = arith.constant 0 : index
    %c0_28 = arith.constant 0 : index
    %65 = vector.load %arg3[%c3, %c0_27, %c0_28] : memref<4x2x4xbf16, #tpu.memory_space<vmem>>, vector<1x2x4xbf16>
    %66 = vector.shape_cast %65 : vector<1x2x4xbf16> to vector<2x4xbf16>
    %67 = vector.shape_cast %64 : vector<2x4xbf16> to vector<1x2x4xbf16>
    tpu.vector_store %arg3[%c3, %c0_27, %c0_28], %67 {strides = array<i32>} : memref<4x2x4xbf16, #tpu.memory_space<vmem>>, vector<1x2x4xbf16>,
    %68 = vector.shape_cast %63 : vector<2x4xf32> to vector<1x2x4xf32>
    %cst_29 = arith.constant dense<0.000000e+00> : vector<1xf32>
    %69 = vector.multi_reduction <add>, %68, %cst_29 [1, 2] : vector<1x2x4xf32> to vector<1xf32>
    %70 = vector.shape_cast %69 : vector<1xf32> to vector<1x1x1xf32>
    %71 = vector.extract %70[0, 0, 0] : f32 from vector<1x1x1xf32>
    %72 = arith.addf %52, %71 : f32
    %cst_30 = arith.constant 0.000000e+00 : f32
    %73 = vector.broadcast %cst_30 : f32 to vector<1x8x128xf32>
    %74 = vector.broadcast %72 : f32 to vector<1x8x128xf32>
    %75 = arith.addf %73, %74 : vector<1x8x128xf32>
    %c0_31 = arith.constant 0 : index
    %c0_32 = arith.constant 0 : index
    %c0_33 = arith.constant 0 : index
    %76 = vector.load %arg4[%c0_31, %c0_32, %c0_33] : memref<1x8x128xf32, #tpu.memory_space<vmem>>, vector<1x8x128xf32>
    tpu.vector_store %arg4[%c0_31, %c0_32, %c0_33], %75 {strides = array<i32>} : memref<1x8x128xf32, #tpu.memory_space<vmem>>, vector<1x8x128xf32>,
    return
  }
  func.func @transform_0(%arg0: i32) -> (i32, i32) {
    %c0_i32 = arith.constant 0 : i32
    %c0_i32_0 = arith.constant 0 : i32
    %c0_i32_1 = arith.constant 0 : i32
    return %c0_i32, %c0_i32_0 : i32, i32
  }
  func.func @transform_1(%arg0: i32) -> (i32, i32) {
    %c0_i32 = arith.constant 0 : i32
    %c0_i32_0 = arith.constant 0 : i32
    return %c0_i32, %arg0 : i32, i32
  }
  func.func @transform_2(%arg0: i32) -> (i32, i32, i32) {
    %c0_i32 = arith.constant 0 : i32
    %c0_i32_0 = arith.constant 0 : i32
    %c0_i32_1 = arith.constant 0 : i32
    return %c0_i32, %c0_i32_0, %arg0 : i32, i32, i32
  }
  func.func @transform_3(%arg0: i32) -> (i32, i32, i32) {
    %c0_i32 = arith.constant 0 : i32
    %c0_i32_0 = arith.constant 0 : i32
    %c0_i32_1 = arith.constant 0 : i32
    return %arg0, %c0_i32, %c0_i32_0 : i32, i32, i32
  }
}

</mosaic_0001>

<bundles_post_ra>
// kernel: network_forward.7
= control target key start
LH: loop header
LB: loop body
LE: loop exit
PB: predicated region body
PF: predicated region fallthrough
CT: control target
= control target key end

     0   :  { %s554_s9 = smov 0   ;;  %s556_s10 = smov 0   ;;  %s629_s0 = inlined_call_operand.vmem [shape: f32[4,8,512], index: 0, kind: input, shape index: {}]   ;;  %s630_s1 = inlined_call_operand.vmem [shape: bf16[4,8,512], index: 1, kind: output, shape index: {0}]   ;;  %s631_s2 = inlined_call_operand.vmem [shape: f32[2,8,128], index: 2, kind: output, shape index: {1}]  }
   0x1   :  { %s558_s11 = smov 0  }
   0x2 LB: > { %s570_s12 = sadd.s32 4294967295, %s535_s11   ;;  %s573_s13 = sadd.s32 1, %s535_s11   ;;  %s535_s11 = sphi %s558_s11, %s635_s11   ;;  %s531_s10 = sphi %s556_s10, %s634_s10   ;;  %s527_s9 = sphi %s554_s9, %s633_s9  }
   0x3   : > { %s17_s14 = ssub.s32 %s535_s11, %s573_s13  ;;  %s20_s15 = sadd.s32 1, %s531_s10 }
   0x4   : > { %p18_p0 = scmp.eq.s32.totalorder %s17_s14, 0  ;;  %p27_p1 = scmp.ne.s32.totalorder %s531_s10, %s527_s9 }
   0x5   : > { %p28_p2 = scmp.eq.s32.totalorder %s535_s11, 0  ;;  %p57_p3 = scmp.eq.s32.totalorder %s570_s12, 1 }
   0x6   : > { %s583_s16 = scalar_select %p18_p0, %s531_s10, %s20_s15  }
   0x7   : > { %p29_p4 = por %p28_p2, %p27_p1  ;;  %p585_p5 = por %p57_p3, %p27_p1 }
   0x8   : > { %p447_p6 = scmp.ge.s32.totalorder %s535_s11, 2 }
   0xa   : > { %105 = sbr.rel (%p447_p6) target bundleno = 25 (0x19), region = 16 }
  0x11   : > { %108 = sbr.rel (!%p29_p4) target bundleno = 25 (0x19), region = 20  ;;  %s110_s18 = sand.u32 (%p29_p4), 1, %s531_s10  }
  0x12   : > { %s476_s19 = sshll.u32 (%p29_p4), %s535_s11, 4  ;;  %s448_s20 = sshll.u32 (%p29_p4), %s110_s18, 6 }
  0x13   : > { %s115_s23 = scalar_lea.vmem (%p29_p4), %s629_s0, %s476_s19  ;;  %s112_s24 = scalar_lea.vmem (%p29_p4), [#allocation2], %s448_s20 }
  0x14   : > { %v128_v0 = vld [vmem:[%s115_s23] sm:$0xff] (%p29_p4)  ;;  %v130_v1 = vld [vmem:[%s115_s23 + $0x8] sm:$0xff] (%p29_p4) }
  0x15   : > { %v132_v2 = vld [vmem:[%s115_s23 + $0x20] sm:$0xff] (%p29_p4)  ;;  %129 = vst [vmem:[%s112_s24] sm:$0xff] (%p29_p4), %v128_v0  ;;  %131 = vst [vmem:[%s112_s24 + $0x8] sm:$0xff] (%p29_p4), %v130_v1  ;;  %v134_v3 = vld [vmem:[%s115_s23 + $0x28] sm:$0xff] (%p29_p4) }
  0x16   : > { %133 = vst [vmem:[%s112_s24 + $0x10] sm:$0xff] (%p29_p4), %v132_v2  ;;  %v136_v4 = vld [vmem:[%s115_s23 + $0x40] sm:$0xff] (%p29_p4)  ;;  %v138_v5 = vld [vmem:[%s115_s23 + $0x48] sm:$0xff] (%p29_p4)  ;;  %135 = vst [vmem:[%s112_s24 + $0x18] sm:$0xff] (%p29_p4), %v134_v3 }
  0x17   : > { %137 = vst [vmem:[%s112_s24 + $0x20] sm:$0xff] (%p29_p4), %v136_v4  ;;  %139 = vst [vmem:[%s112_s24 + $0x28] sm:$0xff] (%p29_p4), %v138_v5  ;;  %v140_v6 = vld [vmem:[%s115_s23 + $0x60] sm:$0xff] (%p29_p4)  ;;  %v142_v7 = vld [vmem:[%s115_s23 + $0x68] sm:$0xff] (%p29_p4) }
  0x18   : > { %141 = vst [vmem:[%s112_s24 + $0x30] sm:$0xff] %v140_v6  ;;  %143 = vst [vmem:[%s112_s24 + $0x38] sm:$0xff] %v142_v7 }
  0x19 PF: > { %p451_p7 = scmp.ge.s32.totalorder %s535_s11, 1  ;;  %p148_p8 = scmp.lt.s32.totalorder %s535_s11, 3 }
  0x1b   : > { %p149_p9 = pnand %p451_p7, %p148_p8 }
  0x1c   : > { %s155_s25 = sand.u32 (!%p149_p9), 1, %s527_s9   ;;  %v537_v8 = vmov (!%p149_p9), 0   ;;  %v538_v16 = vmov (!%p149_p9), 0.0   ;;  %p181_p10 = scmp.lt.s32.totalorder (!%p149_p9), %s570_s12, 1 }
  0x1d   : > { %152 = sbr.rel (%p149_p9) target bundleno = 257 (0x101), region = 43  ;;  %s452_s26 = sshll.u32 (!%p149_p9), %s155_s25, 6 }
  0x1e   : > { %s453_s27 = sshll.u32 (!%p149_p9), %s155_s25, 5  ;;  %s157_s29 = scalar_lea.vmem (!%p149_p9), [#allocation2], %s452_s26 }
  0x1f   : > { %s598_s28 = scalar_lea.vmem (!%p149_p9), [#allocation3], %s453_s27  ;;  %v187_v9 = vld [vmem:[%s157_s29] sm:$0xff] (!%p149_p9)  ;;  %v188_v10 = vld [vmem:[%s157_s29 + $0x8] sm:$0xff] (!%p149_p9)  ;;  %v459_v11 = vld [vmem:[%s157_s29 + $0x10] sm:$0xff] (!%p149_p9) }
  0x20   : > { %186 = vst [vmem:[%s598_s28] sm:$0xff] (!%p149_p9), %v537_v8  ;;  %vm193_vm0 = vcmp.ge.f32.partialorder (!%p149_p9), %v187_v9, 1.25  ;;  %vm194_vm1 = vcmp.ge.f32.partialorder (!%p149_p9), %v188_v10, 1.25  ;;  %v222_v12 = vmul.f32 (!%p149_p9), 0.75, %v187_v9  ;;  %v223_v13 = vmul.f32 (!%p149_p9), 0.75, %v188_v10  ;;  %v460_v14 = vld [vmem:[%s157_s29 + $0x18] sm:$0xff] (!%p149_p9)  ;;  %v466_v26 = vld [vmem:[%s157_s29 + $0x28] sm:$0xff] (!%p149_p9) }
  0x21   : > { %v196_v15 = vsel (!%p149_p9), %vm194_vm1, 0.0, %v188_v10  ;;  %v455_v17 = vsel (!%p149_p9), %vm193_vm0, 1.0, %v538_v16  ;;  %v456_v18 = vsel (!%p149_p9), %vm194_vm1, 1.0, %v538_v16  ;;  %v195_v19 = vsel (!%p149_p9), %vm193_vm0, 0.0, %v187_v9  ;;  %v465_v30 = vld [vmem:[%s157_s29 + $0x20] sm:$0xff] (!%p149_p9) }
  0x22   : > { %v211_v20 = vadd.f32 (!%p149_p9), %v456_v18, %v455_v17  ;;  %v227_v21 = vadd.f32 (!%p149_p9), %v459_v11, %v222_v12  ;;  %v228_v22 = vadd.f32 (!%p149_p9), %v460_v14, %v223_v13  ;;  %v230_v23 = vmul.f32 (!%p149_p9), 0.9699707, %v196_v15 }
  0x23   : > { %v477_v24 = vpack.c.bf16 (!%p149_p9), %v456_v18, %v455_v17  ;;  %v229_v25 = vmul.f32 (!%p149_p9), 0.9699707, %v195_v19 }
  0x24   : > { %v232_v27 = vadd.f32 %v230_v23, %v228_v22  ;;  %212 = vadd.xlane.f32.xlu0 %v211_v20  ;;  %v262_v28 = vmul.f32 0.75, %v227_v21  ;;  %v263_v29 = vmul.f32 0.75, %v228_v22  ;;  %s182_s30 = scalar_select %p181_p10, %s570_s12, 1 }
  0x25   : > { %458 = vst [vmem:[%s598_s28 + $0x8] sm:$0xff] %v477_v24  ;;  %v231_v31 = vadd.f32 %v229_v25, %v227_v21  ;;  %s480_s15 = sshll.u32 (%p585_p5), %s570_s12, 3 }
  0x26   : > { %vm234_vm2 = vcmp.ge.f32.partialorder %v232_v27, 1.25  ;;  %v268_v32 = vadd.f32 %v466_v26, %v263_v29  ;;  %v267_v35 = vadd.f32 %v465_v30, %v262_v28  ;;  %s454_s5 = sshll.u32 %s182_s30, 3  ;;  %s316_s20 = scalar_lea.vmem (%p585_p5), %s630_s1, %s480_s15 }
  0x27   : > { %vm233_vm3 = vcmp.ge.f32.partialorder %v231_v31, 1.25  ;;  %v236_v33 = vsel %vm234_vm2, 0.0, %v232_v27  ;;  %v462_v34 = vsel %vm234_vm2, 1.0, %v538_v16  ;;  %s184_s11 = scalar_lea.vmem %s631_s2, %s454_s5  ;;  %v350_v6 = vld [vmem:[%s598_s28] sm:$0xff] (%p585_p5) }
  0x28   : > { %v461_v36 = vsel %vm233_vm3, 1.0, %v538_v16  ;;  %v235_v37 = vsel %vm233_vm3, 0.0, %v231_v31  ;;  %v270_v38 = vmul.f32 0.9699707, %v236_v33  ;;  %351 = vst [vmem:[%s316_s20] sm:$0xff] (%p585_p5), %v350_v6 }
  0x29   : > { %v251_v39 = vadd.f32 %v462_v34, %v461_v36  ;;  %v478_v40 = vpack.c.bf16 %v462_v34, %v461_v36  ;;  %v269_v41 = vmul.f32 0.9699707, %v235_v37 }
  0x2a   : > { %v272_v42 = vadd.f32 %v270_v38, %v268_v32 }
  0x2b   : > { %252 = vadd.xlane.f32.xlu0 %v251_v39  ;;  %464 = vst [vmem:[%s598_s28 + $0x10] sm:$0xff] %v478_v40  ;;  %v271_v43 = vadd.f32 %v269_v41, %v267_v35 }
  0x2c   : > { %vm274_vm4 = vcmp.ge.f32.partialorder %v272_v42, 1.25  ;;  %v352_v7 = vld [vmem:[%s598_s28 + $0x8] sm:$0xff] (%p585_p5) }
  0x2d   : > { %vm273_vm5 = vcmp.ge.f32.partialorder %v271_v43, 1.25  ;;  %v468_v44 = vsel %vm274_vm4, 1.0, %v538_v16  ;;  %353 = vst [vmem:[%s316_s20 + $0x10] sm:$0xff] (%p585_p5), %v352_v7 }
  0x2e   : > { %v467_v45 = vsel %vm273_vm5, 1.0, %v538_v16 }
  0x2f   : > { %v289_v46 = vadd.f32 %v468_v44, %v467_v45  ;;  %v479_v47 = vpack.c.bf16 %v468_v44, %v467_v45 }
  0x31   : > { %290 = vadd.xlane.f32.xlu1 %v289_v46  ;;  %470 = vst [vmem:[%s598_s28 + $0x18] sm:$0xff] %v479_v47 }
  0x32   : > { %v354_v8 = vld [vmem:[%s598_s28 + $0x10] sm:$0xff] (%p585_p5) }
  0x33   : > { %355 = vst [vmem:[%s316_s20 + $0x20] sm:$0xff] (%p585_p5), %v354_v8 }
  0x38   : > { %v356_v9 = vld [vmem:[%s598_s28 + $0x18] sm:$0xff] (%p585_p5) }
  0x39   : > { %357 = vst [vmem:[%s316_s20 + $0x30] sm:$0xff] (%p585_p5), %v356_v9 }
  0xb1   : > { %v213_v48 = vpop.xlane.xlu0 %212 }
  0xb2   : > { %v214_v49 = vrot.slane %v213_v48, 4 }
  0xb4   : > { %v215_v50 = vadd.f32 %v214_v49, %v213_v48 }
  0xb6   : > { %v216_v51 = vrot.slane %v215_v50, 2 }
  0xb8   : > { %v253_v52 = vpop.xlane.xlu0 %252  ;;  %v217_v53 = vadd.f32 %v216_v51, %v215_v50 }
  0xb9   : > { %v254_v54 = vrot.slane %v253_v52, 4 }
  0xba   : > { %v218_v55 = vrot.slane %v217_v53, 1 }
  0xbb   : > { %v255_v56 = vadd.f32 %v254_v54, %v253_v52 }
  0xbc   : > { %v219_v57 = vadd.f32 %v218_v55, %v217_v53 }
  0xbd   : > { %v256_v58 = vrot.slane %v255_v56, 2 }
  0xbe   : > { %v291_v59 = vpop.xlane.xlu1 %290  ;;  %481 = vpush %v219_v57 }
  0xbf   : > { %v257_v60 = vadd.f32 %v256_v58, %v255_v56  ;;  %v292_v61 = vrot.slane %v291_v59, 4 }
  0xc1   : > { %v293_v62 = vadd.f32 %v292_v61, %v291_v59  ;;  %v258_v63 = vrot.slane %v257_v60, 1 }
  0xc3   : > { %v294_v0 = vrot.slane %v293_v62, 2  ;;  %v259_v1 = vadd.f32 %v258_v63, %v257_v60 }
  0xc5   : > { %v295_v2 = vadd.f32 %v294_v0, %v293_v62  ;;  %483 = vpush %v259_v1 }
  0xc7   : > { %v296_v3 = vrot.slane %v295_v2, 1 }
  0xc9   : > { %v297_v4 = vadd.f32 %v296_v3, %v295_v2 }
  0xcb   : > { %485 = vpush %v297_v4 }
  0xef   : > { %s482_s3 = spop %481 }
  0xf6   : > { %s484_s4 = spop %483 }
  0xf7   : > { %s261_s6 = sadd.f32 %s484_s4, %s482_s3 }
  0xfa   : > { %313 = sbr.rel (!%p585_p5) target bundleno = 257 (0x101), region = 51 }
  0xfc   : > { %s486_s7 = spop %485 }
  0xfd   : > { %s299_s14 = sadd.f32 %s486_s7, %s261_s6 }
  0xff   : > { %v300_v5 = vstv %s299_s14 }
 0x100   : > { %302 = vst [vmem:[%s184_s11] sm:$0xff] %v300_v5 }
 0x101 PF: > { %p10_p11 = scmp.ge.s32.totalorder %s573_s13, 4   ;;  %s633_s9 = smov %s531_s10 }
 0x102   : > { %s634_s10 = smov %s583_s16  ;;  %s635_s11 = smov %s573_s13 }
 0x103   :  { %12 = sbr.rel (!%p10_p11) target bundleno = 2 (0x2), region = 137 }

// kernel: network_forward.8
= control target key start
LH: loop header
LB: loop body
LE: loop exit
PB: predicated region body
PF: predicated region fallthrough
CT: control target
= control target key end

     0   :  { %s1630_s12 = smov 0   ;;  %s1632_s13 = smov 0   ;;  %s1968_s0 = inlined_call_operand.vmem [shape: bf16[4,50,2048], index: 0, kind: input, shape index: {}]   ;;  %s1969_s1 = inlined_call_operand.vmem [shape: bf16[16,50], index: 1, kind: input, shape index: {}]   ;;  %s1970_s2 = inlined_call_operand.vmem [shape: bf16[4,16,2048], index: 2, kind: output, shape index: {0}]   ;;  %s1971_s3 = inlined_call_operand.vmem [shape: f32[4,8,128], index: 3, kind: output, shape index: {1}]  }
   0x1   :  { %s1634_s14 = smov 0  }
   0x2 LB: > { %s1646_s15 = sadd.s32 4294967295, %s1606_s14   ;;  %s1649_s16 = sadd.s32 1, %s1606_s14   ;;  %s1606_s14 = sphi %s1634_s14, %s1975_s14   ;;  %s1602_s13 = sphi %s1632_s13, %s1974_s13   ;;  %s1598_s12 = sphi %s1630_s12, %s1973_s12  }
   0x3   : > { %s18_s17 = ssub.s32 %s1606_s14, %s1649_s16  ;;  %s21_s18 = sadd.s32 1, %s1602_s13 }
   0x4   : > { %p19_p0 = scmp.eq.s32.totalorder %s18_s17, 0  ;;  %p28_p1 = scmp.ne.s32.totalorder %s1602_s13, %s1598_s12 }
   0x5   : > { %p29_p2 = scmp.eq.s32.totalorder %s1606_s14, 0  ;;  %p79_p3 = scmp.eq.s32.totalorder %s1646_s15, 3 }
   0x6   : > { %s1659_s19 = scalar_select %p19_p0, %s1602_s13, %s21_s18  }
   0x7   : > { %p30_p4 = por %p29_p2, %p28_p1  ;;  %p1661_p5 = por %p79_p3, %p28_p1 }
   0x8   : > { %p1321_p6 = scmp.ge.s32.totalorder %s1606_s14, 4 }
   0xa   : > { %130 = sbr.rel (%p1321_p6) target bundleno = 49 (0x31), region = 20 }
  0x11   : > { %133 = sbr.rel (!%p30_p4) target bundleno = 49 (0x31), region = 24  ;;  %s135_s21 = sand.u32 (%p30_p4), 1, %s1602_s13  }
  0x12   : > { %s1469_s22 = sshll.u32 (%p30_p4), %s1606_s14, 4  ;;  %s1483_s23 = smul.u32 (%p30_p4), 448, %s135_s21 }
  0x13   : > { %s1671_s26 = scalar_lea.vmem (%p30_p4), %s1968_s0, %s1469_s22 }
  0x14   : > { %v153_v0 = vld [vmem:[%s1671_s26] sm:$0xff] (%p30_p4)  ;;  %v155_v1 = vld [vmem:[%s1671_s26 + $0x8] sm:$0xff] (%p30_p4)  ;;  %s1679_s27 = scalar_lea.vmem (%p30_p4), [#allocation2], %s1483_s23 }
  0x15   : > { %v157_v2 = vld [vmem:[%s1671_s26 + $0x40] sm:$0xff] (%p30_p4)  ;;  %v159_v3 = vld [vmem:[%s1671_s26 + $0x48] sm:$0xff] (%p30_p4)  ;;  %154 = vst [vmem:[%s1679_s27] sm:$0xff] (%p30_p4), %v153_v0  ;;  %156 = vst [vmem:[%s1679_s27 + $0x8] sm:$0xff] (%p30_p4), %v155_v1 }
  0x16   : > { %v161_v4 = vld [vmem:[%s1671_s26 + $0x80] sm:$0xff] (%p30_p4)  ;;  %v163_v5 = vld [vmem:[%s1671_s26 + $0x88] sm:$0xff] (%p30_p4)  ;;  %158 = vst [vmem:[%s1679_s27 + $0x10] sm:$0xff] (%p30_p4), %v157_v2  ;;  %160 = vst [vmem:[%s1679_s27 + $0x18] sm:$0xff] (%p30_p4), %v159_v3 }
  0x17   : > { %162 = vst [vmem:[%s1679_s27 + $0x20] sm:$0xff] (%p30_p4), %v161_v4  ;;  %164 = vst [vmem:[%s1679_s27 + $0x28] sm:$0xff] (%p30_p4), %v163_v5  ;;  %v165_v6 = vld [vmem:[%s1671_s26 + $0xc0] sm:$0xff] (%p30_p4)  ;;  %v167_v7 = vld [vmem:[%s1671_s26 + $0xc8] sm:$0xff] (%p30_p4) }
  0x18   : > { %v169_v8 = vld [vmem:[%s1671_s26 + $0x100] sm:$0xff]  ;;  %166 = vst [vmem:[%s1679_s27 + $0x30] sm:$0xff] %v165_v6  ;;  %168 = vst [vmem:[%s1679_s27 + $0x38] sm:$0xff] %v167_v7  ;;  %v171_v9 = vld [vmem:[%s1671_s26 + $0x108] sm:$0xff] }
  0x19   : > { %170 = vst [vmem:[%s1679_s27 + $0x40] sm:$0xff] %v169_v8  ;;  %v173_v10 = vld [vmem:[%s1671_s26 + $0x140] sm:$0xff]  ;;  %v175_v11 = vld [vmem:[%s1671_s26 + $0x148] sm:$0xff]  ;;  %172 = vst [vmem:[%s1679_s27 + $0x48] sm:$0xff] %v171_v9 }
  0x1a   : > { %174 = vst [vmem:[%s1679_s27 + $0x50] sm:$0xff] %v173_v10  ;;  %176 = vst [vmem:[%s1679_s27 + $0x58] sm:$0xff] %v175_v11  ;;  %v177_v12 = vld [vmem:[%s1671_s26 + $0x180] sm:$0xff]  ;;  %v179_v13 = vld [vmem:[%s1671_s26 + $0x188] sm:$0xff] }
  0x1b   : > { %v181_v14 = vld [vmem:[%s1671_s26 + $0x1c0] sm:$0xff]  ;;  %178 = vst [vmem:[%s1679_s27 + $0x60] sm:$0xff] %v177_v12  ;;  %180 = vst [vmem:[%s1679_s27 + $0x68] sm:$0xff] %v179_v13  ;;  %v183_v15 = vld [vmem:[%s1671_s26 + $0x1c8] sm:$0xff] }
  0x1c   : > { %182 = vst [vmem:[%s1679_s27 + $0x70] sm:$0xff] %v181_v14  ;;  %v185_v16 = vld [vmem:[%s1671_s26 + $0x200] sm:$0xff]  ;;  %v187_v17 = vld [vmem:[%s1671_s26 + $0x208] sm:$0xff]  ;;  %184 = vst [vmem:[%s1679_s27 + $0x78] sm:$0xff] %v183_v15 }
  0x1d   : > { %186 = vst [vmem:[%s1679_s27 + $0x80] sm:$0xff] %v185_v16  ;;  %188 = vst [vmem:[%s1679_s27 + $0x88] sm:$0xff] %v187_v17  ;;  %v189_v18 = vld [vmem:[%s1671_s26 + $0x240] sm:$0xff]  ;;  %v191_v19 = vld [vmem:[%s1671_s26 + $0x248] sm:$0xff] }
  0x1e   : > { %v193_v20 = vld [vmem:[%s1671_s26 + $0x280] sm:$0xff]  ;;  %190 = vst [vmem:[%s1679_s27 + $0x90] sm:$0xff] %v189_v18  ;;  %192 = vst [vmem:[%s1679_s27 + $0x98] sm:$0xff] %v191_v19  ;;  %v195_v21 = vld [vmem:[%s1671_s26 + $0x288] sm:$0xff] }
  0x1f   : > { %194 = vst [vmem:[%s1679_s27 + $0xa0] sm:$0xff] %v193_v20  ;;  %v197_v22 = vld [vmem:[%s1671_s26 + $0x2c0] sm:$0xff]  ;;  %v199_v23 = vld [vmem:[%s1671_s26 + $0x2c8] sm:$0xff]  ;;  %196 = vst [vmem:[%s1679_s27 + $0xa8] sm:$0xff] %v195_v21 }
  0x20   : > { %198 = vst [vmem:[%s1679_s27 + $0xb0] sm:$0xff] %v197_v22  ;;  %200 = vst [vmem:[%s1679_s27 + $0xb8] sm:$0xff] %v199_v23  ;;  %v201_v24 = vld [vmem:[%s1671_s26 + $0x300] sm:$0xff]  ;;  %v203_v25 = vld [vmem:[%s1671_s26 + $0x308] sm:$0xff] }
  0x21   : > { %v205_v26 = vld [vmem:[%s1671_s26 + $0x340] sm:$0xff]  ;;  %202 = vst [vmem:[%s1679_s27 + $0xc0] sm:$0xff] %v201_v24  ;;  %204 = vst [vmem:[%s1679_s27 + $0xc8] sm:$0xff] %v203_v25  ;;  %v207_v27 = vld [vmem:[%s1671_s26 + $0x348] sm:$0xff] }
  0x22   : > { %206 = vst [vmem:[%s1679_s27 + $0xd0] sm:$0xff] %v205_v26  ;;  %v209_v28 = vld [vmem:[%s1671_s26 + $0x380] sm:$0xff]  ;;  %v211_v29 = vld [vmem:[%s1671_s26 + $0x388] sm:$0xff]  ;;  %208 = vst [vmem:[%s1679_s27 + $0xd8] sm:$0xff] %v207_v27 }
  0x23   : > { %210 = vst [vmem:[%s1679_s27 + $0xe0] sm:$0xff] %v209_v28  ;;  %212 = vst [vmem:[%s1679_s27 + $0xe8] sm:$0xff] %v211_v29  ;;  %v213_v30 = vld [vmem:[%s1671_s26 + $0x3c0] sm:$0xff]  ;;  %v215_v31 = vld [vmem:[%s1671_s26 + $0x3c8] sm:$0xff] }
  0x24   : > { %v217_v32 = vld [vmem:[%s1671_s26 + $0x400] sm:$0xff]  ;;  %214 = vst [vmem:[%s1679_s27 + $0xf0] sm:$0xff] %v213_v30  ;;  %216 = vst [vmem:[%s1679_s27 + $0xf8] sm:$0xff] %v215_v31  ;;  %v219_v33 = vld [vmem:[%s1671_s26 + $0x408] sm:$0xff] }
  0x25   : > { %218 = vst [vmem:[%s1679_s27 + $0x100] sm:$0xff] %v217_v32  ;;  %v221_v34 = vld [vmem:[%s1671_s26 + $0x440] sm:$0xff]  ;;  %v223_v35 = vld [vmem:[%s1671_s26 + $0x448] sm:$0xff]  ;;  %220 = vst [vmem:[%s1679_s27 + $0x108] sm:$0xff] %v219_v33 }
  0x26   : > { %222 = vst [vmem:[%s1679_s27 + $0x110] sm:$0xff] %v221_v34  ;;  %224 = vst [vmem:[%s1679_s27 + $0x118] sm:$0xff] %v223_v35  ;;  %v225_v36 = vld [vmem:[%s1671_s26 + $0x480] sm:$0xff]  ;;  %v227_v37 = vld [vmem:[%s1671_s26 + $0x488] sm:$0xff] }
  0x27   : > { %v229_v38 = vld [vmem:[%s1671_s26 + $0x4c0] sm:$0xff]  ;;  %226 = vst [vmem:[%s1679_s27 + $0x120] sm:$0xff] %v225_v36  ;;  %228 = vst [vmem:[%s1679_s27 + $0x128] sm:$0xff] %v227_v37  ;;  %v231_v39 = vld [vmem:[%s1671_s26 + $0x4c8] sm:$0xff] }
  0x28   : > { %230 = vst [vmem:[%s1679_s27 + $0x130] sm:$0xff] %v229_v38  ;;  %v233_v40 = vld [vmem:[%s1671_s26 + $0x500] sm:$0xff]  ;;  %v235_v41 = vld [vmem:[%s1671_s26 + $0x508] sm:$0xff]  ;;  %232 = vst [vmem:[%s1679_s27 + $0x138] sm:$0xff] %v231_v39 }
  0x29   : > { %234 = vst [vmem:[%s1679_s27 + $0x140] sm:$0xff] %v233_v40  ;;  %236 = vst [vmem:[%s1679_s27 + $0x148] sm:$0xff] %v235_v41  ;;  %v237_v42 = vld [vmem:[%s1671_s26 + $0x540] sm:$0xff]  ;;  %v239_v43 = vld [vmem:[%s1671_s26 + $0x548] sm:$0xff] }
  0x2a   : > { %v241_v44 = vld [vmem:[%s1671_s26 + $0x580] sm:$0xff]  ;;  %238 = vst [vmem:[%s1679_s27 + $0x150] sm:$0xff] %v237_v42  ;;  %240 = vst [vmem:[%s1679_s27 + $0x158] sm:$0xff] %v239_v43  ;;  %v243_v45 = vld [vmem:[%s1671_s26 + $0x588] sm:$0xff] }
  0x2b   : > { %242 = vst [vmem:[%s1679_s27 + $0x160] sm:$0xff] %v241_v44  ;;  %v245_v46 = vld [vmem:[%s1671_s26 + $0x5c0] sm:$0xff]  ;;  %v247_v47 = vld [vmem:[%s1671_s26 + $0x5c8] sm:$0xff]  ;;  %244 = vst [vmem:[%s1679_s27 + $0x168] sm:$0xff] %v243_v45 }
  0x2c   : > { %246 = vst [vmem:[%s1679_s27 + $0x170] sm:$0xff] %v245_v46  ;;  %248 = vst [vmem:[%s1679_s27 + $0x178] sm:$0xff] %v247_v47  ;;  %v249_v48 = vld [vmem:[%s1671_s26 + $0x600] sm:$0xff]  ;;  %v251_v49 = vld [vmem:[%s1671_s26 + $0x608] sm:$0xff] }
  0x2d   : > { %v253_v50 = vld [vmem:[%s1671_s26 + $0x640] sm:$0xff]  ;;  %250 = vst [vmem:[%s1679_s27 + $0x180] sm:$0xff] %v249_v48  ;;  %252 = vst [vmem:[%s1679_s27 + $0x188] sm:$0xff] %v251_v49  ;;  %v255_v51 = vld [vmem:[%s1671_s26 + $0x648] sm:$0xff] }
  0x2e   : > { %254 = vst [vmem:[%s1679_s27 + $0x190] sm:$0xff] %v253_v50  ;;  %v257_v52 = vld [vmem:[%s1671_s26 + $0x680] sm:$0xff]  ;;  %v259_v53 = vld [vmem:[%s1671_s26 + $0x688] sm:$0xff]  ;;  %256 = vst [vmem:[%s1679_s27 + $0x198] sm:$0xff] %v255_v51 }
  0x2f   : > { %258 = vst [vmem:[%s1679_s27 + $0x1a0] sm:$0xff] %v257_v52  ;;  %260 = vst [vmem:[%s1679_s27 + $0x1a8] sm:$0xff] %v259_v53  ;;  %v261_v54 = vld [vmem:[%s1671_s26 + $0x6c0] sm:$0xff]  ;;  %v263_v55 = vld [vmem:[%s1671_s26 + $0x6c8] sm:$0xff] }
  0x30   : > { %262 = vst [vmem:[%s1679_s27 + $0x1b0] sm:$0xff] %v261_v54  ;;  %264 = vst [vmem:[%s1679_s27 + $0x1b8] sm:$0xff] %v263_v55 }
  0x31 PF: > { %p1324_p7 = scmp.ge.s32.totalorder %s1606_s14, 1  ;;  %p269_p8 = scmp.lt.s32.totalorder %s1606_s14, 5 }
  0x33   : > { %p270_p9 = pnand %p1324_p7, %p269_p8 }
  0x34   : > { %s276_s28 = sand.u32 (!%p270_p9), 1, %s1598_s12   ;;  %v1608_v56 = vmov (!%p270_p9), 0   ;;  %vm408_vm0 = vcmask (!%p270_p9), 1040384   ;;  %v1827_v15 = vld [vmem:[%s1969_s1] sm:$0xff] (!%p270_p9)   ;;  %vm404_vm1 = vcmask (!%p270_p9), 408576   ;;  %p304_p10 = scmp.lt.s32.totalorder (!%p270_p9), %s1646_s15, 3 }
  0x35   : > { %273 = sbr.rel (%p270_p9) target bundleno = 547 (0x223), region = 47  ;;  %s1325_s30 = sshll.u32 (!%p270_p9), %s276_s28, 7  ;;  %453 = vmatprep.mubr.bf16.mxu0 (!%p270_p9), %v1608_v56  ;;  %496 = vmatprep.mubr.bf16.mxu1 (!%p270_p9), %v1608_v56 }
  0x36   : > { %s1484_s29 = smul.u32 (!%p270_p9), 448, %s276_s28  ;;  %s1792_s4 = scalar_lea.vmem (!%p270_p9), [#allocation3], %s1325_s30 }
  0x37   : > { %311 = vst [vmem:[%s1792_s4] sm:$0xff] (!%p270_p9), %v1608_v56  ;;  %312 = vst [vmem:[%s1792_s4 + $0x8] sm:$0xff] (!%p270_p9), %v1608_v56 }
  0x38   : > { %313 = vst [vmem:[%s1792_s4 + $0x10] sm:$0xff] (!%p270_p9), %v1608_v56  ;;  %314 = vst [vmem:[%s1792_s4 + $0x18] sm:$0xff] (!%p270_p9), %v1608_v56  ;;  %s1802_s5 = scalar_lea.vmem (!%p270_p9), [#allocation2], %s1484_s29 }
  0x39   : > { %v1517_v57 = vld [vmem:[%s1802_s5 + $0x4] ss:$16 sps:$4 sm:$0xff] (!%p270_p9)   ;;  %v1519_v58 = vld [vmem:[%s1802_s5 + $0xc] ss:$16 sps:$4 sm:$0xff] (!%p270_p9)   ;;  %v1521_v59 = vld [vmem:[%s1802_s5] ss:$16 sps:$4 sm:$0xff] (!%p270_p9)  }
  0x3a   : > { %421 = vmatprep.subr.bf16.mxu0 (!%p270_p9), %v1517_v57  ;;  %v1522_v60 = vld [vmem:[%s1802_s5 + $0x8] ss:$16 sps:$4 sm:$0xff] (!%p270_p9)   ;;  %464 = vmatprep.subr.bf16.mxu1 (!%p270_p9), %v1519_v58  ;;  %v1523_v61 = vld [vmem:[%s1802_s5 + $0x24] ss:$16 sps:$4 sm:$0xff] (!%p270_p9)   ;;  %v1525_v62 = vld [vmem:[%s1802_s5 + $0x2c] ss:$16 sps:$4 sm:$0xff] (!%p270_p9)  }
  0x3b   : > { %422 = vmatpush1.bf16.msra.mxu0 (!%p270_p9), %v1521_v59  ;;  %465 = vmatpush1.bf16.msra.mxu1 (!%p270_p9), %v1522_v60  ;;  %v1527_v63 = vld [vmem:[%s1802_s5 + $0x20] ss:$16 sps:$4 sm:$0xff] (!%p270_p9)   ;;  %v1528_v0 = vld [vmem:[%s1802_s5 + $0x28] ss:$16 sps:$4 sm:$0xff] (!%p270_p9)   ;;  %v1529_v1 = vld [vmem:[%s1802_s5 + $0x44] ss:$16 sps:$4 sm:$0xff] (!%p270_p9)  }
  0x3c   : > { %423 = vmatprep.subr.bf16.mxu0 %v1523_v61  ;;  %466 = vmatprep.subr.bf16.mxu1 %v1525_v62  ;;  %v1531_v2 = vld [vmem:[%s1802_s5 + $0x4c] ss:$16 sps:$4 sm:$0xff]   ;;  %v1533_v3 = vld [vmem:[%s1802_s5 + $0x40] ss:$16 sps:$4 sm:$0xff]   ;;  %v1534_v4 = vld [vmem:[%s1802_s5 + $0x48] ss:$16 sps:$4 sm:$0xff]  }
  0x3d   : > { %v327_v5 = vld [vmem:[%s1802_s5 + $0x60] sm:$0x11]  ;;  %v328_v6 = vld [vmem:[%s1802_s5 + $0x68] sm:$0x11]  ;;  %v1376_v24 = vld [vmem:[%s1802_s5 + $0xd0] sm:$0x11] }
  0x3e   : > { %v1341_v7 = vcombine.high %v327_v5, %v327_v5  ;;  %v1343_v8 = vcombine.high %v328_v6, %v328_v6  ;;  %v1340_v9 = vcombine.low %v327_v5, %v327_v5  ;;  %v1342_v10 = vcombine.low %v328_v6, %v328_v6  ;;  %v1542_v11 = vld [vmem:[%s1802_s5 + $0x74] ss:$16 sps:$4 sm:$0xff]   ;;  %v1545_v14 = vld [vmem:[%s1802_s5 + $0x7c] ss:$16 sps:$4 sm:$0xff]   ;;  %v1540_v16 = vld [vmem:[%s1802_s5 + $0x70] ss:$16 sps:$4 sm:$0xff]  }
  0x3f   : > { %424 = vmatpush1.bf16.msra.mxu0 %v1527_v63  ;;  %467 = vmatpush1.bf16.msra.mxu1 %v1528_v0  ;;  %v1543_v17 = vld [vmem:[%s1802_s5 + $0x78] ss:$16 sps:$4 sm:$0xff]   ;;  %v1548_v18 = vld [vmem:[%s1802_s5 + $0x94] ss:$16 sps:$4 sm:$0xff]   ;;  %v1551_v19 = vld [vmem:[%s1802_s5 + $0x9c] ss:$16 sps:$4 sm:$0xff]   ;;  %v1391_v28 = vcombine.high %v1376_v24, %v1376_v24  ;;  %v1390_v30 = vcombine.low %v1376_v24, %v1376_v24 }
  0x40   : > { %425 = vmatprep.subr.bf16.mxu0 %v1529_v1  ;;  %468 = vmatprep.subr.bf16.mxu1 %v1531_v2  ;;  %v410_v12 = vsel %vm408_vm0, %v1340_v9, 0  ;;  %v416_v13 = vsel %vm408_vm0, %v1342_v10, 0  ;;  %v1546_v20 = vld [vmem:[%s1802_s5 + $0x90] ss:$16 sps:$4 sm:$0xff]   ;;  %v1549_v21 = vld [vmem:[%s1802_s5 + $0x98] ss:$16 sps:$4 sm:$0xff]  }
  0x41   : > { %v1554_v22 = vld [vmem:[%s1802_s5 + $0xb4] ss:$16 sps:$4 sm:$0xff]   ;;  %v1557_v23 = vld [vmem:[%s1802_s5 + $0xbc] ss:$16 sps:$4 sm:$0xff]   ;;  %v1552_v26 = vld [vmem:[%s1802_s5 + $0xb0] ss:$16 sps:$4 sm:$0xff]  }
  0x42   : > { %v1377_v25 = vld [vmem:[%s1802_s5 + $0xd8] sm:$0x11]  ;;  %v687_v32 = vsel %vm408_vm0, %v1390_v30, 0  ;;  %v1564_v34 = vld [vmem:[%s1802_s5 + $0xe4] ss:$16 sps:$4 sm:$0xff]   ;;  %v1609_v58 = vmov 0.0  }
  0x43   : > { %426 = vmatpush1.bf16.msra.mxu0 %v1533_v3  ;;  %469 = vmatpush1.bf16.msra.mxu1 %v1534_v4  ;;  %v1555_v27 = vld [vmem:[%s1802_s5 + $0xb8] ss:$16 sps:$4 sm:$0xff]   ;;  %v1393_v29 = vcombine.high %v1377_v25, %v1377_v25  ;;  %v1392_v31 = vcombine.low %v1377_v25, %v1377_v25  ;;  %v1567_v35 = vld [vmem:[%s1802_s5 + $0xec] ss:$16 sps:$4 sm:$0xff]   ;;  %v1562_v36 = vld [vmem:[%s1802_s5 + $0xe0] ss:$16 sps:$4 sm:$0xff]  }
  0x44   : > { %1344 = vmatprep.subr.msk.bf16.mxu0 %vm408_vm0, %v1341_v7  ;;  %1346 = vmatprep.subr.msk.bf16.mxu1 %vm408_vm0, %v1343_v8  ;;  %v1565_v37 = vld [vmem:[%s1802_s5 + $0xe8] ss:$16 sps:$4 sm:$0xff]   ;;  %v1570_v38 = vld [vmem:[%s1802_s5 + $0x104] ss:$16 sps:$4 sm:$0xff]   ;;  %v1573_v39 = vld [vmem:[%s1802_s5 + $0x10c] ss:$16 sps:$4 sm:$0xff]  }
  0x45   : > { %v693_v33 = vsel %vm408_vm0, %v1392_v31, 0  ;;  %v1568_v40 = vld [vmem:[%s1802_s5 + $0x100] ss:$16 sps:$4 sm:$0xff]   ;;  %v1571_v41 = vld [vmem:[%s1802_s5 + $0x108] ss:$16 sps:$4 sm:$0xff]   ;;  %s305_s8 = scalar_select %p304_p10, %s1646_s15, 3 }
  0x46   : > { %v1576_v42 = vld [vmem:[%s1802_s5 + $0x124] ss:$16 sps:$4 sm:$0xff]   ;;  %v1579_v43 = vld [vmem:[%s1802_s5 + $0x12c] ss:$16 sps:$4 sm:$0xff]   ;;  %v1574_v46 = vld [vmem:[%s1802_s5 + $0x120] ss:$16 sps:$4 sm:$0xff]  }
  0x47   : > { %428 = vmatpush1.bf16.msra.mxu0 %v410_v12  ;;  %471 = vmatpush1.bf16.msra.mxu1 %v416_v13  ;;  %v1426_v44 = vld [vmem:[%s1802_s5 + $0x140] sm:$0x11]  ;;  %v1427_v45 = vld [vmem:[%s1802_s5 + $0x148] sm:$0x11]  ;;  %s1326_s11 = sshll.u32 %s305_s8, 3  ;;  %s1482_s23 = sshll.u32 (%p1661_p5), %s1646_s15, 4 }
  0x48   : > { %698 = vmatprep.subr.bf16.mxu0 %v1542_v11  ;;  %741 = vmatprep.subr.bf16.mxu1 %v1545_v14  ;;  %v1577_v47 = vld [vmem:[%s1802_s5 + $0x128] ss:$16 sps:$4 sm:$0xff]   ;;  %v1441_v48 = vcombine.high %v1426_v44, %v1426_v44  ;;  %v1443_v49 = vcombine.high %v1427_v45, %v1427_v45  ;;  %v1440_v50 = vcombine.low %v1426_v44, %v1426_v44  ;;  %s307_s21 = scalar_lea.vmem %s1971_s3, %s1326_s11  ;;  %s1187_s26 = scalar_lea.vmem (%p1661_p5), %s1970_s2, %s1482_s23 }
  0x49   : > { %v1442_v51 = vcombine.low %v1427_v45, %v1427_v45 }
  0x4a   : > { %1345 = vmatmul.mubr.msk.bf16.vlgmr.msra.gmra.mrb[0].mxu0 %vm404_vm1, %v1827_v15  ;;  %1347 = vmatmul.mubr.msk.bf16.vlgmr.msra.gmra.mrb[0].mxu1 %vm404_vm1, %v1827_v15  ;;  %v980_v52 = vsel %vm408_vm0, %v1440_v50, 0 }
  0x4b   : > { %699 = vmatpush1.bf16.msra.mxu0 %v1540_v16  ;;  %742 = vmatpush1.bf16.msra.mxu1 %v1543_v17  ;;  %v986_v53 = vsel %vm408_vm0, %v1442_v51, 0 }
  0x4c   : > { %700 = vmatprep.subr.bf16.mxu0 %v1548_v18  ;;  %743 = vmatprep.subr.bf16.mxu1 %v1551_v19 }
  0x4d   : > { %730 = vmatprep.mubr.bf16.mxu0 %v1608_v56  ;;  %773 = vmatprep.mubr.bf16.mxu1 %v1608_v56 }
  0x4f   : > { %701 = vmatpush1.bf16.msra.mxu0 %v1546_v20  ;;  %744 = vmatpush1.bf16.msra.mxu1 %v1549_v21 }
  0x50   : > { %702 = vmatprep.subr.bf16.mxu0 %v1554_v22  ;;  %745 = vmatprep.subr.bf16.mxu1 %v1557_v23 }
  0x53   : > { %703 = vmatpush1.bf16.msra.mxu0 %v1552_v26  ;;  %746 = vmatpush1.bf16.msra.mxu1 %v1555_v27 }
  0x54   : > { %1394 = vmatprep.subr.msk.bf16.mxu0 %vm408_vm0, %v1391_v28  ;;  %1396 = vmatprep.subr.msk.bf16.mxu1 %vm408_vm0, %v1393_v29 }
  0x57   : > { %705 = vmatpush1.bf16.msra.mxu0 %v687_v32  ;;  %748 = vmatpush1.bf16.msra.mxu1 %v693_v33 }
  0x58   : > { %991 = vmatprep.subr.bf16.mxu0 %v1564_v34  ;;  %1034 = vmatprep.subr.bf16.mxu1 %v1567_v35 }
  0x5a   : > { %1395 = vmatmul.mubr.msk.bf16.vlgmr.msra.gmra.mrb[4].mxu0 %vm404_vm1, %v1827_v15  ;;  %1397 = vmatmul.mubr.msk.bf16.vlgmr.msra.gmra.mrb[4].mxu1 %vm404_vm1, %v1827_v15 }
  0x5b   : > { %992 = vmatpush1.bf16.msra.mxu0 %v1562_v36  ;;  %1035 = vmatpush1.bf16.msra.mxu1 %v1565_v37 }
  0x5c   : > { %993 = vmatprep.subr.bf16.mxu0 %v1570_v38  ;;  %1036 = vmatprep.subr.bf16.mxu1 %v1573_v39 }
  0x5d   : > { %1023 = vmatprep.mubr.bf16.mxu0 %v1608_v56  ;;  %1066 = vmatprep.mubr.bf16.mxu1 %v1608_v56 }
  0x5f   : > { %994 = vmatpush1.bf16.msra.mxu0 %v1568_v40  ;;  %1037 = vmatpush1.bf16.msra.mxu1 %v1571_v41 }
  0x60   : > { %995 = vmatprep.subr.bf16.mxu0 %v1576_v42  ;;  %1038 = vmatprep.subr.bf16.mxu1 %v1579_v43 }
  0x63   : > { %996 = vmatpush1.bf16.msra.mxu0 %v1574_v46  ;;  %1039 = vmatpush1.bf16.msra.mxu1 %v1577_v47 }
  0x64   : > { %1444 = vmatprep.subr.msk.bf16.mxu0 %vm408_vm0, %v1441_v48  ;;  %1446 = vmatprep.subr.msk.bf16.mxu1 %vm408_vm0, %v1443_v49 }
  0x67   : > { %998 = vmatpush1.bf16.msra.mxu0 %v980_v52  ;;  %1041 = vmatpush1.bf16.msra.mxu1 %v986_v53 }
  0x6a   : > { %1445 = vmatmul.mubr.msk.bf16.vlgmr.msra.gmra.mrb[8].mxu0 %vm404_vm1, %v1827_v15  ;;  %1447 = vmatmul.mubr.msk.bf16.vlgmr.msra.gmra.mrb[8].mxu1 %vm404_vm1, %v1827_v15 }
 0x11d   : > { %v455_v54 = vpop.f32.mrb[0].mxu0  ;;  %v498_v55 = vpop.f32.mrb[0].mxu1 }
 0x11e   : > { %vm515_vm2 = vcmp.ge.f32.partialorder %v455_v54, 1.25  ;;  %vm517_vm3 = vcmp.ge.f32.partialorder %v498_v55, 1.25  ;;  %v457_v56 = vpop.f32.mrb[1].mxu0  ;;  %v500_v57 = vpop.f32.mrb[1].mxu1  ;;  %v593_v22 = vmul.f32 0.75, %v455_v54  ;;  %v595_v23 = vmul.f32 0.75, %v498_v55 }
 0x11f   : > { %v1348_v59 = vsel %vm515_vm2, 1.0, %v1609_v58  ;;  %v1350_v60 = vsel %vm517_vm3, 1.0, %v1609_v58  ;;  %v459_v61 = vpop.f32.mrb[2].mxu0  ;;  %v502_v62 = vpop.f32.mrb[2].mxu1  ;;  %vm516_vm4 = vcmp.ge.f32.partialorder %v457_v56, 1.25  ;;  %vm518_vm5 = vcmp.ge.f32.partialorder %v500_v57, 1.25 }
 0x120   : > { %v461_v63 = vpop.f32.mrb[3].mxu0  ;;  %v504_v0 = vpop.f32.mrb[3].mxu1  ;;  %v1349_v1 = vsel %vm516_vm4, 1.0, %v1609_v58  ;;  %v1351_v2 = vsel %vm518_vm5, 1.0, %v1609_v58  ;;  %vm519_vm6 = vcmp.ge.f32.partialorder %v459_v61, 1.25  ;;  %vm521_vm8 = vcmp.ge.f32.partialorder %v502_v62, 1.25 }
 0x121   : > { %v1470_v3 = vpack.c.bf16 %v1349_v1, %v1348_v59  ;;  %v576_v4 = vadd.f32 %v1349_v1, %v1348_v59  ;;  %v1471_v5 = vpack.c.bf16 %v1351_v2, %v1350_v60  ;;  %vm520_vm7 = vcmp.ge.f32.partialorder %v461_v63, 1.25 }
 0x122   : > { %v1352_v7 = vsel %vm519_vm6, 1.0, %v1609_v58  ;;  %v1353_v8 = vsel %vm520_vm7, 1.0, %v1609_v58  ;;  %v523_v11 = vsel %vm515_vm2, 0.0, %v455_v54  ;;  %v525_v12 = vsel %vm517_vm3, 0.0, %v498_v55 }
 0x123   : > { %1360 = vst [vmem:[%s1792_s4 + $0x20] sm:$0xff] %v1470_v3  ;;  %1361 = vst [vmem:[%s1792_s4 + $0x28] sm:$0xff] %v1471_v5  ;;  %v577_v6 = vadd.f32 %v1350_v60, %v576_v4  ;;  %v1472_v10 = vpack.c.bf16 %v1353_v8, %v1352_v7  ;;  %v524_v13 = vsel %vm516_vm4, 0.0, %v457_v56  ;;  %vm522_vm9 = vcmp.ge.f32.partialorder %v504_v0, 1.25 }
 0x124   : > { %v526_v14 = vsel %vm518_vm5, 0.0, %v500_v57  ;;  %v1354_v16 = vsel %vm521_vm8, 1.0, %v1609_v58  ;;  %v1355_v17 = vsel %vm522_vm9, 1.0, %v1609_v58  ;;  %v527_v18 = vsel %vm519_vm6, 0.0, %v459_v61 }
 0x125   : > { %v578_v9 = vadd.f32 %v1351_v2, %v577_v6  ;;  %1362 = vst [vmem:[%s1792_s4 + $0x30] sm:$0xff] %v1472_v10  ;;  %v529_v19 = vsel %vm521_vm8, 0.0, %v502_v62  ;;  %v528_v20 = vsel %vm520_vm7, 0.0, %v461_v63  ;;  %v1473_v21 = vpack.c.bf16 %v1355_v17, %v1354_v16 }
 0x126   : > { %v792_v25 = vmul.f32 0.9699707, %v523_v11  ;;  %v794_v26 = vmul.f32 0.9699707, %v525_v12  ;;  %v793_v27 = vmul.f32 0.9699707, %v524_v13  ;;  %v795_v28 = vmul.f32 0.9699707, %v526_v14 }
 0x127   : > { %v579_v15 = vadd.f32 %v1352_v7, %v578_v9  ;;  %1363 = vst [vmem:[%s1792_s4 + $0x38] sm:$0xff] %v1473_v21  ;;  %v796_v29 = vmul.f32 0.9699707, %v527_v18  ;;  %v798_v30 = vmul.f32 0.9699707, %v529_v19  ;;  %v797_v31 = vmul.f32 0.9699707, %v528_v20 }
 0x128   : > { %v594_v35 = vmul.f32 0.75, %v457_v56  ;;  %v596_v36 = vmul.f32 0.75, %v500_v57  ;;  %v597_v37 = vmul.f32 0.75, %v459_v61  ;;  %v599_v38 = vmul.f32 0.75, %v502_v62 }
 0x129   : > { %v580_v24 = vadd.f32 %v1353_v8, %v579_v15  ;;  %v530_v43 = vsel %vm522_vm9, 0.0, %v504_v0  ;;  %v598_v49 = vmul.f32 0.75, %v461_v63  ;;  %v600_v50 = vmul.f32 0.75, %v504_v0 }
 0x12a   : > { %v799_v0 = vmul.f32 0.9699707, %v530_v43 }
 0x12b   : > { %v581_v32 = vadd.f32 %v1354_v16, %v580_v24 }
 0x12d   : > { %v732_v33 = vpop.f32.mrb[4].mxu0  ;;  %v775_v34 = vpop.f32.mrb[4].mxu1  ;;  %v582_v44 = vadd.f32 %v1355_v17, %v581_v32 }
 0x12e   : > { %v784_v39 = vadd.f32 %v732_v33, %v593_v22  ;;  %v786_v40 = vadd.f32 %v775_v34, %v595_v23  ;;  %v734_v41 = vpop.f32.mrb[5].mxu0  ;;  %v777_v42 = vpop.f32.mrb[5].mxu1 }
 0x12f   : > { %v785_v45 = vadd.f32 %v734_v41, %v594_v35  ;;  %v787_v46 = vadd.f32 %v777_v42, %v596_v36  ;;  %v736_v47 = vpop.f32.mrb[6].mxu0  ;;  %v779_v48 = vpop.f32.mrb[6].mxu1  ;;  %583 = vadd.xlane.f32.xlu0 %v582_v44 }
 0x130   : > { %v800_v51 = vadd.f32 %v792_v25, %v784_v39  ;;  %v802_v52 = vadd.f32 %v794_v26, %v786_v40  ;;  %v788_v53 = vadd.f32 %v736_v47, %v597_v37  ;;  %v790_v54 = vadd.f32 %v779_v48, %v599_v38  ;;  %v738_v55 = vpop.f32.mrb[7].mxu0  ;;  %v781_v56 = vpop.f32.mrb[7].mxu1 }
 0x131   : > { %v801_v57 = vadd.f32 %v793_v27, %v785_v45  ;;  %v803_v59 = vadd.f32 %v795_v28, %v787_v46  ;;  %v789_v60 = vadd.f32 %v738_v55, %v598_v49  ;;  %v791_v61 = vadd.f32 %v781_v56, %v600_v50 }
 0x132   : > { %vm808_vm10 = vcmp.ge.f32.partialorder %v800_v51, 1.25  ;;  %vm810_vm11 = vcmp.ge.f32.partialorder %v802_v52, 1.25  ;;  %v804_v62 = vadd.f32 %v796_v29, %v788_v53  ;;  %v806_v1 = vadd.f32 %v798_v30, %v790_v54 }
 0x133   : > { %v816_v2 = vsel %vm808_vm10, 0.0, %v800_v51  ;;  %v1398_v3 = vsel %vm808_vm10, 1.0, %v1609_v58  ;;  %v1400_v63 = vsel %vm810_vm11, 1.0, %v1609_v58  ;;  %v818_v4 = vsel %vm810_vm11, 0.0, %v802_v52 }
 0x134   : > { %vm809_vm12 = vcmp.ge.f32.partialorder %v801_v57, 1.25  ;;  %vm811_vm13 = vcmp.ge.f32.partialorder %v803_v59, 1.25  ;;  %vm812_vm14 = vcmp.ge.f32.partialorder %v804_v62, 1.25  ;;  %vm814_vm15 = vcmp.ge.f32.partialorder %v806_v1, 1.25 }
 0x135   : > { %v817_v5 = vsel %vm809_vm12, 0.0, %v801_v57  ;;  %v1399_v6 = vsel %vm809_vm12, 1.0, %v1609_v58  ;;  %v1401_v7 = vsel %vm811_vm13, 1.0, %v1609_v58  ;;  %v819_v10 = vsel %vm811_vm13, 0.0, %v803_v59 }
 0x136   : > { %v1474_v8 = vpack.c.bf16 %v1399_v6, %v1398_v3  ;;  %v869_v9 = vadd.f32 %v1399_v6, %v1398_v3  ;;  %v1475_v11 = vpack.c.bf16 %v1401_v7, %v1400_v63  ;;  %v820_v12 = vsel %vm812_vm14, 0.0, %v804_v62 }
 0x137   : > { %v1402_v13 = vsel %vm812_vm14, 1.0, %v1609_v58  ;;  %v805_v14 = vadd.f32 %v797_v31, %v789_v60  ;;  %v807_v15 = vadd.f32 %v799_v0, %v791_v61  ;;  %v822_v17 = vsel %vm814_vm15, 0.0, %v806_v1 }
 0x138   : > { %1410 = vst [vmem:[%s1792_s4 + $0x40] sm:$0xff] %v1474_v8  ;;  %1411 = vst [vmem:[%s1792_s4 + $0x48] sm:$0xff] %v1475_v11  ;;  %v870_v16 = vadd.f32 %v1400_v63, %v869_v9  ;;  %v886_v18 = vmul.f32 0.75, %v784_v39  ;;  %v1085_v19 = vmul.f32 0.9699707, %v816_v2  ;;  %v888_v20 = vmul.f32 0.75, %v786_v40 }
 0x139   : > { %vm813_vm0 = vcmp.ge.f32.partialorder %v805_v14, 1.25  ;;  %v1087_v21 = vmul.f32 0.9699707, %v818_v4  ;;  %v887_v22 = vmul.f32 0.75, %v785_v45  ;;  %v1086_v26 = vmul.f32 0.9699707, %v817_v5 }
 0x13a   : > { %v871_v23 = vadd.f32 %v1401_v7, %v870_v16  ;;  %v821_v24 = vsel %vm813_vm0, 0.0, %v805_v14  ;;  %v1403_v25 = vsel %vm813_vm0, 1.0, %v1609_v58  ;;  %v889_v28 = vmul.f32 0.75, %v787_v46 }
 0x13b   : > { %v1476_v27 = vpack.c.bf16 %v1403_v25, %v1402_v13  ;;  %v1088_v29 = vmul.f32 0.9699707, %v819_v10  ;;  %v890_v30 = vmul.f32 0.75, %v788_v53  ;;  %v1089_v32 = vmul.f32 0.9699707, %v820_v12 }
 0x13c   : > { %v872_v31 = vadd.f32 %v1402_v13, %v871_v23  ;;  %v892_v33 = vmul.f32 0.75, %v790_v54  ;;  %v1091_v34 = vmul.f32 0.9699707, %v822_v17  ;;  %v891_v37 = vmul.f32 0.75, %v789_v60 }
 0x13d   : > { %1412 = vst [vmem:[%s1792_s4 + $0x50] sm:$0xff] %v1476_v27  ;;  %v1025_v35 = vpop.f32.mrb[8].mxu0  ;;  %v1068_v36 = vpop.f32.mrb[8].mxu1  ;;  %v893_v38 = vmul.f32 0.75, %v791_v61  ;;  %vm815_vm1 = vcmp.ge.f32.partialorder %v807_v15, 1.25  ;;  %v1404_v39 = vsel %vm814_vm15, 1.0, %v1609_v58 }
 0x13e   : > { %v1077_v40 = vadd.f32 %v1025_v35, %v886_v18  ;;  %v1079_v41 = vadd.f32 %v1068_v36, %v888_v20  ;;  %v1027_v42 = vpop.f32.mrb[9].mxu0  ;;  %v1070_v43 = vpop.f32.mrb[9].mxu1  ;;  %v823_v44 = vsel %vm815_vm1, 0.0, %v807_v15  ;;  %v1405_v45 = vsel %vm815_vm1, 1.0, %v1609_v58 }
 0x13f   : > { %v1078_v46 = vadd.f32 %v1027_v42, %v887_v22  ;;  %v1080_v47 = vadd.f32 %v1070_v43, %v889_v28  ;;  %v1029_v48 = vpop.f32.mrb[10].mxu0  ;;  %v1072_v49 = vpop.f32.mrb[10].mxu1  ;;  %v1477_v50 = vpack.c.bf16 %v1405_v45, %v1404_v39  ;;  %v873_v51 = vadd.f32 %v1403_v25, %v872_v31 }
 0x140   : > { %v1093_v52 = vadd.f32 %v1085_v19, %v1077_v40  ;;  %v1095_v53 = vadd.f32 %v1087_v21, %v1079_v41  ;;  %v1081_v54 = vadd.f32 %v1029_v48, %v890_v30  ;;  %v1083_v55 = vadd.f32 %v1072_v49, %v892_v33  ;;  %v1031_v56 = vpop.f32.mrb[11].mxu0  ;;  %v1074_v57 = vpop.f32.mrb[11].mxu1  ;;  %v1202_v48 = vld [vmem:[%s1792_s4 + $0x8] sm:$0xff] (%p1661_p5)  ;;  %v1204_v49 = vld [vmem:[%s1792_s4 + $0x10] sm:$0xff] (%p1661_p5) }
 0x141   : > { %v1094_v59 = vadd.f32 %v1086_v26, %v1078_v46  ;;  %v1096_v60 = vadd.f32 %v1088_v29, %v1080_v47  ;;  %v1082_v61 = vadd.f32 %v1031_v56, %v891_v37  ;;  %v1084_v62 = vadd.f32 %v1074_v57, %v893_v38  ;;  %1413 = vst [vmem:[%s1792_s4 + $0x58] sm:$0xff] %v1477_v50  ;;  %v1200_v47 = vld [vmem:[%s1792_s4] sm:$0xff] (%p1661_p5)  ;;  %v1206_v50 = vld [vmem:[%s1792_s4 + $0x18] sm:$0xff] (%p1661_p5)  ;;  %v1218_v56 = vld [vmem:[%s1792_s4 + $0x48] sm:$0xff] (%p1661_p5) }
 0x142   : > { %vm1101_vm2 = vcmp.ge.f32.partialorder %v1093_v52, 1.25  ;;  %vm1103_vm3 = vcmp.ge.f32.partialorder %v1095_v53, 1.25  ;;  %v1097_v1 = vadd.f32 %v1089_v32, %v1081_v54  ;;  %v1099_v2 = vadd.f32 %v1091_v34, %v1083_v55  ;;  %v1210_v52 = vld [vmem:[%s1792_s4 + $0x28] sm:$0xff] (%p1661_p5)  ;;  %1201 = vst [vmem:[%s1187_s26] sm:$0xff] (%p1661_p5), %v1200_v47  ;;  %1203 = vst [vmem:[%s1187_s26 + $0x8] sm:$0xff] (%p1661_p5), %v1202_v48  ;;  %v1212_v53 = vld [vmem:[%s1792_s4 + $0x30] sm:$0xff] (%p1661_p5) }
 0x143   : > { %v1448_v3 = vsel %vm1101_vm2, 1.0, %v1609_v58  ;;  %v1450_v63 = vsel %vm1103_vm3, 1.0, %v1609_v58  ;;  %vm1102_vm4 = vcmp.ge.f32.partialorder %v1094_v59, 1.25  ;;  %vm1104_vm5 = vcmp.ge.f32.partialorder %v1096_v60, 1.25  ;;  %1205 = vst [vmem:[%s1187_s26 + $0x40] sm:$0xff] (%p1661_p5), %v1204_v49  ;;  %1207 = vst [vmem:[%s1187_s26 + $0x48] sm:$0xff] (%p1661_p5), %v1206_v50 }
 0x144   : > { %v1449_v0 = vsel %vm1102_vm4, 1.0, %v1609_v58  ;;  %v1451_v4 = vsel %vm1104_vm5, 1.0, %v1609_v58  ;;  %vm1105_vm6 = vcmp.ge.f32.partialorder %v1097_v1, 1.25  ;;  %v1090_v5 = vmul.f32 0.9699707, %v821_v24  ;;  %1211 = vst [vmem:[%s1187_s26 + $0x88] sm:$0xff] (%p1661_p5), %v1210_v52  ;;  %v1214_v54 = vld [vmem:[%s1792_s4 + $0x38] sm:$0xff] (%p1661_p5) }
 0x145   : > { %v1478_v6 = vpack.c.bf16 %v1449_v0, %v1448_v3  ;;  %v1154_v7 = vadd.f32 %v1449_v0, %v1448_v3  ;;  %v1479_v8 = vpack.c.bf16 %v1451_v4, %v1450_v63  ;;  %vm1107_vm7 = vcmp.ge.f32.partialorder %v1099_v2, 1.25  ;;  %v1216_v55 = vld [vmem:[%s1792_s4 + $0x40] sm:$0xff] (%p1661_p5)  ;;  %1213 = vst [vmem:[%s1187_s26 + $0xc0] sm:$0xff] (%p1661_p5), %v1212_v53  ;;  %1215 = vst [vmem:[%s1187_s26 + $0xc8] sm:$0xff] (%p1661_p5), %v1214_v54  ;;  %v1220_v57 = vld [vmem:[%s1792_s4 + $0x50] sm:$0xff] (%p1661_p5) }
 0x146   : > { %v1098_v9 = vadd.f32 %v1090_v5, %v1082_v61  ;;  %v874_v10 = vadd.f32 %v1404_v39, %v873_v51  ;;  %v1092_v11 = vmul.f32 0.9699707, %v823_v44  ;;  %v1452_v13 = vsel %vm1105_vm6, 1.0, %v1609_v58  ;;  %v1208_v51 = vld [vmem:[%s1792_s4 + $0x20] sm:$0xff] (%p1661_p5)  ;;  %1217 = vst [vmem:[%s1187_s26 + $0x100] sm:$0xff] (%p1661_p5), %v1216_v55  ;;  %1219 = vst [vmem:[%s1187_s26 + $0x108] sm:$0xff] (%p1661_p5), %v1218_v56 }
 0x147   : > { %1460 = vst [vmem:[%s1792_s4 + $0x60] sm:$0xff] %v1478_v6  ;;  %1461 = vst [vmem:[%s1792_s4 + $0x68] sm:$0xff] %v1479_v8  ;;  %v1155_v12 = vadd.f32 %v1450_v63, %v1154_v7  ;;  %v1454_v18 = vsel %vm1107_vm7, 1.0, %v1609_v58 }
 0x148   : > { %vm1106_vm8 = vcmp.ge.f32.partialorder %v1098_v9, 1.25  ;;  %v875_v14 = vadd.f32 %v1405_v45, %v874_v10  ;;  %v1100_v15 = vadd.f32 %v1092_v11, %v1084_v62  ;;  %1209 = vst [vmem:[%s1187_s26 + $0x80] sm:$0xff] (%p1661_p5), %v1208_v51  ;;  %v1222_v59 = vld [vmem:[%s1792_s4 + $0x58] sm:$0xff] (%p1661_p5)  ;;  %1221 = vst [vmem:[%s1187_s26 + $0x140] sm:$0xff] (%p1661_p5), %v1220_v57 }
 0x149   : > { %v1156_v16 = vadd.f32 %v1451_v4, %v1155_v12  ;;  %v1453_v17 = vsel %vm1106_vm8, 1.0, %v1609_v58  ;;  %1223 = vst [vmem:[%s1187_s26 + $0x148] sm:$0xff] (%p1661_p5), %v1222_v59 }
 0x14a   : > { %v1480_v19 = vpack.c.bf16 %v1453_v17, %v1452_v13  ;;  %876 = vadd.xlane.f32.xlu0 %v875_v14  ;;  %vm1108_vm9 = vcmp.ge.f32.partialorder %v1100_v15, 1.25 }
 0x14b   : > { %v1157_v20 = vadd.f32 %v1452_v13, %v1156_v16  ;;  %v1455_v21 = vsel %vm1108_vm9, 1.0, %v1609_v58 }
 0x14c   : > { %1462 = vst [vmem:[%s1792_s4 + $0x70] sm:$0xff] %v1480_v19  ;;  %v1481_v22 = vpack.c.bf16 %v1455_v21, %v1454_v18 }
 0x14d   : > { %v1158_v23 = vadd.f32 %v1453_v17, %v1157_v20 }
 0x14e   : > { %1463 = vst [vmem:[%s1792_s4 + $0x78] sm:$0xff] %v1481_v22  ;;  %v1224_v60 = vld [vmem:[%s1792_s4 + $0x60] sm:$0xff] (%p1661_p5)  ;;  %v1226_v61 = vld [vmem:[%s1792_s4 + $0x68] sm:$0xff] (%p1661_p5) }
 0x14f   : > { %v1159_v24 = vadd.f32 %v1454_v18, %v1158_v23  ;;  %1225 = vst [vmem:[%s1187_s26 + $0x180] sm:$0xff] (%p1661_p5), %v1224_v60  ;;  %1227 = vst [vmem:[%s1187_s26 + $0x188] sm:$0xff] (%p1661_p5), %v1226_v61 }
 0x151   : > { %v1160_v25 = vadd.f32 %v1455_v21, %v1159_v24 }
 0x153   : > { %1161 = vadd.xlane.f32.xlu1 %v1160_v25  ;;  %v1228_v62 = vld [vmem:[%s1792_s4 + $0x70] sm:$0xff] (%p1661_p5) }
 0x154   : > { %1229 = vst [vmem:[%s1187_s26 + $0x1c0] sm:$0xff] (%p1661_p5), %v1228_v62 }
 0x155   : > { %v1230_v1 = vld [vmem:[%s1792_s4 + $0x78] sm:$0xff] (%p1661_p5) }
 0x156   : > { %1231 = vst [vmem:[%s1187_s26 + $0x1c8] sm:$0xff] (%p1661_p5), %v1230_v1 }
 0x1bc   : > { %v584_v26 = vpop.xlane.xlu0 %583 }
 0x1bd   : > { %v585_v27 = vrot.slane %v584_v26, 4 }
 0x1bf   : > { %v586_v28 = vadd.f32 %v585_v27, %v584_v26 }
 0x1c1   : > { %v587_v29 = vrot.slane %v586_v28, 2 }
 0x1c3   : > { %v588_v30 = vadd.f32 %v587_v29, %v586_v28 }
 0x1c5   : > { %v589_v31 = vrot.slane %v588_v30, 1 }
 0x1c7   : > { %v590_v32 = vadd.f32 %v589_v31, %v588_v30 }
 0x1c9   : > { %1485 = vpush %v590_v32 }
 0x1d7   : > { %v877_v33 = vpop.xlane.xlu0 %876 }
 0x1d8   : > { %v878_v34 = vrot.slane %v877_v33, 4 }
 0x1da   : > { %v879_v58 = vadd.f32 %v878_v34, %v877_v33 }
 0x1dc   : > { %v880_v35 = vrot.slane %v879_v58, 2 }
 0x1de   : > { %v881_v36 = vadd.f32 %v880_v35, %v879_v58 }
 0x1e0   : > { %v882_v37 = vrot.slane %v881_v36, 1  ;;  %v1162_v38 = vpop.xlane.xlu1 %1161 }
 0x1e1   : > { %v1163_v39 = vrot.slane %v1162_v38, 4 }
 0x1e2   : > { %v883_v40 = vadd.f32 %v882_v37, %v881_v36 }
 0x1e3   : > { %v1164_v41 = vadd.f32 %v1163_v39, %v1162_v38 }
 0x1e4   : > { %1487 = vpush %v883_v40 }
 0x1e5   : > { %v1165_v42 = vrot.slane %v1164_v41, 2 }
 0x1e7   : > { %v1166_v43 = vadd.f32 %v1165_v42, %v1164_v41 }
 0x1e9   : > { %v1167_v44 = vrot.slane %v1166_v43, 1 }
 0x1eb   : > { %v1168_v45 = vadd.f32 %v1167_v44, %v1166_v43 }
 0x1ed   : > { %1489 = vpush %v1168_v45 }
 0x1fa   : > { %s1486_s9 = spop %1485 }
 0x215   : > { %s1488_s10 = spop %1487 }
 0x216   : > { %s885_s12 = sadd.f32 %s1488_s10, %s1486_s9 }
 0x21c   : > { %1184 = sbr.rel (!%p1661_p5) target bundleno = 547 (0x223), region = 55 }
 0x21e   : > { %s1490_s14 = spop %1489 }
 0x21f   : > { %s1170_s22 = sadd.f32 %s1490_s14, %s885_s12 }
 0x221   : > { %v1171_v46 = vstv %s1170_s22 }
 0x222   : > { %1173 = vst [vmem:[%s307_s21] sm:$0xff] %v1171_v46 }
 0x223 PF: > { %p11_p11 = scmp.ge.s32.totalorder %s1649_s16, 6   ;;  %s1973_s12 = smov %s1602_s13 }
 0x224   : > { %s1974_s13 = smov %s1659_s19  ;;  %s1975_s14 = smov %s1649_s16 }
 0x225   :  { %13 = sbr.rel (!%p11_p11) target bundleno = 2 (0x2), region = 126 }

// kernel: network_forward.9
= control target key start
LH: loop header
LB: loop body
LE: loop exit
PB: predicated region body
PF: predicated region fallthrough
CT: control target
= control target key end

     0   :  { %s658_s9 = smov 0   ;;  %s660_s10 = smov 0   ;;  %s787_s0 = inlined_call_operand.vmem [shape: f32[4,8,1024], index: 0, kind: input, shape index: {}]   ;;  %s788_s1 = inlined_call_operand.vmem [shape: bf16[4,8,1024], index: 1, kind: output, shape index: {0}]   ;;  %s789_s2 = inlined_call_operand.vmem [shape: f32[2,8,128], index: 2, kind: output, shape index: {1}]  }
   0x1   :  { %s662_s11 = smov 0  }
   0x2 LB: > { %s674_s12 = sadd.s32 4294967295, %s639_s11   ;;  %s677_s13 = sadd.s32 1, %s639_s11   ;;  %s639_s11 = sphi %s662_s11, %s793_s11   ;;  %s635_s10 = sphi %s660_s10, %s792_s10   ;;  %s631_s9 = sphi %s658_s9, %s791_s9  }
   0x3   : > { %s17_s14 = ssub.s32 %s639_s11, %s677_s13  ;;  %s20_s15 = sadd.s32 1, %s635_s10 }
   0x4   : > { %p18_p0 = scmp.eq.s32.totalorder %s17_s14, 0  ;;  %p27_p1 = scmp.ne.s32.totalorder %s635_s10, %s631_s9 }
   0x5   : > { %p28_p2 = scmp.eq.s32.totalorder %s639_s11, 0  ;;  %p57_p3 = scmp.eq.s32.totalorder %s674_s12, 1 }
   0x6   : > { %s687_s16 = scalar_select %p18_p0, %s635_s10, %s20_s15  }
   0x7   : > { %p29_p4 = por %p28_p2, %p27_p1  ;;  %p689_p5 = por %p57_p3, %p27_p1 }
   0x8   : > { %p532_p6 = scmp.ge.s32.totalorder %s639_s11, 2 }
   0xa   : > { %105 = sbr.rel (%p532_p6) target bundleno = 29 (0x1d), region = 16 }
  0x11   : > { %108 = sbr.rel (!%p29_p4) target bundleno = 29 (0x1d), region = 20  ;;  %s110_s18 = sand.u32 (%p29_p4), 1, %s635_s10  }
  0x12   : > { %s577_s19 = sshll.u32 (%p29_p4), %s639_s11, 5  ;;  %s533_s20 = sshll.u32 (%p29_p4), %s110_s18, 7 }
  0x13   : > { %s699_s23 = scalar_lea.vmem (%p29_p4), %s787_s0, %s577_s19  ;;  %s112_s24 = scalar_lea.vmem (%p29_p4), [#allocation2], %s533_s20 }
  0x14   : > { %v128_v0 = vld [vmem:[%s699_s23] sm:$0xff] (%p29_p4)  ;;  %v130_v1 = vld [vmem:[%s699_s23 + $0x8] sm:$0xff] (%p29_p4)  ;;  %v132_v2 = vld [vmem:[%s699_s23 + $0x10] sm:$0xff] (%p29_p4) }
  0x15   : > { %129 = vst [vmem:[%s112_s24] sm:$0xff] (%p29_p4), %v128_v0  ;;  %131 = vst [vmem:[%s112_s24 + $0x8] sm:$0xff] (%p29_p4), %v130_v1  ;;  %v134_v3 = vld [vmem:[%s699_s23 + $0x18] sm:$0xff] (%p29_p4)  ;;  %v136_v4 = vld [vmem:[%s699_s23 + $0x40] sm:$0xff] (%p29_p4) }
  0x16   : > { %133 = vst [vmem:[%s112_s24 + $0x10] sm:$0xff] (%p29_p4), %v132_v2  ;;  %v138_v5 = vld [vmem:[%s699_s23 + $0x48] sm:$0xff] (%p29_p4)  ;;  %135 = vst [vmem:[%s112_s24 + $0x18] sm:$0xff] (%p29_p4), %v134_v3  ;;  %v140_v6 = vld [vmem:[%s699_s23 + $0x50] sm:$0xff] (%p29_p4) }
  0x17   : > { %137 = vst [vmem:[%s112_s24 + $0x20] sm:$0xff] (%p29_p4), %v136_v4  ;;  %139 = vst [vmem:[%s112_s24 + $0x28] sm:$0xff] (%p29_p4), %v138_v5  ;;  %v142_v7 = vld [vmem:[%s699_s23 + $0x58] sm:$0xff] (%p29_p4)  ;;  %v144_v8 = vld [vmem:[%s699_s23 + $0x80] sm:$0xff] (%p29_p4) }
  0x18   : > { %141 = vst [vmem:[%s112_s24 + $0x30] sm:$0xff] %v140_v6  ;;  %143 = vst [vmem:[%s112_s24 + $0x38] sm:$0xff] %v142_v7  ;;  %v146_v9 = vld [vmem:[%s699_s23 + $0x88] sm:$0xff]  ;;  %v148_v10 = vld [vmem:[%s699_s23 + $0x90] sm:$0xff] }
  0x19   : > { %145 = vst [vmem:[%s112_s24 + $0x40] sm:$0xff] %v144_v8  ;;  %v150_v11 = vld [vmem:[%s699_s23 + $0x98] sm:$0xff]  ;;  %147 = vst [vmem:[%s112_s24 + $0x48] sm:$0xff] %v146_v9  ;;  %v152_v12 = vld [vmem:[%s699_s23 + $0xc0] sm:$0xff] }
  0x1a   : > { %149 = vst [vmem:[%s112_s24 + $0x50] sm:$0xff] %v148_v10  ;;  %151 = vst [vmem:[%s112_s24 + $0x58] sm:$0xff] %v150_v11  ;;  %v154_v13 = vld [vmem:[%s699_s23 + $0xc8] sm:$0xff]  ;;  %v156_v14 = vld [vmem:[%s699_s23 + $0xd0] sm:$0xff] }
  0x1b   : > { %153 = vst [vmem:[%s112_s24 + $0x60] sm:$0xff] %v152_v12  ;;  %155 = vst [vmem:[%s112_s24 + $0x68] sm:$0xff] %v154_v13  ;;  %v158_v15 = vld [vmem:[%s699_s23 + $0xd8] sm:$0xff] }
  0x1c   : > { %157 = vst [vmem:[%s112_s24 + $0x70] sm:$0xff] %v156_v14  ;;  %159 = vst [vmem:[%s112_s24 + $0x78] sm:$0xff] %v158_v15 }
  0x1d PF: > { %p536_p7 = scmp.ge.s32.totalorder %s639_s11, 1  ;;  %p164_p8 = scmp.lt.s32.totalorder %s639_s11, 3 }
  0x1f   : > { %p165_p9 = pnand %p536_p7, %p164_p8 }
  0x20   : > { %s171_s25 = sand.u32 (!%p165_p9), 1, %s631_s9   ;;  %v641_v16 = vmov (!%p165_p9), 0   ;;  %v642_v24 = vmov (!%p165_p9), 0.0   ;;  %p197_p10 = scmp.lt.s32.totalorder (!%p165_p9), %s674_s12, 1 }
  0x21   : > { %168 = sbr.rel (%p165_p9) target bundleno = 270 (0x10e), region = 43  ;;  %s537_s26 = sshll.u32 (!%p165_p9), %s171_s25, 7 }
  0x22   : > { %s538_s27 = sshll.u32 (!%p165_p9), %s171_s25, 6  ;;  %s724_s29 = scalar_lea.vmem (!%p165_p9), [#allocation2], %s537_s26 }
  0x23   : > { %s720_s28 = scalar_lea.vmem (!%p165_p9), [#allocation3], %s538_s27  ;;  %v204_v17 = vld [vmem:[%s724_s29] sm:$0xff] (!%p165_p9)  ;;  %v205_v18 = vld [vmem:[%s724_s29 + $0x8] sm:$0xff] (!%p165_p9)  ;;  %v206_v19 = vld [vmem:[%s724_s29 + $0x10] sm:$0xff] (!%p165_p9) }
  0x24   : > { %202 = vst [vmem:[%s720_s28] sm:$0xff] (!%p165_p9), %v641_v16  ;;  %203 = vst [vmem:[%s720_s28 + $0x8] sm:$0xff] (!%p165_p9), %v641_v16  ;;  %v207_v20 = vld [vmem:[%s724_s29 + $0x18] sm:$0xff] (!%p165_p9)  ;;  %vm216_vm0 = vcmp.ge.f32.partialorder (!%p165_p9), %v204_v17, 1.25  ;;  %vm217_vm1 = vcmp.ge.f32.partialorder (!%p165_p9), %v205_v18, 1.25  ;;  %vm218_vm2 = vcmp.ge.f32.partialorder (!%p165_p9), %v206_v19, 1.25  ;;  %v264_v21 = vmul.f32 (!%p165_p9), 0.75, %v204_v17 }
  0x25   : > { %vm219_vm3 = vcmp.ge.f32.partialorder (!%p165_p9), %v207_v20, 1.25  ;;  %v221_v22 = vsel (!%p165_p9), %vm217_vm1, 0.0, %v205_v18  ;;  %v222_v23 = vsel (!%p165_p9), %vm218_vm2, 0.0, %v206_v19  ;;  %v540_v25 = vsel (!%p165_p9), %vm216_vm0, 1.0, %v642_v24  ;;  %v548_v26 = vld [vmem:[%s724_s29 + $0x20] sm:$0xff] (!%p165_p9)  ;;  %v549_v31 = vld [vmem:[%s724_s29 + $0x28] sm:$0xff] (!%p165_p9) }
  0x26   : > { %v223_v27 = vsel (!%p165_p9), %vm219_vm3, 0.0, %v207_v20  ;;  %v541_v28 = vsel (!%p165_p9), %vm217_vm1, 1.0, %v642_v24  ;;  %v542_v29 = vsel (!%p165_p9), %vm218_vm2, 1.0, %v642_v24  ;;  %v543_v30 = vsel (!%p165_p9), %vm219_vm3, 1.0, %v642_v24  ;;  %v550_v32 = vld [vmem:[%s724_s29 + $0x30] sm:$0xff] (!%p165_p9)  ;;  %v551_v37 = vld [vmem:[%s724_s29 + $0x38] sm:$0xff] (!%p165_p9) }
  0x27   : > { %v579_v33 = vpack.c.bf16 (!%p165_p9), %v543_v30, %v542_v29  ;;  %v251_v34 = vadd.f32 (!%p165_p9), %v541_v28, %v540_v25  ;;  %v265_v35 = vmul.f32 (!%p165_p9), 0.75, %v205_v18  ;;  %v266_v36 = vmul.f32 (!%p165_p9), 0.75, %v206_v19  ;;  %v560_v50 = vld [vmem:[%s724_s29 + $0x40] sm:$0xff] (!%p165_p9)  ;;  %v561_v60 = vld [vmem:[%s724_s29 + $0x48] sm:$0xff] (!%p165_p9)  ;;  %v562_v1 = vld [vmem:[%s724_s29 + $0x50] sm:$0xff] (!%p165_p9) }
  0x28   : > { %v267_v38 = vmul.f32 0.75, %v207_v20  ;;  %v273_v39 = vadd.f32 %v548_v26, %v264_v21  ;;  %v278_v40 = vmul.f32 0.9699707, %v221_v22  ;;  %v279_v41 = vmul.f32 0.9699707, %v222_v23  ;;  %v563_v2 = vld [vmem:[%s724_s29 + $0x58] sm:$0xff]  ;;  %s198_s30 = scalar_select %p197_p10, %s674_s12, 1 }
  0x29   : > { %547 = vst [vmem:[%s720_s28 + $0x18] sm:$0xff] %v579_v33  ;;  %v252_v42 = vadd.f32 %v542_v29, %v251_v34  ;;  %v274_v43 = vadd.f32 %v549_v31, %v265_v35  ;;  %v275_v44 = vadd.f32 %v550_v32, %v266_v36  ;;  %v280_v45 = vmul.f32 0.9699707, %v223_v27  ;;  %s584_s15 = sshll.u32 (%p689_p5), %s674_s12, 4 }
  0x2a   : > { %v276_v46 = vadd.f32 %v551_v37, %v267_v38  ;;  %v220_v47 = vsel %vm216_vm0, 0.0, %v204_v17  ;;  %v578_v48 = vpack.c.bf16 %v541_v28, %v540_v25  ;;  %v333_v49 = vmul.f32 0.75, %v273_v39  ;;  %s539_s5 = sshll.u32 %s198_s30, 3  ;;  %s414_s20 = scalar_lea.vmem (%p689_p5), %s788_s1, %s584_s15 }
  0x2b   : > { %v253_v51 = vadd.f32 %v543_v30, %v252_v42  ;;  %v282_v52 = vadd.f32 %v278_v40, %v274_v43  ;;  %v283_v53 = vadd.f32 %v279_v41, %v275_v44  ;;  %v277_v54 = vmul.f32 0.9699707, %v220_v47  ;;  %s200_s11 = scalar_lea.vmem %s789_s2, %s539_s5 }
  0x2c   : > { %v284_v55 = vadd.f32 %v280_v45, %v276_v46  ;;  %546 = vst [vmem:[%s720_s28 + $0x10] sm:$0xff] %v578_v48  ;;  %v334_v56 = vmul.f32 0.75, %v274_v43  ;;  %v335_v57 = vmul.f32 0.75, %v275_v44  ;;  %v336_v58 = vmul.f32 0.75, %v276_v46 }
  0x2d   : > { %254 = vadd.xlane.f32.xlu0 %v253_v51  ;;  %v281_v59 = vadd.f32 %v277_v54, %v273_v39  ;;  %vm286_vm4 = vcmp.ge.f32.partialorder %v282_v52, 1.25  ;;  %vm287_vm5 = vcmp.ge.f32.partialorder %v283_v53, 1.25  ;;  %v342_v61 = vadd.f32 %v560_v50, %v333_v49 }
  0x2e   : > { %vm288_vm6 = vcmp.ge.f32.partialorder %v284_v55, 1.25  ;;  %v290_v62 = vsel %vm286_vm4, 0.0, %v282_v52  ;;  %v291_v63 = vsel %vm287_vm5, 0.0, %v283_v53  ;;  %v553_v0 = vsel %vm286_vm4, 1.0, %v642_v24 }
  0x2f   : > { %vm285_vm7 = vcmp.ge.f32.partialorder %v281_v59, 1.25  ;;  %v292_v3 = vsel %vm288_vm6, 0.0, %v284_v55  ;;  %v554_v4 = vsel %vm287_vm5, 1.0, %v642_v24  ;;  %v555_v5 = vsel %vm288_vm6, 1.0, %v642_v24  ;;  %v427_v55 = vld [vmem:[%s720_s28] sm:$0xff] (%p689_p5) }
  0x30   : > { %v552_v6 = vsel %vm285_vm7, 1.0, %v642_v24  ;;  %v581_v7 = vpack.c.bf16 %v555_v5, %v554_v4  ;;  %v289_v8 = vsel %vm285_vm7, 0.0, %v281_v59  ;;  %v343_v9 = vadd.f32 %v561_v60, %v334_v56  ;;  %v429_v56 = vld [vmem:[%s720_s28 + $0x8] sm:$0xff] (%p689_p5)  ;;  %428 = vst [vmem:[%s414_s20] sm:$0xff] (%p689_p5), %v427_v55 }
  0x31   : > { %v320_v10 = vadd.f32 %v553_v0, %v552_v6  ;;  %v580_v11 = vpack.c.bf16 %v553_v0, %v552_v6  ;;  %v344_v12 = vadd.f32 %v562_v1, %v335_v57  ;;  %v345_v13 = vadd.f32 %v563_v2, %v336_v58  ;;  %v433_v58 = vld [vmem:[%s720_s28 + $0x18] sm:$0xff] (%p689_p5)  ;;  %430 = vst [vmem:[%s414_s20 + $0x8] sm:$0xff] (%p689_p5), %v429_v56 }
  0x32   : > { %559 = vst [vmem:[%s720_s28 + $0x28] sm:$0xff] %v581_v7  ;;  %v346_v14 = vmul.f32 0.9699707, %v289_v8  ;;  %v347_v15 = vmul.f32 0.9699707, %v290_v62  ;;  %v348_v16 = vmul.f32 0.9699707, %v291_v63  ;;  %v349_v17 = vmul.f32 0.9699707, %v292_v3  ;;  %434 = vst [vmem:[%s414_s20 + $0x28] sm:$0xff] (%p689_p5), %v433_v58 }
  0x33   : > { %v321_v18 = vadd.f32 %v554_v4, %v320_v10  ;;  %558 = vst [vmem:[%s720_s28 + $0x20] sm:$0xff] %v580_v11  ;;  %v431_v57 = vld [vmem:[%s720_s28 + $0x10] sm:$0xff] (%p689_p5) }
  0x34   : > { %v350_v19 = vadd.f32 %v346_v14, %v342_v61  ;;  %v351_v20 = vadd.f32 %v347_v15, %v343_v9  ;;  %v352_v21 = vadd.f32 %v348_v16, %v344_v12  ;;  %v353_v22 = vadd.f32 %v349_v17, %v345_v13  ;;  %432 = vst [vmem:[%s414_s20 + $0x20] sm:$0xff] (%p689_p5), %v431_v57 }
  0x35   : > { %v322_v23 = vadd.f32 %v555_v5, %v321_v18 }
  0x36   : > { %vm354_vm8 = vcmp.ge.f32.partialorder %v350_v19, 1.25  ;;  %vm355_vm9 = vcmp.ge.f32.partialorder %v351_v20, 1.25  ;;  %vm356_vm10 = vcmp.ge.f32.partialorder %v352_v21, 1.25  ;;  %vm357_vm11 = vcmp.ge.f32.partialorder %v353_v22, 1.25 }
  0x37   : > { %323 = vadd.xlane.f32.xlu0 %v322_v23  ;;  %v564_v25 = vsel %vm354_vm8, 1.0, %v642_v24  ;;  %v565_v26 = vsel %vm355_vm9, 1.0, %v642_v24  ;;  %v566_v27 = vsel %vm356_vm10, 1.0, %v642_v24  ;;  %v567_v28 = vsel %vm357_vm11, 1.0, %v642_v24 }
  0x38   : > { %v583_v29 = vpack.c.bf16 %v567_v28, %v566_v27  ;;  %v385_v30 = vadd.f32 %v565_v26, %v564_v25  ;;  %v582_v31 = vpack.c.bf16 %v565_v26, %v564_v25 }
  0x39   : > { %v437_v60 = vld [vmem:[%s720_s28 + $0x28] sm:$0xff] (%p689_p5) }
  0x3a   : > { %571 = vst [vmem:[%s720_s28 + $0x38] sm:$0xff] %v583_v29  ;;  %v386_v32 = vadd.f32 %v566_v27, %v385_v30  ;;  %570 = vst [vmem:[%s720_s28 + $0x30] sm:$0xff] %v582_v31  ;;  %v435_v59 = vld [vmem:[%s720_s28 + $0x20] sm:$0xff] (%p689_p5) }
  0x3b   : > { %436 = vst [vmem:[%s414_s20 + $0x40] sm:$0xff] (%p689_p5), %v435_v59  ;;  %438 = vst [vmem:[%s414_s20 + $0x48] sm:$0xff] (%p689_p5), %v437_v60 }
  0x3c   : > { %v387_v33 = vadd.f32 %v567_v28, %v386_v32 }
  0x3e   : > { %388 = vadd.xlane.f32.xlu1 %v387_v33 }
  0x41   : > { %v439_v61 = vld [vmem:[%s720_s28 + $0x30] sm:$0xff] (%p689_p5)  ;;  %v441_v62 = vld [vmem:[%s720_s28 + $0x38] sm:$0xff] (%p689_p5) }
  0x42   : > { %440 = vst [vmem:[%s414_s20 + $0x60] sm:$0xff] (%p689_p5), %v439_v61  ;;  %442 = vst [vmem:[%s414_s20 + $0x68] sm:$0xff] (%p689_p5), %v441_v62 }
  0xba   : > { %v255_v34 = vpop.xlane.xlu0 %254 }
  0xbb   : > { %v256_v35 = vrot.slane %v255_v34, 4 }
  0xbd   : > { %v257_v36 = vadd.f32 %v256_v35, %v255_v34 }
  0xbf   : > { %v258_v37 = vrot.slane %v257_v36, 2 }
  0xc1   : > { %v259_v38 = vadd.f32 %v258_v37, %v257_v36 }
  0xc3   : > { %v260_v39 = vrot.slane %v259_v38, 1 }
  0xc4   : > { %v324_v40 = vpop.xlane.xlu0 %323 }
  0xc5   : > { %v325_v41 = vrot.slane %v324_v40, 4  ;;  %v261_v42 = vadd.f32 %v260_v39, %v259_v38 }
  0xc7   : > { %v326_v43 = vadd.f32 %v325_v41, %v324_v40  ;;  %585 = vpush %v261_v42 }
  0xc9   : > { %v327_v24 = vrot.slane %v326_v43, 2 }
  0xcb   : > { %v328_v44 = vadd.f32 %v327_v24, %v326_v43  ;;  %v389_v45 = vpop.xlane.xlu1 %388 }
  0xcc   : > { %v390_v46 = vrot.slane %v389_v45, 4 }
  0xcd   : > { %v329_v47 = vrot.slane %v328_v44, 1 }
  0xce   : > { %v391_v48 = vadd.f32 %v390_v46, %v389_v45 }
  0xcf   : > { %v330_v49 = vadd.f32 %v329_v47, %v328_v44 }
  0xd0   : > { %v392_v50 = vrot.slane %v391_v48, 2 }
  0xd1   : > { %587 = vpush %v330_v49 }
  0xd2   : > { %v393_v51 = vadd.f32 %v392_v50, %v391_v48 }
  0xd4   : > { %v394_v52 = vrot.slane %v393_v51, 1 }
  0xd6   : > { %v395_v53 = vadd.f32 %v394_v52, %v393_v51 }
  0xd8   : > { %589 = vpush %v395_v53 }
  0xf8   : > { %s586_s3 = spop %585 }
 0x102   : > { %s588_s4 = spop %587 }
 0x103   : > { %s332_s6 = sadd.f32 %s588_s4, %s586_s3 }
 0x107   : > { %411 = sbr.rel (!%p689_p5) target bundleno = 270 (0x10e), region = 51 }
 0x109   : > { %s590_s7 = spop %589 }
 0x10a   : > { %s397_s14 = sadd.f32 %s590_s7, %s332_s6 }
 0x10c   : > { %v398_v54 = vstv %s397_s14 }
 0x10d   : > { %400 = vst [vmem:[%s200_s11] sm:$0xff] %v398_v54 }
 0x10e PF: > { %p10_p11 = scmp.ge.s32.totalorder %s677_s13, 4   ;;  %s791_s9 = smov %s635_s10 }
 0x10f   : > { %s792_s10 = smov %s687_s16  ;;  %s793_s11 = smov %s677_s13 }
 0x110   :  { %12 = sbr.rel (!%p10_p11) target bundleno = 2 (0x2), region = 122 }

// kernel: network_forward.10
= control target key start
LH: loop header
LB: loop body
LE: loop exit
PB: predicated region body
PF: predicated region fallthrough
CT: control target
= control target key end

     0   :  { %s1867_s12 = smov 0   ;;  %s1869_s13 = smov 0   ;;  %s2284_s0 = inlined_call_operand.vmem [shape: bf16[4,144,512], index: 0, kind: input, shape index: {}]   ;;  %s2285_s1 = inlined_call_operand.vmem [shape: bf16[32,144], index: 1, kind: input, shape index: {}]   ;;  %s2286_s2 = inlined_call_operand.vmem [shape: bf16[4,32,512], index: 2, kind: output, shape index: {0}]   ;;  %s2287_s3 = inlined_call_operand.vmem [shape: f32[2,8,128], index: 3, kind: output, shape index: {1}]  }
   0x1   :  { %s1871_s14 = smov 0  }
   0x2 LB: > { %s1883_s15 = sadd.s32 4294967295, %s1843_s14   ;;  %s1886_s16 = sadd.s32 1, %s1843_s14   ;;  %s1843_s14 = sphi %s1871_s14, %s2291_s14   ;;  %s1839_s13 = sphi %s1869_s13, %s2290_s13   ;;  %s1835_s12 = sphi %s1867_s12, %s2289_s12  }
   0x3   : > { %s18_s17 = ssub.s32 %s1843_s14, %s1886_s16  ;;  %s21_s18 = sadd.s32 1, %s1839_s13 }
   0x4   : > { %p19_p0 = scmp.eq.s32.totalorder %s18_s17, 0  ;;  %p28_p1 = scmp.ne.s32.totalorder %s1839_s13, %s1835_s12 }
   0x5   : > { %p29_p2 = scmp.eq.s32.totalorder %s1843_s14, 0  ;;  %p79_p3 = scmp.eq.s32.totalorder %s1883_s15, 1 }
   0x6   : > { %s1896_s19 = scalar_select %p19_p0, %s1839_s13, %s21_s18  }
   0x7   : > { %p30_p4 = por %p29_p2, %p28_p1  ;;  %p1898_p5 = por %p79_p3, %p28_p1 }
   0x8   : > { %p1509_p6 = scmp.ge.s32.totalorder %s1843_s14, 2 }
   0xa   : > { %130 = sbr.rel (%p1509_p6) target bundleno = 57 (0x39), region = 20 }
  0x11   : > { %133 = sbr.rel (!%p30_p4) target bundleno = 57 (0x39), region = 24  ;;  %s135_s21 = sand.u32 (%p30_p4), 1, %s1839_s13  }
  0x12   : > { %s1668_s22 = sshll.u32 (%p30_p4), %s1843_s14, 3  ;;  %s1700_s23 = smul.u32 (%p30_p4), 576, %s135_s21 }
  0x13   : > { %s1908_s26 = scalar_lea.vmem (%p30_p4), %s2284_s0, %s1668_s22 }
  0x14   : > { %v310_v0 = vld [vmem:[%s1908_s26] sm:$0xff] (%p30_p4)  ;;  %v312_v1 = vld [vmem:[%s1908_s26 + $0x10] sm:$0xff] (%p30_p4)  ;;  %s1916_s27 = scalar_lea.vmem (%p30_p4), [#allocation2], %s1700_s23 }
  0x15   : > { %v314_v2 = vld [vmem:[%s1908_s26 + $0x20] sm:$0xff] (%p30_p4)  ;;  %v316_v3 = vld [vmem:[%s1908_s26 + $0x30] sm:$0xff] (%p30_p4)  ;;  %311 = vst [vmem:[%s1916_s27] sm:$0xff] (%p30_p4), %v310_v0  ;;  %313 = vst [vmem:[%s1916_s27 + $0x8] sm:$0xff] (%p30_p4), %v312_v1 }
  0x16   : > { %v318_v4 = vld [vmem:[%s1908_s26 + $0x40] sm:$0xff] (%p30_p4)  ;;  %v320_v5 = vld [vmem:[%s1908_s26 + $0x50] sm:$0xff] (%p30_p4)  ;;  %315 = vst [vmem:[%s1916_s27 + $0x10] sm:$0xff] (%p30_p4), %v314_v2  ;;  %317 = vst [vmem:[%s1916_s27 + $0x18] sm:$0xff] (%p30_p4), %v316_v3 }
  0x17   : > { %319 = vst [vmem:[%s1916_s27 + $0x20] sm:$0xff] (%p30_p4), %v318_v4  ;;  %321 = vst [vmem:[%s1916_s27 + $0x28] sm:$0xff] (%p30_p4), %v320_v5  ;;  %v322_v6 = vld [vmem:[%s1908_s26 + $0x60] sm:$0xff] (%p30_p4)  ;;  %v324_v7 = vld [vmem:[%s1908_s26 + $0x70] sm:$0xff] (%p30_p4) }
  0x18   : > { %v326_v8 = vld [vmem:[%s1908_s26 + $0x80] sm:$0xff]  ;;  %323 = vst [vmem:[%s1916_s27 + $0x30] sm:$0xff] %v322_v6  ;;  %325 = vst [vmem:[%s1916_s27 + $0x38] sm:$0xff] %v324_v7  ;;  %v328_v9 = vld [vmem:[%s1908_s26 + $0x90] sm:$0xff] }
  0x19   : > { %327 = vst [vmem:[%s1916_s27 + $0x40] sm:$0xff] %v326_v8  ;;  %v330_v10 = vld [vmem:[%s1908_s26 + $0xa0] sm:$0xff]  ;;  %v332_v11 = vld [vmem:[%s1908_s26 + $0xb0] sm:$0xff]  ;;  %329 = vst [vmem:[%s1916_s27 + $0x48] sm:$0xff] %v328_v9 }
  0x1a   : > { %331 = vst [vmem:[%s1916_s27 + $0x50] sm:$0xff] %v330_v10  ;;  %333 = vst [vmem:[%s1916_s27 + $0x58] sm:$0xff] %v332_v11  ;;  %v334_v12 = vld [vmem:[%s1908_s26 + $0xc0] sm:$0xff]  ;;  %v336_v13 = vld [vmem:[%s1908_s26 + $0xd0] sm:$0xff] }
  0x1b   : > { %v338_v14 = vld [vmem:[%s1908_s26 + $0xe0] sm:$0xff]  ;;  %335 = vst [vmem:[%s1916_s27 + $0x60] sm:$0xff] %v334_v12  ;;  %337 = vst [vmem:[%s1916_s27 + $0x68] sm:$0xff] %v336_v13  ;;  %v340_v15 = vld [vmem:[%s1908_s26 + $0xf0] sm:$0xff] }
  0x1c   : > { %339 = vst [vmem:[%s1916_s27 + $0x70] sm:$0xff] %v338_v14  ;;  %v342_v16 = vld [vmem:[%s1908_s26 + $0x100] sm:$0xff]  ;;  %v344_v17 = vld [vmem:[%s1908_s26 + $0x110] sm:$0xff]  ;;  %341 = vst [vmem:[%s1916_s27 + $0x78] sm:$0xff] %v340_v15 }
  0x1d   : > { %343 = vst [vmem:[%s1916_s27 + $0x80] sm:$0xff] %v342_v16  ;;  %345 = vst [vmem:[%s1916_s27 + $0x88] sm:$0xff] %v344_v17  ;;  %v346_v18 = vld [vmem:[%s1908_s26 + $0x120] sm:$0xff]  ;;  %v348_v19 = vld [vmem:[%s1908_s26 + $0x130] sm:$0xff] }
  0x1e   : > { %v350_v20 = vld [vmem:[%s1908_s26 + $0x140] sm:$0xff]  ;;  %347 = vst [vmem:[%s1916_s27 + $0x90] sm:$0xff] %v346_v18  ;;  %349 = vst [vmem:[%s1916_s27 + $0x98] sm:$0xff] %v348_v19  ;;  %v352_v21 = vld [vmem:[%s1908_s26 + $0x150] sm:$0xff] }
  0x1f   : > { %351 = vst [vmem:[%s1916_s27 + $0xa0] sm:$0xff] %v350_v20  ;;  %v354_v22 = vld [vmem:[%s1908_s26 + $0x160] sm:$0xff]  ;;  %v356_v23 = vld [vmem:[%s1908_s26 + $0x170] sm:$0xff]  ;;  %353 = vst [vmem:[%s1916_s27 + $0xa8] sm:$0xff] %v352_v21 }
  0x20   : > { %355 = vst [vmem:[%s1916_s27 + $0xb0] sm:$0xff] %v354_v22  ;;  %357 = vst [vmem:[%s1916_s27 + $0xb8] sm:$0xff] %v356_v23  ;;  %v358_v24 = vld [vmem:[%s1908_s26 + $0x180] sm:$0xff]  ;;  %v360_v25 = vld [vmem:[%s1908_s26 + $0x190] sm:$0xff] }
  0x21   : > { %v362_v26 = vld [vmem:[%s1908_s26 + $0x1a0] sm:$0xff]  ;;  %359 = vst [vmem:[%s1916_s27 + $0xc0] sm:$0xff] %v358_v24  ;;  %361 = vst [vmem:[%s1916_s27 + $0xc8] sm:$0xff] %v360_v25  ;;  %v364_v27 = vld [vmem:[%s1908_s26 + $0x1b0] sm:$0xff] }
  0x22   : > { %363 = vst [vmem:[%s1916_s27 + $0xd0] sm:$0xff] %v362_v26  ;;  %v366_v28 = vld [vmem:[%s1908_s26 + $0x1c0] sm:$0xff]  ;;  %v368_v29 = vld [vmem:[%s1908_s26 + $0x1d0] sm:$0xff]  ;;  %365 = vst [vmem:[%s1916_s27 + $0xd8] sm:$0xff] %v364_v27 }
  0x23   : > { %367 = vst [vmem:[%s1916_s27 + $0xe0] sm:$0xff] %v366_v28  ;;  %369 = vst [vmem:[%s1916_s27 + $0xe8] sm:$0xff] %v368_v29  ;;  %v370_v30 = vld [vmem:[%s1908_s26 + $0x1e0] sm:$0xff]  ;;  %v372_v31 = vld [vmem:[%s1908_s26 + $0x1f0] sm:$0xff] }
  0x24   : > { %v374_v32 = vld [vmem:[%s1908_s26 + $0x200] sm:$0xff]  ;;  %371 = vst [vmem:[%s1916_s27 + $0xf0] sm:$0xff] %v370_v30  ;;  %373 = vst [vmem:[%s1916_s27 + $0xf8] sm:$0xff] %v372_v31  ;;  %v376_v33 = vld [vmem:[%s1908_s26 + $0x210] sm:$0xff] }
  0x25   : > { %375 = vst [vmem:[%s1916_s27 + $0x100] sm:$0xff] %v374_v32  ;;  %v378_v34 = vld [vmem:[%s1908_s26 + $0x220] sm:$0xff]  ;;  %v380_v35 = vld [vmem:[%s1908_s26 + $0x230] sm:$0xff]  ;;  %377 = vst [vmem:[%s1916_s27 + $0x108] sm:$0xff] %v376_v33 }
  0x26   : > { %379 = vst [vmem:[%s1916_s27 + $0x110] sm:$0xff] %v378_v34  ;;  %381 = vst [vmem:[%s1916_s27 + $0x118] sm:$0xff] %v380_v35  ;;  %v382_v36 = vld [vmem:[%s1908_s26 + $0x240] sm:$0xff]  ;;  %v384_v37 = vld [vmem:[%s1908_s26 + $0x250] sm:$0xff] }
  0x27   : > { %v386_v38 = vld [vmem:[%s1908_s26 + $0x260] sm:$0xff]  ;;  %383 = vst [vmem:[%s1916_s27 + $0x120] sm:$0xff] %v382_v36  ;;  %385 = vst [vmem:[%s1916_s27 + $0x128] sm:$0xff] %v384_v37  ;;  %v388_v39 = vld [vmem:[%s1908_s26 + $0x270] sm:$0xff] }
  0x28   : > { %387 = vst [vmem:[%s1916_s27 + $0x130] sm:$0xff] %v386_v38  ;;  %v390_v40 = vld [vmem:[%s1908_s26 + $0x280] sm:$0xff]  ;;  %v392_v41 = vld [vmem:[%s1908_s26 + $0x290] sm:$0xff]  ;;  %389 = vst [vmem:[%s1916_s27 + $0x138] sm:$0xff] %v388_v39 }
  0x29   : > { %391 = vst [vmem:[%s1916_s27 + $0x140] sm:$0xff] %v390_v40  ;;  %393 = vst [vmem:[%s1916_s27 + $0x148] sm:$0xff] %v392_v41  ;;  %v394_v42 = vld [vmem:[%s1908_s26 + $0x2a0] sm:$0xff]  ;;  %v396_v43 = vld [vmem:[%s1908_s26 + $0x2b0] sm:$0xff] }
  0x2a   : > { %v398_v44 = vld [vmem:[%s1908_s26 + $0x2c0] sm:$0xff]  ;;  %395 = vst [vmem:[%s1916_s27 + $0x150] sm:$0xff] %v394_v42  ;;  %397 = vst [vmem:[%s1916_s27 + $0x158] sm:$0xff] %v396_v43  ;;  %v400_v45 = vld [vmem:[%s1908_s26 + $0x2d0] sm:$0xff] }
  0x2b   : > { %399 = vst [vmem:[%s1916_s27 + $0x160] sm:$0xff] %v398_v44  ;;  %v402_v46 = vld [vmem:[%s1908_s26 + $0x2e0] sm:$0xff]  ;;  %v404_v47 = vld [vmem:[%s1908_s26 + $0x2f0] sm:$0xff]  ;;  %401 = vst [vmem:[%s1916_s27 + $0x168] sm:$0xff] %v400_v45 }
  0x2c   : > { %403 = vst [vmem:[%s1916_s27 + $0x170] sm:$0xff] %v402_v46  ;;  %405 = vst [vmem:[%s1916_s27 + $0x178] sm:$0xff] %v404_v47  ;;  %v406_v48 = vld [vmem:[%s1908_s26 + $0x300] sm:$0xff]  ;;  %v408_v49 = vld [vmem:[%s1908_s26 + $0x310] sm:$0xff] }
  0x2d   : > { %v410_v50 = vld [vmem:[%s1908_s26 + $0x320] sm:$0xff]  ;;  %407 = vst [vmem:[%s1916_s27 + $0x180] sm:$0xff] %v406_v48  ;;  %409 = vst [vmem:[%s1916_s27 + $0x188] sm:$0xff] %v408_v49  ;;  %v412_v51 = vld [vmem:[%s1908_s26 + $0x330] sm:$0xff] }
  0x2e   : > { %411 = vst [vmem:[%s1916_s27 + $0x190] sm:$0xff] %v410_v50  ;;  %v414_v52 = vld [vmem:[%s1908_s26 + $0x340] sm:$0xff]  ;;  %v416_v53 = vld [vmem:[%s1908_s26 + $0x350] sm:$0xff]  ;;  %413 = vst [vmem:[%s1916_s27 + $0x198] sm:$0xff] %v412_v51 }
  0x2f   : > { %415 = vst [vmem:[%s1916_s27 + $0x1a0] sm:$0xff] %v414_v52  ;;  %417 = vst [vmem:[%s1916_s27 + $0x1a8] sm:$0xff] %v416_v53  ;;  %v418_v54 = vld [vmem:[%s1908_s26 + $0x360] sm:$0xff]  ;;  %v420_v55 = vld [vmem:[%s1908_s26 + $0x370] sm:$0xff] }
  0x30   : > { %v422_v56 = vld [vmem:[%s1908_s26 + $0x380] sm:$0xff]  ;;  %419 = vst [vmem:[%s1916_s27 + $0x1b0] sm:$0xff] %v418_v54  ;;  %421 = vst [vmem:[%s1916_s27 + $0x1b8] sm:$0xff] %v420_v55  ;;  %v424_v57 = vld [vmem:[%s1908_s26 + $0x390] sm:$0xff] }
  0x31   : > { %423 = vst [vmem:[%s1916_s27 + $0x1c0] sm:$0xff] %v422_v56  ;;  %v426_v58 = vld [vmem:[%s1908_s26 + $0x3a0] sm:$0xff]  ;;  %v428_v59 = vld [vmem:[%s1908_s26 + $0x3b0] sm:$0xff]  ;;  %425 = vst [vmem:[%s1916_s27 + $0x1c8] sm:$0xff] %v424_v57 }
  0x32   : > { %427 = vst [vmem:[%s1916_s27 + $0x1d0] sm:$0xff] %v426_v58  ;;  %429 = vst [vmem:[%s1916_s27 + $0x1d8] sm:$0xff] %v428_v59  ;;  %v430_v60 = vld [vmem:[%s1908_s26 + $0x3c0] sm:$0xff]  ;;  %v432_v61 = vld [vmem:[%s1908_s26 + $0x3d0] sm:$0xff] }
  0x33   : > { %v434_v62 = vld [vmem:[%s1908_s26 + $0x3e0] sm:$0xff]  ;;  %431 = vst [vmem:[%s1916_s27 + $0x1e0] sm:$0xff] %v430_v60  ;;  %433 = vst [vmem:[%s1916_s27 + $0x1e8] sm:$0xff] %v432_v61  ;;  %v436_v63 = vld [vmem:[%s1908_s26 + $0x3f0] sm:$0xff] }
  0x34   : > { %435 = vst [vmem:[%s1916_s27 + $0x1f0] sm:$0xff] %v434_v62  ;;  %v438_v0 = vld [vmem:[%s1908_s26 + $0x400] sm:$0xff]  ;;  %v440_v1 = vld [vmem:[%s1908_s26 + $0x410] sm:$0xff]  ;;  %437 = vst [vmem:[%s1916_s27 + $0x1f8] sm:$0xff] %v436_v63 }
  0x35   : > { %439 = vst [vmem:[%s1916_s27 + $0x200] sm:$0xff] %v438_v0  ;;  %441 = vst [vmem:[%s1916_s27 + $0x208] sm:$0xff] %v440_v1  ;;  %v442_v2 = vld [vmem:[%s1908_s26 + $0x420] sm:$0xff]  ;;  %v444_v3 = vld [vmem:[%s1908_s26 + $0x430] sm:$0xff] }
  0x36   : > { %v446_v4 = vld [vmem:[%s1908_s26 + $0x440] sm:$0xff]  ;;  %443 = vst [vmem:[%s1916_s27 + $0x210] sm:$0xff] %v442_v2  ;;  %445 = vst [vmem:[%s1916_s27 + $0x218] sm:$0xff] %v444_v3  ;;  %v448_v5 = vld [vmem:[%s1908_s26 + $0x450] sm:$0xff] }
  0x37   : > { %447 = vst [vmem:[%s1916_s27 + $0x220] sm:$0xff] %v446_v4  ;;  %v450_v6 = vld [vmem:[%s1908_s26 + $0x460] sm:$0xff]  ;;  %v452_v7 = vld [vmem:[%s1908_s26 + $0x470] sm:$0xff]  ;;  %449 = vst [vmem:[%s1916_s27 + $0x228] sm:$0xff] %v448_v5 }
  0x38   : > { %451 = vst [vmem:[%s1916_s27 + $0x230] sm:$0xff] %v450_v6  ;;  %453 = vst [vmem:[%s1916_s27 + $0x238] sm:$0xff] %v452_v7 }
  0x39 PF: > { %p1512_p7 = scmp.ge.s32.totalorder %s1843_s14, 1  ;;  %p458_p8 = scmp.lt.s32.totalorder %s1843_s14, 3 }
  0x3b   : > { %p459_p9 = pnand %p1512_p7, %p458_p8 }
  0x3c   : > { %s465_s28 = sand.u32 (!%p459_p9), 1, %s1835_s12   ;;  %v2062_v8 = vld [vmem:[%s2285_s1 + $0x4] ss:$8 sps:$4 sm:$0xff] (!%p459_p9)   ;;  %vm632_vm0 = vcmask (!%p459_p9), 130048   ;;  %v2112_v46 = vld [vmem:[%s2285_s1] ss:$8 sps:$4 sm:$0xff] (!%p459_p9)  }
  0x3d   : > { %462 = sbr.rel (%p459_p9) target bundleno = 580 (0x244), region = 62  ;;  %1537 = vmatprep.mubr.msk.bf16.mxu0 (!%p459_p9), %vm632_vm0, %v2062_v8  ;;  %1591 = vmatprep.mubr.msk.bf16.mxu1 (!%p459_p9), %vm632_vm0, %v2062_v8  ;;  %v1797_v49 = vld [vmem:[%s2285_s1 + $0x14] ss:$8 sps:$4 sm:$0xff] (!%p459_p9)   ;;  %v1799_v52 = vld [vmem:[%s2285_s1 + $0x10] ss:$8 sps:$4 sm:$0xff] (!%p459_p9)   ;;  %s1513_s14 = sshll.u32 (!%p459_p9), %s465_s28, 7 }
  0x3e   : > { %s1701_s4 = smul.u32 (!%p459_p9), 576, %s465_s28  ;;  %s2147_s17 = scalar_lea.vmem (!%p459_p9), [#allocation3], %s1513_s14  ;;  %v1845_v2 = vmov (!%p459_p9), 0  }
  0x3f   : > { %502 = vst [vmem:[%s2147_s17] sm:$0xff] (!%p459_p9), %v1845_v2  ;;  %503 = vst [vmem:[%s2147_s17 + $0x8] sm:$0xff] (!%p459_p9), %v1845_v2  ;;  %p493_p10 = scmp.lt.s32.totalorder (!%p459_p9), %s1883_s15, 1 }
  0x40   : > { %s2070_s5 = scalar_lea.vmem (!%p459_p9), [#allocation2], %s1701_s4  ;;  %504 = vst [vmem:[%s2147_s17 + $0x10] sm:$0xff] (!%p459_p9), %v1845_v2  ;;  %505 = vst [vmem:[%s2147_s17 + $0x18] sm:$0xff] (!%p459_p9), %v1845_v2 }
  0x41   : > { %v1734_v9 = vld [vmem:[%s2070_s5 + $0x4] ss:$8 sps:$4 sm:$0xff] (!%p459_p9)   ;;  %v1736_v10 = vld [vmem:[%s2070_s5 + $0x94] ss:$8 sps:$4 sm:$0xff] (!%p459_p9)   ;;  %v1738_v11 = vld [vmem:[%s2070_s5] ss:$8 sps:$4 sm:$0xff] (!%p459_p9)  }
  0x42   : > { %639 = vmatprep.subr.bf16.mxu0 (!%p459_p9), %v1734_v9  ;;  %v1739_v12 = vld [vmem:[%s2070_s5 + $0x90] ss:$8 sps:$4 sm:$0xff] (!%p459_p9)   ;;  %895 = vmatprep.subr.bf16.mxu1 (!%p459_p9), %v1736_v10  ;;  %v1740_v13 = vld [vmem:[%s2070_s5 + $0x14] ss:$8 sps:$4 sm:$0xff] (!%p459_p9)   ;;  %v1742_v14 = vld [vmem:[%s2070_s5 + $0xa4] ss:$8 sps:$4 sm:$0xff] (!%p459_p9)  }
  0x43   : > { %640 = vmatpush1.bf16.msra.mxu0 (!%p459_p9), %v1738_v11  ;;  %896 = vmatpush1.bf16.msra.mxu1 (!%p459_p9), %v1739_v12  ;;  %v1744_v15 = vld [vmem:[%s2070_s5 + $0x10] ss:$8 sps:$4 sm:$0xff] (!%p459_p9)   ;;  %v1745_v16 = vld [vmem:[%s2070_s5 + $0xa0] ss:$8 sps:$4 sm:$0xff] (!%p459_p9)   ;;  %v1746_v17 = vld [vmem:[%s2070_s5 + $0x24] ss:$8 sps:$4 sm:$0xff] (!%p459_p9)  }
  0x44   : > { %641 = vmatprep.subr.bf16.mxu0 %v1740_v13  ;;  %897 = vmatprep.subr.bf16.mxu1 %v1742_v14  ;;  %v1748_v18 = vld [vmem:[%s2070_s5 + $0xb4] ss:$8 sps:$4 sm:$0xff]   ;;  %v1750_v19 = vld [vmem:[%s2070_s5 + $0x20] ss:$8 sps:$4 sm:$0xff]   ;;  %v1751_v20 = vld [vmem:[%s2070_s5 + $0xb0] ss:$8 sps:$4 sm:$0xff]  }
  0x45   : > { %v1752_v21 = vld [vmem:[%s2070_s5 + $0x34] ss:$8 sps:$4 sm:$0xff]   ;;  %v1754_v22 = vld [vmem:[%s2070_s5 + $0xc4] ss:$8 sps:$4 sm:$0xff]   ;;  %v1756_v23 = vld [vmem:[%s2070_s5 + $0x30] ss:$8 sps:$4 sm:$0xff]  }
  0x46   : > { %v1757_v24 = vld [vmem:[%s2070_s5 + $0xc0] ss:$8 sps:$4 sm:$0xff]   ;;  %v1758_v25 = vld [vmem:[%s2070_s5 + $0x44] ss:$8 sps:$4 sm:$0xff]   ;;  %v1760_v26 = vld [vmem:[%s2070_s5 + $0xd4] ss:$8 sps:$4 sm:$0xff]  }
  0x47   : > { %642 = vmatpush1.bf16.msra.mxu0 %v1744_v15  ;;  %898 = vmatpush1.bf16.msra.mxu1 %v1745_v16  ;;  %v1762_v27 = vld [vmem:[%s2070_s5 + $0x40] ss:$8 sps:$4 sm:$0xff]   ;;  %v1763_v28 = vld [vmem:[%s2070_s5 + $0xd0] ss:$8 sps:$4 sm:$0xff]   ;;  %v1764_v29 = vld [vmem:[%s2070_s5 + $0x54] ss:$8 sps:$4 sm:$0xff]  }
  0x48   : > { %643 = vmatprep.subr.bf16.mxu0 %v1746_v17  ;;  %899 = vmatprep.subr.bf16.mxu1 %v1748_v18  ;;  %v1766_v30 = vld [vmem:[%s2070_s5 + $0xe4] ss:$8 sps:$4 sm:$0xff]   ;;  %v1768_v31 = vld [vmem:[%s2070_s5 + $0x50] ss:$8 sps:$4 sm:$0xff]   ;;  %v1769_v32 = vld [vmem:[%s2070_s5 + $0xe0] ss:$8 sps:$4 sm:$0xff]  }
  0x49   : > { %v1770_v33 = vld [vmem:[%s2070_s5 + $0x64] ss:$8 sps:$4 sm:$0xff]   ;;  %v1772_v34 = vld [vmem:[%s2070_s5 + $0xf4] ss:$8 sps:$4 sm:$0xff]   ;;  %v1774_v35 = vld [vmem:[%s2070_s5 + $0x60] ss:$8 sps:$4 sm:$0xff]  }
  0x4a   : > { %v1775_v36 = vld [vmem:[%s2070_s5 + $0xf0] ss:$8 sps:$4 sm:$0xff]   ;;  %v1776_v37 = vld [vmem:[%s2070_s5 + $0x74] ss:$8 sps:$4 sm:$0xff]   ;;  %v1778_v38 = vld [vmem:[%s2070_s5 + $0x104] ss:$8 sps:$4 sm:$0xff]  }
  0x4b   : > { %644 = vmatpush1.bf16.msra.mxu0 %v1750_v19  ;;  %900 = vmatpush1.bf16.msra.mxu1 %v1751_v20  ;;  %v1780_v39 = vld [vmem:[%s2070_s5 + $0x70] ss:$8 sps:$4 sm:$0xff]   ;;  %v1781_v40 = vld [vmem:[%s2070_s5 + $0x100] ss:$8 sps:$4 sm:$0xff]   ;;  %v1782_v41 = vld [vmem:[%s2070_s5 + $0x84] ss:$8 sps:$4 sm:$0xff]  }
  0x4c   : > { %645 = vmatprep.subr.bf16.mxu0 %v1752_v21  ;;  %901 = vmatprep.subr.bf16.mxu1 %v1754_v22  ;;  %v1784_v42 = vld [vmem:[%s2070_s5 + $0x114] ss:$8 sps:$4 sm:$0xff]   ;;  %v1786_v43 = vld [vmem:[%s2070_s5 + $0x80] ss:$8 sps:$4 sm:$0xff]   ;;  %v1787_v44 = vld [vmem:[%s2070_s5 + $0x110] ss:$8 sps:$4 sm:$0xff]  }
  0x4d   : > { %v1793_v45 = vld [vmem:[%s2070_s5 + $0x124] ss:$8 sps:$4 sm:$0xff]   ;;  %v1791_v47 = vld [vmem:[%s2070_s5 + $0x120] ss:$8 sps:$4 sm:$0xff]   ;;  %v1796_v48 = vld [vmem:[%s2070_s5 + $0x134] ss:$8 sps:$4 sm:$0xff]  }
  0x4e   : > { %v1794_v50 = vld [vmem:[%s2070_s5 + $0x130] ss:$8 sps:$4 sm:$0xff]   ;;  %v1802_v51 = vld [vmem:[%s2070_s5 + $0x144] ss:$8 sps:$4 sm:$0xff]   ;;  %v1800_v53 = vld [vmem:[%s2070_s5 + $0x140] ss:$8 sps:$4 sm:$0xff]  }
  0x4f   : > { %646 = vmatpush1.bf16.msra.mxu0 %v1756_v23  ;;  %902 = vmatpush1.bf16.msra.mxu1 %v1757_v24  ;;  %v1805_v54 = vld [vmem:[%s2070_s5 + $0x154] ss:$8 sps:$4 sm:$0xff]   ;;  %v1803_v55 = vld [vmem:[%s2070_s5 + $0x150] ss:$8 sps:$4 sm:$0xff]   ;;  %v1808_v56 = vld [vmem:[%s2070_s5 + $0x164] ss:$8 sps:$4 sm:$0xff]  }
  0x50   : > { %647 = vmatprep.subr.bf16.mxu0 %v1758_v25  ;;  %903 = vmatprep.subr.bf16.mxu1 %v1760_v26  ;;  %v1806_v57 = vld [vmem:[%s2070_s5 + $0x160] ss:$8 sps:$4 sm:$0xff]   ;;  %v1811_v58 = vld [vmem:[%s2070_s5 + $0x174] ss:$8 sps:$4 sm:$0xff]   ;;  %v1809_v59 = vld [vmem:[%s2070_s5 + $0x170] ss:$8 sps:$4 sm:$0xff]  }
  0x51   : > { %v1814_v60 = vld [vmem:[%s2070_s5 + $0x184] ss:$8 sps:$4 sm:$0xff]   ;;  %v1812_v61 = vld [vmem:[%s2070_s5 + $0x180] ss:$8 sps:$4 sm:$0xff]   ;;  %v1817_v62 = vld [vmem:[%s2070_s5 + $0x194] ss:$8 sps:$4 sm:$0xff]  }
  0x52   : > { %v1815_v63 = vld [vmem:[%s2070_s5 + $0x190] ss:$8 sps:$4 sm:$0xff]   ;;  %v1820_v0 = vld [vmem:[%s2070_s5 + $0x1a4] ss:$8 sps:$4 sm:$0xff]   ;;  %v1818_v1 = vld [vmem:[%s2070_s5 + $0x1a0] ss:$8 sps:$4 sm:$0xff]  }
  0x53   : > { %648 = vmatpush1.bf16.msra.mxu0 %v1762_v27  ;;  %904 = vmatpush1.bf16.msra.mxu1 %v1763_v28  ;;  %v1846_v9 = vmov 0.0   ;;  %s494_s12 = scalar_select %p493_p10, %s1883_s15, 1 }
  0x54   : > { %649 = vmatprep.subr.bf16.mxu0 %v1764_v29  ;;  %905 = vmatprep.subr.bf16.mxu1 %v1766_v30  ;;  %s1681_s29 = sshll.u32 (%p1898_p5), %s1883_s15, 3 }
  0x55   : > { %s1514_s22 = sshll.u32 %s494_s12, 3  ;;  %s1330_s5 = scalar_lea.vmem (%p1898_p5), %s2286_s2, %s1681_s29 }
  0x56   : > { %s496_s27 = scalar_lea.vmem %s2287_s3, %s1514_s22 }
  0x57   : > { %650 = vmatpush1.bf16.msra.mxu0 %v1768_v31  ;;  %906 = vmatpush1.bf16.msra.mxu1 %v1769_v32 }
  0x58   : > { %651 = vmatprep.subr.bf16.mxu0 %v1770_v33  ;;  %907 = vmatprep.subr.bf16.mxu1 %v1772_v34 }
  0x5b   : > { %652 = vmatpush1.bf16.msra.mxu0 %v1774_v35  ;;  %908 = vmatpush1.bf16.msra.mxu1 %v1775_v36 }
  0x5c   : > { %653 = vmatprep.subr.bf16.mxu0 %v1776_v37  ;;  %909 = vmatprep.subr.bf16.mxu1 %v1778_v38 }
  0x5f   : > { %654 = vmatpush1.bf16.msra.mxu0 %v1780_v39  ;;  %910 = vmatpush1.bf16.msra.mxu1 %v1781_v40 }
  0x60   : > { %655 = vmatprep.subr.bf16.mxu0 %v1782_v41  ;;  %911 = vmatprep.subr.bf16.mxu1 %v1784_v42 }
  0x63   : > { %656 = vmatpush1.bf16.msra.mxu0 %v1786_v43  ;;  %912 = vmatpush1.bf16.msra.mxu1 %v1787_v44 }
  0x64   : > { %1167 = vmatprep.subr.bf16.mxu0 %v1793_v45  ;;  %1682 = vmatprep.subr.bf16.mxu1 %v1793_v45 }
  0x66   : > { %672 = vmatmul.mubr.bf16.vlgmr.msra.gmra.mrb[0].mxu0 %v2112_v46  ;;  %928 = vmatmul.mubr.bf16.vlgmr.msra.gmra.mrb[0].mxu1 %v2112_v46 }
  0x67   : > { %1168 = vmatpush1.bf16.msra.mxu0 %v1791_v47  ;;  %1691 = vmatpush1.bf16.msra.mxu1 %v1791_v47 }
  0x68   : > { %1169 = vmatprep.subr.bf16.mxu0 %v1796_v48  ;;  %1683 = vmatprep.subr.bf16.mxu1 %v1796_v48 }
  0x69   : > { %1538 = vmatprep.mubr.msk.bf16.mxu0 %vm632_vm0, %v1797_v49  ;;  %1592 = vmatprep.mubr.msk.bf16.mxu1 %vm632_vm0, %v1797_v49 }
  0x6b   : > { %1170 = vmatpush1.bf16.msra.mxu0 %v1794_v50  ;;  %1692 = vmatpush1.bf16.msra.mxu1 %v1794_v50 }
  0x6c   : > { %1171 = vmatprep.subr.bf16.mxu0 %v1802_v51  ;;  %1684 = vmatprep.subr.bf16.mxu1 %v1802_v51 }
  0x6e   : > { %682 = vmatmul.mubr.bf16.gmra.mrb[4].mxu0 %v1799_v52  ;;  %938 = vmatmul.mubr.bf16.gmra.mrb[4].mxu1 %v1799_v52 }
  0x6f   : > { %1172 = vmatpush1.bf16.msra.mxu0 %v1800_v53  ;;  %1693 = vmatpush1.bf16.msra.mxu1 %v1800_v53 }
  0x70   : > { %1173 = vmatprep.subr.bf16.mxu0 %v1805_v54  ;;  %1685 = vmatprep.subr.bf16.mxu1 %v1805_v54 }
  0x71   : > { %1645 = vmatprep.mubr.msk.bf16.mxu0 %vm632_vm0, %v2062_v8  ;;  %1646 = vmatprep.mubr.msk.bf16.mxu1 %vm632_vm0, %v1797_v49 }
  0x73   : > { %1174 = vmatpush1.bf16.msra.mxu0 %v1803_v55  ;;  %1694 = vmatpush1.bf16.msra.mxu1 %v1803_v55 }
  0x74   : > { %1175 = vmatprep.subr.bf16.mxu0 %v1808_v56  ;;  %1686 = vmatprep.subr.bf16.mxu1 %v1808_v56 }
  0x77   : > { %1176 = vmatpush1.bf16.msra.mxu0 %v1806_v57  ;;  %1695 = vmatpush1.bf16.msra.mxu1 %v1806_v57 }
  0x78   : > { %1177 = vmatprep.subr.bf16.mxu0 %v1811_v58  ;;  %1687 = vmatprep.subr.bf16.mxu1 %v1811_v58 }
  0x7b   : > { %1178 = vmatpush1.bf16.msra.mxu0 %v1809_v59  ;;  %1696 = vmatpush1.bf16.msra.mxu1 %v1809_v59 }
  0x7c   : > { %1179 = vmatprep.subr.bf16.mxu0 %v1814_v60  ;;  %1688 = vmatprep.subr.bf16.mxu1 %v1814_v60 }
  0x7f   : > { %1180 = vmatpush1.bf16.msra.mxu0 %v1812_v61  ;;  %1697 = vmatpush1.bf16.msra.mxu1 %v1812_v61 }
  0x80   : > { %1181 = vmatprep.subr.bf16.mxu0 %v1817_v62  ;;  %1689 = vmatprep.subr.bf16.mxu1 %v1817_v62 }
  0x83   : > { %1182 = vmatpush1.bf16.msra.mxu0 %v1815_v63  ;;  %1698 = vmatpush1.bf16.msra.mxu1 %v1815_v63 }
  0x84   : > { %1183 = vmatprep.subr.bf16.mxu0 %v1820_v0  ;;  %1690 = vmatprep.subr.bf16.mxu1 %v1820_v0 }
  0x87   : > { %1184 = vmatpush1.bf16.msra.mxu0 %v1818_v1  ;;  %1699 = vmatpush1.bf16.msra.mxu1 %v1818_v1 }
  0x8a   : > { %1200 = vmatmul.mubr.bf16.vlgmr.msra.gmra.mrb[8].mxu0 %v2112_v46  ;;  %1210 = vmatmul.mubr.bf16.vlgmr.msra.gmra.mrb[8].mxu1 %v1799_v52 }
 0x139   : > { %v673_v3 = vpop.f32.mrb[0].mxu0  ;;  %v929_v4 = vpop.f32.mrb[0].mxu1 }
 0x13a   : > { %vm700_vm1 = vcmp.ge.f32.partialorder %v673_v3, 1.25  ;;  %v675_v5 = vpop.f32.mrb[1].mxu0  ;;  %v778_v6 = vmul.f32 0.75, %v673_v3  ;;  %v931_v7 = vpop.f32.mrb[1].mxu1 }
 0x13b   : > { %v708_v8 = vsel %vm700_vm1, 0.0, %v673_v3  ;;  %v1539_v10 = vsel %vm700_vm1, 1.0, %v1846_v9  ;;  %vm701_vm2 = vcmp.ge.f32.partialorder %v675_v5, 1.25  ;;  %v677_v11 = vpop.f32.mrb[2].mxu0  ;;  %v779_v12 = vmul.f32 0.75, %v675_v5  ;;  %v933_v13 = vpop.f32.mrb[2].mxu1 }
 0x13c   : > { %v956_v14 = vmul.f32 0.9699707, %v708_v8  ;;  %v709_v15 = vsel %vm701_vm2, 0.0, %v675_v5  ;;  %v1540_v16 = vsel %vm701_vm2, 1.0, %v1846_v9  ;;  %vm702_vm3 = vcmp.ge.f32.partialorder %v677_v11, 1.25  ;;  %v679_v17 = vpop.f32.mrb[3].mxu0  ;;  %v935_v18 = vpop.f32.mrb[3].mxu1 }
 0x13d   : > { %v1669_v19 = vpack.c.bf16 %v1540_v16, %v1539_v10  ;;  %v761_v20 = vadd.f32 %v1540_v16, %v1539_v10  ;;  %v957_v21 = vmul.f32 0.9699707, %v709_v15  ;;  %v710_v22 = vsel %vm702_vm3, 0.0, %v677_v11 }
 0x13e   : > { %v1541_v23 = vsel %vm702_vm3, 1.0, %v1846_v9  ;;  %v2156_v24 = vadd.f32 %v929_v4, %v778_v6  ;;  %vm703_vm4 = vcmp.ge.f32.partialorder %v679_v17, 1.25  ;;  %v2160_v28 = vadd.f32 %v931_v7, %v779_v12 }
 0x13f   : > { %1551 = vst [vmem:[%s2147_s17 + $0x20] sm:$0xff] %v1669_v19  ;;  %v762_v25 = vadd.f32 %v1541_v23, %v761_v20  ;;  %v711_v26 = vsel %vm703_vm4, 0.0, %v679_v17  ;;  %v1542_v27 = vsel %vm703_vm4, 1.0, %v1846_v9  ;;  %v958_v29 = vmul.f32 0.9699707, %v710_v22 }
 0x140   : > { %v2163_v30 = vadd.f32 %v956_v14, %v2156_v24  ;;  %v1670_v31 = vpack.c.bf16 %v1542_v27, %v1541_v23  ;;  %v780_v32 = vmul.f32 0.75, %v677_v11  ;;  %v959_v34 = vmul.f32 0.9699707, %v711_v26 }
 0x141   : > { %v763_v33 = vadd.f32 %v1542_v27, %v762_v25  ;;  %v2166_v35 = vadd.f32 %v957_v21, %v2160_v28  ;;  %v781_v36 = vmul.f32 0.75, %v679_v17  ;;  %v683_v37 = vpop.f32.mrb[4].mxu0  ;;  %v939_v38 = vpop.f32.mrb[4].mxu1 }
 0x142   : > { %vm972_vm5 = vcmp.ge.f32.partialorder %v2163_v30, 1.25  ;;  %1552 = vst [vmem:[%s2147_s17 + $0x28] sm:$0xff] %v1670_v31  ;;  %v2170_v39 = vadd.f32 %v933_v13, %v780_v32  ;;  %vm704_vm6 = vcmp.ge.f32.partialorder %v683_v37, 1.25  ;;  %v685_v40 = vpop.f32.mrb[5].mxu0  ;;  %v941_v41 = vpop.f32.mrb[5].mxu1  ;;  %v782_v49 = vmul.f32 0.75, %v683_v37 }
 0x143   : > { %v1593_v42 = vsel %vm972_vm5, 1.0, %v1846_v9  ;;  %vm973_vm7 = vcmp.ge.f32.partialorder %v2166_v35, 1.25  ;;  %v2176_v43 = vadd.f32 %v935_v18, %v781_v36  ;;  %v687_v44 = vpop.f32.mrb[6].mxu0  ;;  %v943_v45 = vpop.f32.mrb[6].mxu1  ;;  %v712_v48 = vsel %vm704_vm6, 0.0, %v683_v37 }
 0x144   : > { %v1594_v46 = vsel %vm973_vm7, 1.0, %v1846_v9  ;;  %v2182_v47 = vadd.f32 %v958_v29, %v2170_v39  ;;  %v689_v50 = vpop.f32.mrb[7].mxu0  ;;  %v945_v51 = vpop.f32.mrb[7].mxu1  ;;  %v1543_v55 = vsel %vm704_vm6, 1.0, %v1846_v9  ;;  %vm705_vm9 = vcmp.ge.f32.partialorder %v685_v40, 1.25 }
 0x145   : > { %v1673_v52 = vpack.c.bf16 %v1594_v46, %v1593_v42  ;;  %v1033_v53 = vadd.f32 %v1594_v46, %v1593_v42  ;;  %v2186_v54 = vadd.f32 %v959_v34, %v2176_v43  ;;  %v764_v56 = vadd.f32 %v1543_v55, %v763_v33 }
 0x146   : > { %vm974_vm8 = vcmp.ge.f32.partialorder %v2182_v47, 1.25  ;;  %v960_v58 = vmul.f32 0.9699707, %v712_v48  ;;  %v713_v59 = vsel %vm705_vm9, 0.0, %v685_v40  ;;  %v1544_v62 = vsel %vm705_vm9, 1.0, %v1846_v9 }
 0x147   : > { %1605 = vst [vmem:[%s2147_s17 + $0x40] sm:$0xff] %v1673_v52  ;;  %v1595_v57 = vsel %vm974_vm8, 1.0, %v1846_v9  ;;  %vm975_vm10 = vcmp.ge.f32.partialorder %v2186_v54, 1.25  ;;  %v1671_v0 = vpack.c.bf16 %v1544_v62, %v1543_v55  ;;  %v961_v1 = vmul.f32 0.9699707, %v713_v59 }
 0x148   : > { %v1034_v60 = vadd.f32 %v1595_v57, %v1033_v53  ;;  %v1596_v61 = vsel %vm975_vm10, 1.0, %v1846_v9  ;;  %v952_v2 = vadd.f32 %v939_v38, %v782_v49  ;;  %vm706_vm11 = vcmp.ge.f32.partialorder %v687_v44, 1.25 }
 0x149   : > { %v1674_v63 = vpack.c.bf16 %v1596_v61, %v1595_v57  ;;  %v783_v4 = vmul.f32 0.75, %v685_v40  ;;  %v784_v5 = vmul.f32 0.75, %v687_v44  ;;  %1553 = vst [vmem:[%s2147_s17 + $0x30] sm:$0xff] %v1671_v0  ;;  %v714_v7 = vsel %vm706_vm11, 0.0, %v687_v44 }
 0x14a   : > { %v1035_v3 = vadd.f32 %v1596_v61, %v1034_v60  ;;  %v968_v6 = vadd.f32 %v960_v58, %v952_v2  ;;  %v785_v8 = vmul.f32 0.75, %v689_v50  ;;  %vm707_vm12 = vcmp.ge.f32.partialorder %v689_v50, 1.25 }
 0x14b   : > { %1606 = vst [vmem:[%s2147_s17 + $0x48] sm:$0xff] %v1674_v63  ;;  %v962_v10 = vmul.f32 0.9699707, %v714_v7  ;;  %v953_v11 = vadd.f32 %v941_v41, %v783_v4  ;;  %v954_v12 = vadd.f32 %v943_v45, %v784_v5  ;;  %v1545_v13 = vsel %vm706_vm11, 1.0, %v1846_v9 }
 0x14c   : > { %vm976_vm13 = vcmp.ge.f32.partialorder %v968_v6, 1.25  ;;  %v955_v14 = vadd.f32 %v945_v51, %v785_v8  ;;  %v765_v15 = vadd.f32 %v1544_v62, %v764_v56  ;;  %v1546_v19 = vsel %vm707_vm12, 1.0, %v1846_v9 }
 0x14d   : > { %v1597_v16 = vsel %vm976_vm13, 1.0, %v1846_v9  ;;  %v969_v17 = vadd.f32 %v961_v1, %v953_v11  ;;  %v970_v18 = vadd.f32 %v962_v10, %v954_v12  ;;  %v715_v22 = vsel %vm707_vm12, 0.0, %v689_v50 }
 0x14e   : > { %v1036_v20 = vadd.f32 %v1597_v16, %v1035_v3  ;;  %v766_v21 = vadd.f32 %v1545_v13, %v765_v15  ;;  %v1672_v23 = vpack.c.bf16 %v1546_v19, %v1545_v13  ;;  %v963_v25 = vmul.f32 0.9699707, %v715_v22 }
 0x14f   : > { %vm977_vm14 = vcmp.ge.f32.partialorder %v969_v17, 1.25  ;;  %vm978_vm15 = vcmp.ge.f32.partialorder %v970_v18, 1.25  ;;  %v980_v40 = vsel %vm972_vm5, 0.0, %v2163_v30  ;;  %v984_v41 = vsel %vm976_vm13, 0.0, %v968_v6 }
 0x150   : > { %v1598_v26 = vsel %vm977_vm14, 1.0, %v1846_v9  ;;  %v767_v27 = vadd.f32 %v1546_v19, %v766_v21  ;;  %1554 = vst [vmem:[%s2147_s17 + $0x38] sm:$0xff] %v1672_v23  ;;  %v971_v31 = vadd.f32 %v963_v25, %v955_v14  ;;  %v1599_v32 = vsel %vm978_vm15, 1.0, %v1846_v9 }
 0x151   : > { %v1675_v29 = vpack.c.bf16 %v1598_v26, %v1597_v16  ;;  %v1037_v33 = vadd.f32 %v1598_v26, %v1036_v20  ;;  %v981_v42 = vsel %vm973_vm7, 0.0, %v2166_v35  ;;  %v985_v44 = vsel %vm977_vm14, 0.0, %v969_v17 }
 0x152   : > { %768 = vadd.xlane.f32.xlu0 %v767_v27  ;;  %vm979_vm0 = vcmp.ge.f32.partialorder %v971_v31, 1.25  ;;  %v982_v45 = vsel %vm974_vm8, 0.0, %v2182_v47  ;;  %v983_v46 = vsel %vm975_vm10, 0.0, %v2186_v54  ;;  %v986_v30 = vsel %vm978_vm15, 0.0, %v970_v18 }
 0x153   : > { %1607 = vst [vmem:[%s2147_s17 + $0x50] sm:$0xff] %v1675_v29  ;;  %v1038_v34 = vadd.f32 %v1599_v32, %v1037_v33  ;;  %v1600_v36 = vsel %vm979_vm0, 1.0, %v1846_v9  ;;  %v1050_v48 = vmul.f32 0.75, %v2156_v24  ;;  %v1228_v49 = vmul.f32 0.9699707, %v980_v40 }
 0x154   : > { %v1676_v38 = vpack.c.bf16 %v1600_v36, %v1599_v32  ;;  %v1054_v50 = vmul.f32 0.75, %v952_v2  ;;  %v1232_v51 = vmul.f32 0.9699707, %v984_v41  ;;  %v1051_v52 = vmul.f32 0.75, %v2160_v28 }
 0x155   : > { %v1039_v37 = vadd.f32 %v1600_v36, %v1038_v34  ;;  %v987_v35 = vsel %vm979_vm0, 0.0, %v971_v31  ;;  %v1229_v53 = vmul.f32 0.9699707, %v981_v42  ;;  %v1055_v55 = vmul.f32 0.75, %v953_v11 }
 0x156   : > { %1608 = vst [vmem:[%s2147_s17 + $0x58] sm:$0xff] %v1676_v38  ;;  %v1233_v56 = vmul.f32 0.9699707, %v985_v44  ;;  %v1052_v58 = vmul.f32 0.75, %v2170_v39  ;;  %v1230_v59 = vmul.f32 0.9699707, %v982_v45  ;;  %v1056_v54 = vmul.f32 0.75, %v954_v12 }
 0x157   : > { %1040 = vadd.xlane.f32.xlu0 %v1039_v37  ;;  %v1234_v60 = vmul.f32 0.9699707, %v986_v30  ;;  %v1053_v0 = vmul.f32 0.75, %v2176_v43  ;;  %v1231_v1 = vmul.f32 0.9699707, %v983_v46  ;;  %v1057_v5 = vmul.f32 0.75, %v955_v14 }
 0x158   : > { %v1235_v6 = vmul.f32 0.9699707, %v987_v35 }
 0x15d   : > { %v1201_v57 = vpop.f32.mrb[8].mxu0  ;;  %v1211_v47 = vpop.f32.mrb[8].mxu1 }
 0x15e   : > { %v1220_v61 = vadd.f32 %v1201_v57, %v1050_v48  ;;  %v1224_v62 = vadd.f32 %v1211_v47, %v1054_v50  ;;  %v1203_v24 = vpop.f32.mrb[9].mxu0  ;;  %v1213_v63 = vpop.f32.mrb[9].mxu1 }
 0x15f   : > { %v1221_v28 = vadd.f32 %v1203_v24, %v1051_v52  ;;  %v1225_v2 = vadd.f32 %v1213_v63, %v1055_v55  ;;  %v1205_v3 = vpop.f32.mrb[10].mxu0  ;;  %v1215_v4 = vpop.f32.mrb[10].mxu1  ;;  %v1388_v63 = vld [vmem:[%s2147_s17] sm:$0xff] (%p1898_p5) }
 0x160   : > { %v1236_v7 = vadd.f32 %v1228_v49, %v1220_v61  ;;  %v1240_v8 = vadd.f32 %v1232_v51, %v1224_v62  ;;  %v1222_v10 = vadd.f32 %v1205_v3, %v1052_v58  ;;  %v1226_v39 = vadd.f32 %v1215_v4, %v1056_v54  ;;  %v1207_v11 = vpop.f32.mrb[11].mxu0  ;;  %v1217_v12 = vpop.f32.mrb[11].mxu1  ;;  %v1398_v3 = vld [vmem:[%s2147_s17 + $0x28] sm:$0xff] (%p1898_p5)  ;;  %1389 = vst [vmem:[%s1330_s5] sm:$0xff] (%p1898_p5), %v1388_v63  ;;  %v1400_v4 = vld [vmem:[%s2147_s17 + $0x30] sm:$0xff] (%p1898_p5) }
 0x161   : > { %v1237_v13 = vadd.f32 %v1229_v53, %v1221_v28  ;;  %v1241_v15 = vadd.f32 %v1233_v56, %v1225_v2  ;;  %v1223_v16 = vadd.f32 %v1207_v11, %v1053_v0  ;;  %v1227_v17 = vadd.f32 %v1217_v12, %v1057_v5  ;;  %v1390_v0 = vld [vmem:[%s2147_s17 + $0x8] sm:$0xff] (%p1898_p5)  ;;  %v1394_v28 = vld [vmem:[%s2147_s17 + $0x18] sm:$0xff] (%p1898_p5)  ;;  %v1396_v2 = vld [vmem:[%s2147_s17 + $0x20] sm:$0xff] (%p1898_p5)  ;;  %1399 = vst [vmem:[%s1330_s5 + $0x50] sm:$0xff] (%p1898_p5), %v1398_v3 }
 0x162   : > { %vm1244_vm1 = vcmp.ge.f32.partialorder %v1236_v7, 1.25  ;;  %vm1248_vm2 = vcmp.ge.f32.partialorder %v1240_v8, 1.25  ;;  %v1238_v43 = vadd.f32 %v1230_v59, %v1222_v10  ;;  %v1242_v18 = vadd.f32 %v1234_v60, %v1226_v39  ;;  %1391 = vst [vmem:[%s1330_s5 + $0x10] sm:$0xff] (%p1898_p5), %v1390_v0  ;;  %1395 = vst [vmem:[%s1330_s5 + $0x30] sm:$0xff] (%p1898_p5), %v1394_v28  ;;  %v1402_v5 = vld [vmem:[%s2147_s17 + $0x38] sm:$0xff] (%p1898_p5)  ;;  %v1406_v7 = vld [vmem:[%s2147_s17 + $0x48] sm:$0xff] (%p1898_p5) }
 0x163   : > { %v1647_v19 = vsel %vm1244_vm1, 1.0, %v1846_v9  ;;  %v1651_v14 = vsel %vm1248_vm2, 1.0, %v1846_v9  ;;  %vm1245_vm3 = vcmp.ge.f32.partialorder %v1237_v13, 1.25  ;;  %vm1249_vm4 = vcmp.ge.f32.partialorder %v1241_v15, 1.25  ;;  %1397 = vst [vmem:[%s1330_s5 + $0x40] sm:$0xff] (%p1898_p5), %v1396_v2  ;;  %1401 = vst [vmem:[%s1330_s5 + $0x60] sm:$0xff] (%p1898_p5), %v1400_v4 }
 0x164   : > { %v1648_v20 = vsel %vm1245_vm3, 1.0, %v1846_v9  ;;  %v1652_v21 = vsel %vm1249_vm4, 1.0, %v1846_v9  ;;  %vm1246_vm5 = vcmp.ge.f32.partialorder %v1238_v43, 1.25  ;;  %vm1250_vm6 = vcmp.ge.f32.partialorder %v1242_v18, 1.25  ;;  %1403 = vst [vmem:[%s1330_s5 + $0x70] sm:$0xff] (%p1898_p5), %v1402_v5  ;;  %v1408_v8 = vld [vmem:[%s2147_s17 + $0x50] sm:$0xff] (%p1898_p5) }
 0x165   : > { %v1677_v22 = vpack.c.bf16 %v1648_v20, %v1647_v19  ;;  %v1297_v23 = vadd.f32 %v1648_v20, %v1647_v19  ;;  %v1679_v25 = vpack.c.bf16 %v1652_v21, %v1651_v14  ;;  %v1649_v26 = vsel %vm1246_vm5, 1.0, %v1846_v9  ;;  %v1410_v10 = vld [vmem:[%s2147_s17 + $0x58] sm:$0xff] (%p1898_p5)  ;;  %1407 = vst [vmem:[%s1330_s5 + $0x90] sm:$0xff] (%p1898_p5), %v1406_v7  ;;  %1409 = vst [vmem:[%s1330_s5 + $0xa0] sm:$0xff] (%p1898_p5), %v1408_v8 }
 0x166   : > { %v1239_v27 = vadd.f32 %v1231_v1, %v1223_v16  ;;  %v1243_v29 = vadd.f32 %v1235_v6, %v1227_v17  ;;  %v1653_v32 = vsel %vm1250_vm6, 1.0, %v1846_v9  ;;  %v1392_v1 = vld [vmem:[%s2147_s17 + $0x10] sm:$0xff] (%p1898_p5)  ;;  %v1404_v6 = vld [vmem:[%s2147_s17 + $0x40] sm:$0xff] (%p1898_p5)  ;;  %1411 = vst [vmem:[%s1330_s5 + $0xb0] sm:$0xff] (%p1898_p5), %v1410_v10 }
 0x167   : > { %1659 = vst [vmem:[%s2147_s17 + $0x60] sm:$0xff] %v1677_v22  ;;  %1661 = vst [vmem:[%s2147_s17 + $0x70] sm:$0xff] %v1679_v25  ;;  %v1298_v31 = vadd.f32 %v1649_v26, %v1297_v23 }
 0x168   : > { %vm1247_vm7 = vcmp.ge.f32.partialorder %v1239_v27, 1.25  ;;  %vm1251_vm8 = vcmp.ge.f32.partialorder %v1243_v29, 1.25  ;;  %1393 = vst [vmem:[%s1330_s5 + $0x20] sm:$0xff] (%p1898_p5), %v1392_v1  ;;  %1405 = vst [vmem:[%s1330_s5 + $0x80] sm:$0xff] (%p1898_p5), %v1404_v6 }
 0x169   : > { %v1650_v33 = vsel %vm1247_vm7, 1.0, %v1846_v9  ;;  %v1654_v34 = vsel %vm1251_vm8, 1.0, %v1846_v9 }
 0x16a   : > { %v1678_v36 = vpack.c.bf16 %v1650_v33, %v1649_v26  ;;  %v1299_v37 = vadd.f32 %v1650_v33, %v1298_v31  ;;  %v1680_v38 = vpack.c.bf16 %v1654_v34, %v1653_v32 }
 0x16c   : > { %1660 = vst [vmem:[%s2147_s17 + $0x68] sm:$0xff] %v1678_v36  ;;  %v1300_v40 = vadd.f32 %v1651_v14, %v1299_v37  ;;  %1662 = vst [vmem:[%s2147_s17 + $0x78] sm:$0xff] %v1680_v38 }
 0x16e   : > { %v1301_v41 = vadd.f32 %v1652_v21, %v1300_v40  ;;  %v1412_v39 = vld [vmem:[%s2147_s17 + $0x60] sm:$0xff] (%p1898_p5)  ;;  %v1416_v12 = vld [vmem:[%s2147_s17 + $0x70] sm:$0xff] (%p1898_p5) }
 0x16f   : > { %1413 = vst [vmem:[%s1330_s5 + $0xc0] sm:$0xff] (%p1898_p5), %v1412_v39  ;;  %1417 = vst [vmem:[%s1330_s5 + $0xe0] sm:$0xff] (%p1898_p5), %v1416_v12 }
 0x170   : > { %v1302_v42 = vadd.f32 %v1653_v32, %v1301_v41 }
 0x172   : > { %v1303_v44 = vadd.f32 %v1654_v34, %v1302_v42 }
 0x173   : > { %v1414_v11 = vld [vmem:[%s2147_s17 + $0x68] sm:$0xff] (%p1898_p5)  ;;  %v1418_v13 = vld [vmem:[%s2147_s17 + $0x78] sm:$0xff] (%p1898_p5) }
 0x174   : > { %1304 = vadd.xlane.f32.xlu1 %v1303_v44  ;;  %1415 = vst [vmem:[%s1330_s5 + $0xd0] sm:$0xff] (%p1898_p5), %v1414_v11  ;;  %1419 = vst [vmem:[%s1330_s5 + $0xf0] sm:$0xff] (%p1898_p5), %v1418_v13 }
 0x1df   : > { %v769_v45 = vpop.xlane.xlu0 %768 }
 0x1e0   : > { %v770_v46 = vrot.slane %v769_v45, 4 }
 0x1e2   : > { %v771_v30 = vadd.f32 %v770_v46, %v769_v45 }
 0x1e4   : > { %v772_v48 = vrot.slane %v771_v30, 2  ;;  %v1041_v49 = vpop.xlane.xlu0 %1040 }
 0x1e5   : > { %v1042_v50 = vrot.slane %v1041_v49, 4 }
 0x1e6   : > { %v773_v51 = vadd.f32 %v772_v48, %v771_v30 }
 0x1e7   : > { %v1043_v52 = vadd.f32 %v1042_v50, %v1041_v49 }
 0x1e8   : > { %v774_v35 = vrot.slane %v773_v51, 1 }
 0x1e9   : > { %v1044_v9 = vrot.slane %v1043_v52, 2 }
 0x1ea   : > { %v775_v53 = vadd.f32 %v774_v35, %v773_v51 }
 0x1eb   : > { %v1045_v55 = vadd.f32 %v1044_v9, %v1043_v52 }
 0x1ec   : > { %1702 = vpush %v775_v53 }
 0x1ed   : > { %v1046_v56 = vrot.slane %v1045_v55, 1 }
 0x1ef   : > { %v1047_v57 = vadd.f32 %v1046_v56, %v1045_v55 }
 0x1f1   : > { %1704 = vpush %v1047_v57 }
 0x201   : > { %v1305_v47 = vpop.xlane.xlu1 %1304 }
 0x202   : > { %v1306_v58 = vrot.slane %v1305_v47, 4 }
 0x204   : > { %v1307_v59 = vadd.f32 %v1306_v58, %v1305_v47 }
 0x206   : > { %v1308_v54 = vrot.slane %v1307_v59, 2 }
 0x208   : > { %v1309_v60 = vadd.f32 %v1308_v54, %v1307_v59 }
 0x20a   : > { %v1310_v61 = vrot.slane %v1309_v60, 1 }
 0x20c   : > { %v1311_v62 = vadd.f32 %v1310_v61, %v1309_v60 }
 0x20e   : > { %1706 = vpush %v1311_v62 }
 0x21d   : > { %s1703_s18 = spop %1702 }
 0x222   : > { %s1705_s21 = spop %1704 }
 0x223   : > { %s1049_s23 = sadd.f32 %s1705_s21, %s1703_s18 }
 0x23d   : > { %1327 = sbr.rel (!%p1898_p5) target bundleno = 580 (0x244), region = 70 }
 0x23f   : > { %s1707_s24 = spop %1706 }
 0x240   : > { %s1313_s28 = sadd.f32 %s1707_s24, %s1049_s23 }
 0x242   : > { %v1314_v24 = vstv %s1313_s28 }
 0x243   : > { %1316 = vst [vmem:[%s496_s27] sm:$0xff] %v1314_v24 }
 0x244 PF: > { %p11_p11 = scmp.ge.s32.totalorder %s1886_s16, 4   ;;  %s2289_s12 = smov %s1839_s13 }
 0x245   : > { %s2290_s13 = smov %s1896_s19  ;;  %s2291_s14 = smov %s1886_s16 }
 0x246   :  { %13 = sbr.rel (!%p11_p11) target bundleno = 2 (0x2), region = 156 }

// kernel: network_forward.12
= control target key start
LH: loop header
LB: loop body
LE: loop exit
PB: predicated region body
PF: predicated region fallthrough
CT: control target
= control target key end

     0   :  { %s3417_s12 = smov 0   ;;  %s3419_s13 = smov 0   ;;  %s4205_s0 = inlined_call_operand.vmem [shape: bf16[8,2048], index: 0, kind: input, shape index: {}]   ;;  %s4206_s1 = inlined_call_operand.vmem [shape: bf16[2048,512], index: 1, kind: input, shape index: {}]   ;;  %s4207_s2 = inlined_call_operand.vmem [shape: bf16[4,2,512], index: 2, kind: output, shape index: {0}]   ;;  %s4208_s3 = inlined_call_operand.vmem [shape: f32[4,8,128], index: 3, kind: output, shape index: {1}]  }
   0x1   :  { %s3421_s14 = smov 0  }
   0x2 LB: > { %s3433_s15 = sadd.s32 4294967295, %s3393_s14   ;;  %s3436_s16 = sadd.s32 1, %s3393_s14   ;;  %s3393_s14 = sphi %s3421_s14, %s4212_s14   ;;  %s3389_s13 = sphi %s3419_s13, %s4211_s13   ;;  %s3385_s12 = sphi %s3417_s12, %s4210_s12  }
   0x3   : > { %s39_s17 = ssub.s32 %s3393_s14, %s3436_s16  ;;  %s42_s18 = sadd.s32 1, %s3389_s13 }
   0x4   : > { %p40_p0 = scmp.eq.s32.totalorder %s39_s17, 0  ;;  %p49_p1 = scmp.ne.s32.totalorder %s3389_s13, %s3385_s12 }
   0x5   : > { %p50_p2 = scmp.eq.s32.totalorder %s3393_s14, 0  ;;  %p79_p3 = scmp.eq.s32.totalorder %s3433_s15, 3 }
   0x6   : > { %s3446_s19 = scalar_select %p40_p0, %s3389_s13, %s42_s18  }
   0x7   : > { %p51_p4 = por %p50_p2, %p49_p1  ;;  %p3448_p5 = por %p79_p3, %p49_p1 }
   0x8   : > { %p2859_p6 = scmp.ge.s32.totalorder %s3393_s14, 4 }
   0xa   : > { %130 = sbr.rel (%p2859_p6) target bundleno = 192 (0xc0), region = 20 }
  0x11   : > { %133 = sbr.rel (!%p51_p4) target bundleno = 192 (0xc0), region = 24  ;;  %s135_s21 = sand.u32 (%p51_p4), 1, %s3389_s13  }
  0x12   : > { %s2861_s22 = sshll.u32 (%p51_p4), %s3393_s14, 2  ;;  %s2860_s23 = sshll.u32 (%p51_p4), %s135_s21, 10 }
  0x13   : > { %s3458_s26 = scalar_lea.vmem (%p51_p4), %s4206_s1, %s2861_s22  ;;  %s3462_s27 = scalar_lea.vmem (%p51_p4), [#allocation2], %s2860_s23 }
  0x14   : > { %v155_v0 = vld [vmem:[%s3458_s26] sm:$0xf] (%p51_p4)  ;;  %v157_v1 = vld [vmem:[%s3458_s26 + $0x10] sm:$0xf] (%p51_p4) }
  0x15   : > { %156 = vst [vmem:[%s3462_s27] sm:$0xf] (%p51_p4), %v155_v0  ;;  %158 = vst [vmem:[%s3462_s27 + $0x4] sm:$0xf] (%p51_p4), %v157_v1  ;;  %v159_v2 = vld [vmem:[%s3458_s26 + $0x20] sm:$0xf] (%p51_p4) }
  0x16   : > { %v161_v3 = vld [vmem:[%s3458_s26 + $0x30] sm:$0xf] (%p51_p4)  ;;  %v163_v4 = vld [vmem:[%s3458_s26 + $0x40] sm:$0xf] (%p51_p4)  ;;  %160 = vst [vmem:[%s3462_s27 + $0x8] sm:$0xf] (%p51_p4), %v159_v2 }
  0x17   : > { %162 = vst [vmem:[%s3462_s27 + $0xc] sm:$0xf] (%p51_p4), %v161_v3  ;;  %164 = vst [vmem:[%s3462_s27 + $0x10] sm:$0xf] (%p51_p4), %v163_v4  ;;  %v165_v5 = vld [vmem:[%s3458_s26 + $0x50] sm:$0xf] (%p51_p4) }
  0x18   : > { %v167_v6 = vld [vmem:[%s3458_s26 + $0x60] sm:$0xf]  ;;  %v169_v7 = vld [vmem:[%s3458_s26 + $0x70] sm:$0xf]  ;;  %166 = vst [vmem:[%s3462_s27 + $0x14] sm:$0xf] %v165_v5 }
  0x19   : > { %168 = vst [vmem:[%s3462_s27 + $0x18] sm:$0xf] %v167_v6  ;;  %170 = vst [vmem:[%s3462_s27 + $0x1c] sm:$0xf] %v169_v7  ;;  %v171_v8 = vld [vmem:[%s3458_s26 + $0x80] sm:$0xf] }
  0x1a   : > { %v173_v9 = vld [vmem:[%s3458_s26 + $0x90] sm:$0xf]  ;;  %v175_v10 = vld [vmem:[%s3458_s26 + $0xa0] sm:$0xf]  ;;  %172 = vst [vmem:[%s3462_s27 + $0x20] sm:$0xf] %v171_v8 }
  0x1b   : > { %174 = vst [vmem:[%s3462_s27 + $0x24] sm:$0xf] %v173_v9  ;;  %176 = vst [vmem:[%s3462_s27 + $0x28] sm:$0xf] %v175_v10  ;;  %v177_v11 = vld [vmem:[%s3458_s26 + $0xb0] sm:$0xf] }
  0x1c   : > { %v179_v12 = vld [vmem:[%s3458_s26 + $0xc0] sm:$0xf]  ;;  %v181_v13 = vld [vmem:[%s3458_s26 + $0xd0] sm:$0xf]  ;;  %178 = vst [vmem:[%s3462_s27 + $0x2c] sm:$0xf] %v177_v11 }
  0x1d   : > { %180 = vst [vmem:[%s3462_s27 + $0x30] sm:$0xf] %v179_v12  ;;  %182 = vst [vmem:[%s3462_s27 + $0x34] sm:$0xf] %v181_v13  ;;  %v183_v14 = vld [vmem:[%s3458_s26 + $0xe0] sm:$0xf] }
  0x1e   : > { %v185_v15 = vld [vmem:[%s3458_s26 + $0xf0] sm:$0xf]  ;;  %v187_v16 = vld [vmem:[%s3458_s26 + $0x100] sm:$0xf]  ;;  %184 = vst [vmem:[%s3462_s27 + $0x38] sm:$0xf] %v183_v14 }
  0x1f   : > { %186 = vst [vmem:[%s3462_s27 + $0x3c] sm:$0xf] %v185_v15  ;;  %188 = vst [vmem:[%s3462_s27 + $0x40] sm:$0xf] %v187_v16  ;;  %v189_v17 = vld [vmem:[%s3458_s26 + $0x110] sm:$0xf] }
  0x20   : > { %v191_v18 = vld [vmem:[%s3458_s26 + $0x120] sm:$0xf]  ;;  %v193_v19 = vld [vmem:[%s3458_s26 + $0x130] sm:$0xf]  ;;  %190 = vst [vmem:[%s3462_s27 + $0x44] sm:$0xf] %v189_v17 }
  0x21   : > { %192 = vst [vmem:[%s3462_s27 + $0x48] sm:$0xf] %v191_v18  ;;  %194 = vst [vmem:[%s3462_s27 + $0x4c] sm:$0xf] %v193_v19  ;;  %v195_v20 = vld [vmem:[%s3458_s26 + $0x140] sm:$0xf] }
  0x22   : > { %v197_v21 = vld [vmem:[%s3458_s26 + $0x150] sm:$0xf]  ;;  %v199_v22 = vld [vmem:[%s3458_s26 + $0x160] sm:$0xf]  ;;  %196 = vst [vmem:[%s3462_s27 + $0x50] sm:$0xf] %v195_v20 }
  0x23   : > { %198 = vst [vmem:[%s3462_s27 + $0x54] sm:$0xf] %v197_v21  ;;  %200 = vst [vmem:[%s3462_s27 + $0x58] sm:$0xf] %v199_v22  ;;  %v201_v23 = vld [vmem:[%s3458_s26 + $0x170] sm:$0xf] }
  0x24   : > { %v203_v24 = vld [vmem:[%s3458_s26 + $0x180] sm:$0xf]  ;;  %v205_v25 = vld [vmem:[%s3458_s26 + $0x190] sm:$0xf]  ;;  %202 = vst [vmem:[%s3462_s27 + $0x5c] sm:$0xf] %v201_v23 }
  0x25   : > { %204 = vst [vmem:[%s3462_s27 + $0x60] sm:$0xf] %v203_v24  ;;  %206 = vst [vmem:[%s3462_s27 + $0x64] sm:$0xf] %v205_v25  ;;  %v207_v26 = vld [vmem:[%s3458_s26 + $0x1a0] sm:$0xf] }
  0x26   : > { %v209_v27 = vld [vmem:[%s3458_s26 + $0x1b0] sm:$0xf]  ;;  %v211_v28 = vld [vmem:[%s3458_s26 + $0x1c0] sm:$0xf]  ;;  %208 = vst [vmem:[%s3462_s27 + $0x68] sm:$0xf] %v207_v26 }
  0x27   : > { %210 = vst [vmem:[%s3462_s27 + $0x6c] sm:$0xf] %v209_v27  ;;  %212 = vst [vmem:[%s3462_s27 + $0x70] sm:$0xf] %v211_v28  ;;  %v213_v29 = vld [vmem:[%s3458_s26 + $0x1d0] sm:$0xf] }
  0x28   : > { %v215_v30 = vld [vmem:[%s3458_s26 + $0x1e0] sm:$0xf]  ;;  %v217_v31 = vld [vmem:[%s3458_s26 + $0x1f0] sm:$0xf]  ;;  %214 = vst [vmem:[%s3462_s27 + $0x74] sm:$0xf] %v213_v29 }
  0x29   : > { %216 = vst [vmem:[%s3462_s27 + $0x78] sm:$0xf] %v215_v30  ;;  %218 = vst [vmem:[%s3462_s27 + $0x7c] sm:$0xf] %v217_v31  ;;  %v219_v32 = vld [vmem:[%s3458_s26 + $0x200] sm:$0xf] }
  0x2a   : > { %v221_v33 = vld [vmem:[%s3458_s26 + $0x210] sm:$0xf]  ;;  %v223_v34 = vld [vmem:[%s3458_s26 + $0x220] sm:$0xf]  ;;  %220 = vst [vmem:[%s3462_s27 + $0x80] sm:$0xf] %v219_v32 }
  0x2b   : > { %222 = vst [vmem:[%s3462_s27 + $0x84] sm:$0xf] %v221_v33  ;;  %224 = vst [vmem:[%s3462_s27 + $0x88] sm:$0xf] %v223_v34  ;;  %v225_v35 = vld [vmem:[%s3458_s26 + $0x230] sm:$0xf] }
  0x2c   : > { %v227_v36 = vld [vmem:[%s3458_s26 + $0x240] sm:$0xf]  ;;  %v229_v37 = vld [vmem:[%s3458_s26 + $0x250] sm:$0xf]  ;;  %226 = vst [vmem:[%s3462_s27 + $0x8c] sm:$0xf] %v225_v35 }
  0x2d   : > { %228 = vst [vmem:[%s3462_s27 + $0x90] sm:$0xf] %v227_v36  ;;  %230 = vst [vmem:[%s3462_s27 + $0x94] sm:$0xf] %v229_v37  ;;  %v231_v38 = vld [vmem:[%s3458_s26 + $0x260] sm:$0xf] }
  0x2e   : > { %v233_v39 = vld [vmem:[%s3458_s26 + $0x270] sm:$0xf]  ;;  %v235_v40 = vld [vmem:[%s3458_s26 + $0x280] sm:$0xf]  ;;  %232 = vst [vmem:[%s3462_s27 + $0x98] sm:$0xf] %v231_v38 }
  0x2f   : > { %234 = vst [vmem:[%s3462_s27 + $0x9c] sm:$0xf] %v233_v39  ;;  %236 = vst [vmem:[%s3462_s27 + $0xa0] sm:$0xf] %v235_v40  ;;  %v237_v41 = vld [vmem:[%s3458_s26 + $0x290] sm:$0xf] }
  0x30   : > { %v239_v42 = vld [vmem:[%s3458_s26 + $0x2a0] sm:$0xf]  ;;  %v241_v43 = vld [vmem:[%s3458_s26 + $0x2b0] sm:$0xf]  ;;  %238 = vst [vmem:[%s3462_s27 + $0xa4] sm:$0xf] %v237_v41 }
  0x31   : > { %240 = vst [vmem:[%s3462_s27 + $0xa8] sm:$0xf] %v239_v42  ;;  %242 = vst [vmem:[%s3462_s27 + $0xac] sm:$0xf] %v241_v43  ;;  %v243_v44 = vld [vmem:[%s3458_s26 + $0x2c0] sm:$0xf] }
  0x32   : > { %v245_v45 = vld [vmem:[%s3458_s26 + $0x2d0] sm:$0xf]  ;;  %v247_v46 = vld [vmem:[%s3458_s26 + $0x2e0] sm:$0xf]  ;;  %244 = vst [vmem:[%s3462_s27 + $0xb0] sm:$0xf] %v243_v44 }
  0x33   : > { %246 = vst [vmem:[%s3462_s27 + $0xb4] sm:$0xf] %v245_v45  ;;  %248 = vst [vmem:[%s3462_s27 + $0xb8] sm:$0xf] %v247_v46  ;;  %v249_v47 = vld [vmem:[%s3458_s26 + $0x2f0] sm:$0xf] }
  0x34   : > { %v251_v48 = vld [vmem:[%s3458_s26 + $0x300] sm:$0xf]  ;;  %v253_v49 = vld [vmem:[%s3458_s26 + $0x310] sm:$0xf]  ;;  %250 = vst [vmem:[%s3462_s27 + $0xbc] sm:$0xf] %v249_v47 }
  0x35   : > { %252 = vst [vmem:[%s3462_s27 + $0xc0] sm:$0xf] %v251_v48  ;;  %254 = vst [vmem:[%s3462_s27 + $0xc4] sm:$0xf] %v253_v49  ;;  %v255_v50 = vld [vmem:[%s3458_s26 + $0x320] sm:$0xf] }
  0x36   : > { %v257_v51 = vld [vmem:[%s3458_s26 + $0x330] sm:$0xf]  ;;  %v259_v52 = vld [vmem:[%s3458_s26 + $0x340] sm:$0xf]  ;;  %256 = vst [vmem:[%s3462_s27 + $0xc8] sm:$0xf] %v255_v50 }
  0x37   : > { %258 = vst [vmem:[%s3462_s27 + $0xcc] sm:$0xf] %v257_v51  ;;  %260 = vst [vmem:[%s3462_s27 + $0xd0] sm:$0xf] %v259_v52  ;;  %v261_v53 = vld [vmem:[%s3458_s26 + $0x350] sm:$0xf] }
  0x38   : > { %v263_v54 = vld [vmem:[%s3458_s26 + $0x360] sm:$0xf]  ;;  %v265_v55 = vld [vmem:[%s3458_s26 + $0x370] sm:$0xf]  ;;  %262 = vst [vmem:[%s3462_s27 + $0xd4] sm:$0xf] %v261_v53 }
  0x39   : > { %264 = vst [vmem:[%s3462_s27 + $0xd8] sm:$0xf] %v263_v54  ;;  %266 = vst [vmem:[%s3462_s27 + $0xdc] sm:$0xf] %v265_v55  ;;  %v267_v56 = vld [vmem:[%s3458_s26 + $0x380] sm:$0xf] }
  0x3a   : > { %v269_v57 = vld [vmem:[%s3458_s26 + $0x390] sm:$0xf]  ;;  %v271_v58 = vld [vmem:[%s3458_s26 + $0x3a0] sm:$0xf]  ;;  %268 = vst [vmem:[%s3462_s27 + $0xe0] sm:$0xf] %v267_v56 }
  0x3b   : > { %270 = vst [vmem:[%s3462_s27 + $0xe4] sm:$0xf] %v269_v57  ;;  %272 = vst [vmem:[%s3462_s27 + $0xe8] sm:$0xf] %v271_v58  ;;  %v273_v59 = vld [vmem:[%s3458_s26 + $0x3b0] sm:$0xf] }
  0x3c   : > { %v275_v60 = vld [vmem:[%s3458_s26 + $0x3c0] sm:$0xf]  ;;  %v277_v61 = vld [vmem:[%s3458_s26 + $0x3d0] sm:$0xf]  ;;  %274 = vst [vmem:[%s3462_s27 + $0xec] sm:$0xf] %v273_v59 }
  0x3d   : > { %276 = vst [vmem:[%s3462_s27 + $0xf0] sm:$0xf] %v275_v60  ;;  %278 = vst [vmem:[%s3462_s27 + $0xf4] sm:$0xf] %v277_v61  ;;  %v279_v62 = vld [vmem:[%s3458_s26 + $0x3e0] sm:$0xf] }
  0x3e   : > { %v281_v63 = vld [vmem:[%s3458_s26 + $0x3f0] sm:$0xf]  ;;  %v283_v0 = vld [vmem:[%s3458_s26 + $0x400] sm:$0xf]  ;;  %280 = vst [vmem:[%s3462_s27 + $0xf8] sm:$0xf] %v279_v62 }
  0x3f   : > { %282 = vst [vmem:[%s3462_s27 + $0xfc] sm:$0xf] %v281_v63  ;;  %284 = vst [vmem:[%s3462_s27 + $0x100] sm:$0xf] %v283_v0  ;;  %v285_v1 = vld [vmem:[%s3458_s26 + $0x410] sm:$0xf] }
  0x40   : > { %v287_v2 = vld [vmem:[%s3458_s26 + $0x420] sm:$0xf]  ;;  %v289_v3 = vld [vmem:[%s3458_s26 + $0x430] sm:$0xf]  ;;  %286 = vst [vmem:[%s3462_s27 + $0x104] sm:$0xf] %v285_v1 }
  0x41   : > { %288 = vst [vmem:[%s3462_s27 + $0x108] sm:$0xf] %v287_v2  ;;  %290 = vst [vmem:[%s3462_s27 + $0x10c] sm:$0xf] %v289_v3  ;;  %v291_v4 = vld [vmem:[%s3458_s26 + $0x440] sm:$0xf] }
  0x42   : > { %v293_v5 = vld [vmem:[%s3458_s26 + $0x450] sm:$0xf]  ;;  %v295_v6 = vld [vmem:[%s3458_s26 + $0x460] sm:$0xf]  ;;  %292 = vst [vmem:[%s3462_s27 + $0x110] sm:$0xf] %v291_v4 }
  0x43   : > { %294 = vst [vmem:[%s3462_s27 + $0x114] sm:$0xf] %v293_v5  ;;  %296 = vst [vmem:[%s3462_s27 + $0x118] sm:$0xf] %v295_v6  ;;  %v297_v7 = vld [vmem:[%s3458_s26 + $0x470] sm:$0xf] }
  0x44   : > { %v299_v8 = vld [vmem:[%s3458_s26 + $0x480] sm:$0xf]  ;;  %v301_v9 = vld [vmem:[%s3458_s26 + $0x490] sm:$0xf]  ;;  %298 = vst [vmem:[%s3462_s27 + $0x11c] sm:$0xf] %v297_v7 }
  0x45   : > { %300 = vst [vmem:[%s3462_s27 + $0x120] sm:$0xf] %v299_v8  ;;  %302 = vst [vmem:[%s3462_s27 + $0x124] sm:$0xf] %v301_v9  ;;  %v303_v10 = vld [vmem:[%s3458_s26 + $0x4a0] sm:$0xf] }
  0x46   : > { %v305_v11 = vld [vmem:[%s3458_s26 + $0x4b0] sm:$0xf]  ;;  %v307_v12 = vld [vmem:[%s3458_s26 + $0x4c0] sm:$0xf]  ;;  %304 = vst [vmem:[%s3462_s27 + $0x128] sm:$0xf] %v303_v10 }
  0x47   : > { %306 = vst [vmem:[%s3462_s27 + $0x12c] sm:$0xf] %v305_v11  ;;  %308 = vst [vmem:[%s3462_s27 + $0x130] sm:$0xf] %v307_v12  ;;  %v309_v13 = vld [vmem:[%s3458_s26 + $0x4d0] sm:$0xf] }
  0x48   : > { %v311_v14 = vld [vmem:[%s3458_s26 + $0x4e0] sm:$0xf]  ;;  %v313_v15 = vld [vmem:[%s3458_s26 + $0x4f0] sm:$0xf]  ;;  %310 = vst [vmem:[%s3462_s27 + $0x134] sm:$0xf] %v309_v13 }
  0x49   : > { %312 = vst [vmem:[%s3462_s27 + $0x138] sm:$0xf] %v311_v14  ;;  %314 = vst [vmem:[%s3462_s27 + $0x13c] sm:$0xf] %v313_v15  ;;  %v315_v16 = vld [vmem:[%s3458_s26 + $0x500] sm:$0xf] }
  0x4a   : > { %v317_v17 = vld [vmem:[%s3458_s26 + $0x510] sm:$0xf]  ;;  %v319_v18 = vld [vmem:[%s3458_s26 + $0x520] sm:$0xf]  ;;  %316 = vst [vmem:[%s3462_s27 + $0x140] sm:$0xf] %v315_v16 }
  0x4b   : > { %318 = vst [vmem:[%s3462_s27 + $0x144] sm:$0xf] %v317_v17  ;;  %320 = vst [vmem:[%s3462_s27 + $0x148] sm:$0xf] %v319_v18  ;;  %v321_v19 = vld [vmem:[%s3458_s26 + $0x530] sm:$0xf] }
  0x4c   : > { %v323_v20 = vld [vmem:[%s3458_s26 + $0x540] sm:$0xf]  ;;  %v325_v21 = vld [vmem:[%s3458_s26 + $0x550] sm:$0xf]  ;;  %322 = vst [vmem:[%s3462_s27 + $0x14c] sm:$0xf] %v321_v19 }
  0x4d   : > { %324 = vst [vmem:[%s3462_s27 + $0x150] sm:$0xf] %v323_v20  ;;  %326 = vst [vmem:[%s3462_s27 + $0x154] sm:$0xf] %v325_v21  ;;  %v327_v22 = vld [vmem:[%s3458_s26 + $0x560] sm:$0xf] }
  0x4e   : > { %v329_v23 = vld [vmem:[%s3458_s26 + $0x570] sm:$0xf]  ;;  %v331_v24 = vld [vmem:[%s3458_s26 + $0x580] sm:$0xf]  ;;  %328 = vst [vmem:[%s3462_s27 + $0x158] sm:$0xf] %v327_v22 }
  0x4f   : > { %330 = vst [vmem:[%s3462_s27 + $0x15c] sm:$0xf] %v329_v23  ;;  %332 = vst [vmem:[%s3462_s27 + $0x160] sm:$0xf] %v331_v24  ;;  %v333_v25 = vld [vmem:[%s3458_s26 + $0x590] sm:$0xf] }
  0x50   : > { %v335_v26 = vld [vmem:[%s3458_s26 + $0x5a0] sm:$0xf]  ;;  %v337_v27 = vld [vmem:[%s3458_s26 + $0x5b0] sm:$0xf]  ;;  %334 = vst [vmem:[%s3462_s27 + $0x164] sm:$0xf] %v333_v25 }
  0x51   : > { %336 = vst [vmem:[%s3462_s27 + $0x168] sm:$0xf] %v335_v26  ;;  %338 = vst [vmem:[%s3462_s27 + $0x16c] sm:$0xf] %v337_v27  ;;  %v339_v28 = vld [vmem:[%s3458_s26 + $0x5c0] sm:$0xf] }
  0x52   : > { %v341_v29 = vld [vmem:[%s3458_s26 + $0x5d0] sm:$0xf]  ;;  %v343_v30 = vld [vmem:[%s3458_s26 + $0x5e0] sm:$0xf]  ;;  %340 = vst [vmem:[%s3462_s27 + $0x170] sm:$0xf] %v339_v28 }
  0x53   : > { %342 = vst [vmem:[%s3462_s27 + $0x174] sm:$0xf] %v341_v29  ;;  %344 = vst [vmem:[%s3462_s27 + $0x178] sm:$0xf] %v343_v30  ;;  %v345_v31 = vld [vmem:[%s3458_s26 + $0x5f0] sm:$0xf] }
  0x54   : > { %v347_v32 = vld [vmem:[%s3458_s26 + $0x600] sm:$0xf]  ;;  %v349_v33 = vld [vmem:[%s3458_s26 + $0x610] sm:$0xf]  ;;  %346 = vst [vmem:[%s3462_s27 + $0x17c] sm:$0xf] %v345_v31 }
  0x55   : > { %348 = vst [vmem:[%s3462_s27 + $0x180] sm:$0xf] %v347_v32  ;;  %350 = vst [vmem:[%s3462_s27 + $0x184] sm:$0xf] %v349_v33  ;;  %v351_v34 = vld [vmem:[%s3458_s26 + $0x620] sm:$0xf] }
  0x56   : > { %v353_v35 = vld [vmem:[%s3458_s26 + $0x630] sm:$0xf]  ;;  %v355_v36 = vld [vmem:[%s3458_s26 + $0x640] sm:$0xf]  ;;  %352 = vst [vmem:[%s3462_s27 + $0x188] sm:$0xf] %v351_v34 }
  0x57   : > { %354 = vst [vmem:[%s3462_s27 + $0x18c] sm:$0xf] %v353_v35  ;;  %356 = vst [vmem:[%s3462_s27 + $0x190] sm:$0xf] %v355_v36  ;;  %v357_v37 = vld [vmem:[%s3458_s26 + $0x650] sm:$0xf] }
  0x58   : > { %v359_v38 = vld [vmem:[%s3458_s26 + $0x660] sm:$0xf]  ;;  %v361_v39 = vld [vmem:[%s3458_s26 + $0x670] sm:$0xf]  ;;  %358 = vst [vmem:[%s3462_s27 + $0x194] sm:$0xf] %v357_v37 }
  0x59   : > { %360 = vst [vmem:[%s3462_s27 + $0x198] sm:$0xf] %v359_v38  ;;  %362 = vst [vmem:[%s3462_s27 + $0x19c] sm:$0xf] %v361_v39  ;;  %v363_v40 = vld [vmem:[%s3458_s26 + $0x680] sm:$0xf] }
  0x5a   : > { %v365_v41 = vld [vmem:[%s3458_s26 + $0x690] sm:$0xf]  ;;  %v367_v42 = vld [vmem:[%s3458_s26 + $0x6a0] sm:$0xf]  ;;  %364 = vst [vmem:[%s3462_s27 + $0x1a0] sm:$0xf] %v363_v40 }
  0x5b   : > { %366 = vst [vmem:[%s3462_s27 + $0x1a4] sm:$0xf] %v365_v41  ;;  %368 = vst [vmem:[%s3462_s27 + $0x1a8] sm:$0xf] %v367_v42  ;;  %v369_v43 = vld [vmem:[%s3458_s26 + $0x6b0] sm:$0xf] }
  0x5c   : > { %v371_v44 = vld [vmem:[%s3458_s26 + $0x6c0] sm:$0xf]  ;;  %v373_v45 = vld [vmem:[%s3458_s26 + $0x6d0] sm:$0xf]  ;;  %370 = vst [vmem:[%s3462_s27 + $0x1ac] sm:$0xf] %v369_v43 }
  0x5d   : > { %372 = vst [vmem:[%s3462_s27 + $0x1b0] sm:$0xf] %v371_v44  ;;  %374 = vst [vmem:[%s3462_s27 + $0x1b4] sm:$0xf] %v373_v45  ;;  %v375_v46 = vld [vmem:[%s3458_s26 + $0x6e0] sm:$0xf] }
  0x5e   : > { %v377_v47 = vld [vmem:[%s3458_s26 + $0x6f0] sm:$0xf]  ;;  %v379_v48 = vld [vmem:[%s3458_s26 + $0x700] sm:$0xf]  ;;  %376 = vst [vmem:[%s3462_s27 + $0x1b8] sm:$0xf] %v375_v46 }
  0x5f   : > { %378 = vst [vmem:[%s3462_s27 + $0x1bc] sm:$0xf] %v377_v47  ;;  %380 = vst [vmem:[%s3462_s27 + $0x1c0] sm:$0xf] %v379_v48  ;;  %v381_v49 = vld [vmem:[%s3458_s26 + $0x710] sm:$0xf] }
  0x60   : > { %v383_v50 = vld [vmem:[%s3458_s26 + $0x720] sm:$0xf]  ;;  %v385_v51 = vld [vmem:[%s3458_s26 + $0x730] sm:$0xf]  ;;  %382 = vst [vmem:[%s3462_s27 + $0x1c4] sm:$0xf] %v381_v49 }
  0x61   : > { %384 = vst [vmem:[%s3462_s27 + $0x1c8] sm:$0xf] %v383_v50  ;;  %386 = vst [vmem:[%s3462_s27 + $0x1cc] sm:$0xf] %v385_v51  ;;  %v387_v52 = vld [vmem:[%s3458_s26 + $0x740] sm:$0xf] }
  0x62   : > { %v389_v53 = vld [vmem:[%s3458_s26 + $0x750] sm:$0xf]  ;;  %v391_v54 = vld [vmem:[%s3458_s26 + $0x760] sm:$0xf]  ;;  %388 = vst [vmem:[%s3462_s27 + $0x1d0] sm:$0xf] %v387_v52 }
  0x63   : > { %390 = vst [vmem:[%s3462_s27 + $0x1d4] sm:$0xf] %v389_v53  ;;  %392 = vst [vmem:[%s3462_s27 + $0x1d8] sm:$0xf] %v391_v54  ;;  %v393_v55 = vld [vmem:[%s3458_s26 + $0x770] sm:$0xf] }
  0x64   : > { %v395_v56 = vld [vmem:[%s3458_s26 + $0x780] sm:$0xf]  ;;  %v397_v57 = vld [vmem:[%s3458_s26 + $0x790] sm:$0xf]  ;;  %394 = vst [vmem:[%s3462_s27 + $0x1dc] sm:$0xf] %v393_v55 }
  0x65   : > { %396 = vst [vmem:[%s3462_s27 + $0x1e0] sm:$0xf] %v395_v56  ;;  %398 = vst [vmem:[%s3462_s27 + $0x1e4] sm:$0xf] %v397_v57  ;;  %v399_v58 = vld [vmem:[%s3458_s26 + $0x7a0] sm:$0xf] }
  0x66   : > { %v401_v59 = vld [vmem:[%s3458_s26 + $0x7b0] sm:$0xf]  ;;  %v403_v60 = vld [vmem:[%s3458_s26 + $0x7c0] sm:$0xf]  ;;  %400 = vst [vmem:[%s3462_s27 + $0x1e8] sm:$0xf] %v399_v58 }
  0x67   : > { %402 = vst [vmem:[%s3462_s27 + $0x1ec] sm:$0xf] %v401_v59  ;;  %404 = vst [vmem:[%s3462_s27 + $0x1f0] sm:$0xf] %v403_v60  ;;  %v405_v61 = vld [vmem:[%s3458_s26 + $0x7d0] sm:$0xf] }
  0x68   : > { %v407_v62 = vld [vmem:[%s3458_s26 + $0x7e0] sm:$0xf]  ;;  %v409_v63 = vld [vmem:[%s3458_s26 + $0x7f0] sm:$0xf]  ;;  %406 = vst [vmem:[%s3462_s27 + $0x1f4] sm:$0xf] %v405_v61 }
  0x69   : > { %408 = vst [vmem:[%s3462_s27 + $0x1f8] sm:$0xf] %v407_v62  ;;  %410 = vst [vmem:[%s3462_s27 + $0x1fc] sm:$0xf] %v409_v63  ;;  %v411_v0 = vld [vmem:[%s3458_s26 + $0x800] sm:$0xf] }
  0x6a   : > { %v413_v1 = vld [vmem:[%s3458_s26 + $0x810] sm:$0xf]  ;;  %v415_v2 = vld [vmem:[%s3458_s26 + $0x820] sm:$0xf]  ;;  %412 = vst [vmem:[%s3462_s27 + $0x200] sm:$0xf] %v411_v0 }
  0x6b   : > { %414 = vst [vmem:[%s3462_s27 + $0x204] sm:$0xf] %v413_v1  ;;  %416 = vst [vmem:[%s3462_s27 + $0x208] sm:$0xf] %v415_v2  ;;  %v417_v3 = vld [vmem:[%s3458_s26 + $0x830] sm:$0xf] }
  0x6c   : > { %v419_v4 = vld [vmem:[%s3458_s26 + $0x840] sm:$0xf]  ;;  %v421_v5 = vld [vmem:[%s3458_s26 + $0x850] sm:$0xf]  ;;  %418 = vst [vmem:[%s3462_s27 + $0x20c] sm:$0xf] %v417_v3 }
  0x6d   : > { %420 = vst [vmem:[%s3462_s27 + $0x210] sm:$0xf] %v419_v4  ;;  %422 = vst [vmem:[%s3462_s27 + $0x214] sm:$0xf] %v421_v5  ;;  %v423_v6 = vld [vmem:[%s3458_s26 + $0x860] sm:$0xf] }
  0x6e   : > { %v425_v7 = vld [vmem:[%s3458_s26 + $0x870] sm:$0xf]  ;;  %v427_v8 = vld [vmem:[%s3458_s26 + $0x880] sm:$0xf]  ;;  %424 = vst [vmem:[%s3462_s27 + $0x218] sm:$0xf] %v423_v6 }
  0x6f   : > { %426 = vst [vmem:[%s3462_s27 + $0x21c] sm:$0xf] %v425_v7  ;;  %428 = vst [vmem:[%s3462_s27 + $0x220] sm:$0xf] %v427_v8  ;;  %v429_v9 = vld [vmem:[%s3458_s26 + $0x890] sm:$0xf] }
  0x70   : > { %v431_v10 = vld [vmem:[%s3458_s26 + $0x8a0] sm:$0xf]  ;;  %v433_v11 = vld [vmem:[%s3458_s26 + $0x8b0] sm:$0xf]  ;;  %430 = vst [vmem:[%s3462_s27 + $0x224] sm:$0xf] %v429_v9 }
  0x71   : > { %432 = vst [vmem:[%s3462_s27 + $0x228] sm:$0xf] %v431_v10  ;;  %434 = vst [vmem:[%s3462_s27 + $0x22c] sm:$0xf] %v433_v11  ;;  %v435_v12 = vld [vmem:[%s3458_s26 + $0x8c0] sm:$0xf] }
  0x72   : > { %v437_v13 = vld [vmem:[%s3458_s26 + $0x8d0] sm:$0xf]  ;;  %v439_v14 = vld [vmem:[%s3458_s26 + $0x8e0] sm:$0xf]  ;;  %436 = vst [vmem:[%s3462_s27 + $0x230] sm:$0xf] %v435_v12 }
  0x73   : > { %438 = vst [vmem:[%s3462_s27 + $0x234] sm:$0xf] %v437_v13  ;;  %440 = vst [vmem:[%s3462_s27 + $0x238] sm:$0xf] %v439_v14  ;;  %v441_v15 = vld [vmem:[%s3458_s26 + $0x8f0] sm:$0xf] }
  0x74   : > { %v443_v16 = vld [vmem:[%s3458_s26 + $0x900] sm:$0xf]  ;;  %v445_v17 = vld [vmem:[%s3458_s26 + $0x910] sm:$0xf]  ;;  %442 = vst [vmem:[%s3462_s27 + $0x23c] sm:$0xf] %v441_v15 }
  0x75   : > { %444 = vst [vmem:[%s3462_s27 + $0x240] sm:$0xf] %v443_v16  ;;  %446 = vst [vmem:[%s3462_s27 + $0x244] sm:$0xf] %v445_v17  ;;  %v447_v18 = vld [vmem:[%s3458_s26 + $0x920] sm:$0xf] }
  0x76   : > { %v449_v19 = vld [vmem:[%s3458_s26 + $0x930] sm:$0xf]  ;;  %v451_v20 = vld [vmem:[%s3458_s26 + $0x940] sm:$0xf]  ;;  %448 = vst [vmem:[%s3462_s27 + $0x248] sm:$0xf] %v447_v18 }
  0x77   : > { %450 = vst [vmem:[%s3462_s27 + $0x24c] sm:$0xf] %v449_v19  ;;  %452 = vst [vmem:[%s3462_s27 + $0x250] sm:$0xf] %v451_v20  ;;  %v453_v21 = vld [vmem:[%s3458_s26 + $0x950] sm:$0xf] }
  0x78   : > { %v455_v22 = vld [vmem:[%s3458_s26 + $0x960] sm:$0xf]  ;;  %v457_v23 = vld [vmem:[%s3458_s26 + $0x970] sm:$0xf]  ;;  %454 = vst [vmem:[%s3462_s27 + $0x254] sm:$0xf] %v453_v21 }
  0x79   : > { %456 = vst [vmem:[%s3462_s27 + $0x258] sm:$0xf] %v455_v22  ;;  %458 = vst [vmem:[%s3462_s27 + $0x25c] sm:$0xf] %v457_v23  ;;  %v459_v24 = vld [vmem:[%s3458_s26 + $0x980] sm:$0xf] }
  0x7a   : > { %v461_v25 = vld [vmem:[%s3458_s26 + $0x990] sm:$0xf]  ;;  %v463_v26 = vld [vmem:[%s3458_s26 + $0x9a0] sm:$0xf]  ;;  %460 = vst [vmem:[%s3462_s27 + $0x260] sm:$0xf] %v459_v24 }
  0x7b   : > { %462 = vst [vmem:[%s3462_s27 + $0x264] sm:$0xf] %v461_v25  ;;  %464 = vst [vmem:[%s3462_s27 + $0x268] sm:$0xf] %v463_v26  ;;  %v465_v27 = vld [vmem:[%s3458_s26 + $0x9b0] sm:$0xf] }
  0x7c   : > { %v467_v28 = vld [vmem:[%s3458_s26 + $0x9c0] sm:$0xf]  ;;  %v469_v29 = vld [vmem:[%s3458_s26 + $0x9d0] sm:$0xf]  ;;  %466 = vst [vmem:[%s3462_s27 + $0x26c] sm:$0xf] %v465_v27 }
  0x7d   : > { %468 = vst [vmem:[%s3462_s27 + $0x270] sm:$0xf] %v467_v28  ;;  %470 = vst [vmem:[%s3462_s27 + $0x274] sm:$0xf] %v469_v29  ;;  %v471_v30 = vld [vmem:[%s3458_s26 + $0x9e0] sm:$0xf] }
  0x7e   : > { %v473_v31 = vld [vmem:[%s3458_s26 + $0x9f0] sm:$0xf]  ;;  %v475_v32 = vld [vmem:[%s3458_s26 + $0xa00] sm:$0xf]  ;;  %472 = vst [vmem:[%s3462_s27 + $0x278] sm:$0xf] %v471_v30 }
  0x7f   : > { %474 = vst [vmem:[%s3462_s27 + $0x27c] sm:$0xf] %v473_v31  ;;  %476 = vst [vmem:[%s3462_s27 + $0x280] sm:$0xf] %v475_v32  ;;  %v477_v33 = vld [vmem:[%s3458_s26 + $0xa10] sm:$0xf] }
  0x80   : > { %v479_v34 = vld [vmem:[%s3458_s26 + $0xa20] sm:$0xf]  ;;  %v481_v35 = vld [vmem:[%s3458_s26 + $0xa30] sm:$0xf]  ;;  %478 = vst [vmem:[%s3462_s27 + $0x284] sm:$0xf] %v477_v33 }
  0x81   : > { %480 = vst [vmem:[%s3462_s27 + $0x288] sm:$0xf] %v479_v34  ;;  %482 = vst [vmem:[%s3462_s27 + $0x28c] sm:$0xf] %v481_v35  ;;  %v483_v36 = vld [vmem:[%s3458_s26 + $0xa40] sm:$0xf] }
  0x82   : > { %v485_v37 = vld [vmem:[%s3458_s26 + $0xa50] sm:$0xf]  ;;  %v487_v38 = vld [vmem:[%s3458_s26 + $0xa60] sm:$0xf]  ;;  %484 = vst [vmem:[%s3462_s27 + $0x290] sm:$0xf] %v483_v36 }
  0x83   : > { %486 = vst [vmem:[%s3462_s27 + $0x294] sm:$0xf] %v485_v37  ;;  %488 = vst [vmem:[%s3462_s27 + $0x298] sm:$0xf] %v487_v38  ;;  %v489_v39 = vld [vmem:[%s3458_s26 + $0xa70] sm:$0xf] }
  0x84   : > { %v491_v40 = vld [vmem:[%s3458_s26 + $0xa80] sm:$0xf]  ;;  %v493_v41 = vld [vmem:[%s3458_s26 + $0xa90] sm:$0xf]  ;;  %490 = vst [vmem:[%s3462_s27 + $0x29c] sm:$0xf] %v489_v39 }
  0x85   : > { %492 = vst [vmem:[%s3462_s27 + $0x2a0] sm:$0xf] %v491_v40  ;;  %494 = vst [vmem:[%s3462_s27 + $0x2a4] sm:$0xf] %v493_v41  ;;  %v495_v42 = vld [vmem:[%s3458_s26 + $0xaa0] sm:$0xf] }
  0x86   : > { %v497_v43 = vld [vmem:[%s3458_s26 + $0xab0] sm:$0xf]  ;;  %v499_v44 = vld [vmem:[%s3458_s26 + $0xac0] sm:$0xf]  ;;  %496 = vst [vmem:[%s3462_s27 + $0x2a8] sm:$0xf] %v495_v42 }
  0x87   : > { %498 = vst [vmem:[%s3462_s27 + $0x2ac] sm:$0xf] %v497_v43  ;;  %500 = vst [vmem:[%s3462_s27 + $0x2b0] sm:$0xf] %v499_v44  ;;  %v501_v45 = vld [vmem:[%s3458_s26 + $0xad0] sm:$0xf] }
  0x88   : > { %v503_v46 = vld [vmem:[%s3458_s26 + $0xae0] sm:$0xf]  ;;  %v505_v47 = vld [vmem:[%s3458_s26 + $0xaf0] sm:$0xf]  ;;  %502 = vst [vmem:[%s3462_s27 + $0x2b4] sm:$0xf] %v501_v45 }
  0x89   : > { %504 = vst [vmem:[%s3462_s27 + $0x2b8] sm:$0xf] %v503_v46  ;;  %506 = vst [vmem:[%s3462_s27 + $0x2bc] sm:$0xf] %v505_v47  ;;  %v507_v48 = vld [vmem:[%s3458_s26 + $0xb00] sm:$0xf] }
  0x8a   : > { %v509_v49 = vld [vmem:[%s3458_s26 + $0xb10] sm:$0xf]  ;;  %v511_v50 = vld [vmem:[%s3458_s26 + $0xb20] sm:$0xf]  ;;  %508 = vst [vmem:[%s3462_s27 + $0x2c0] sm:$0xf] %v507_v48 }
  0x8b   : > { %510 = vst [vmem:[%s3462_s27 + $0x2c4] sm:$0xf] %v509_v49  ;;  %512 = vst [vmem:[%s3462_s27 + $0x2c8] sm:$0xf] %v511_v50  ;;  %v513_v51 = vld [vmem:[%s3458_s26 + $0xb30] sm:$0xf] }
  0x8c   : > { %v515_v52 = vld [vmem:[%s3458_s26 + $0xb40] sm:$0xf]  ;;  %v517_v53 = vld [vmem:[%s3458_s26 + $0xb50] sm:$0xf]  ;;  %514 = vst [vmem:[%s3462_s27 + $0x2cc] sm:$0xf] %v513_v51 }
  0x8d   : > { %516 = vst [vmem:[%s3462_s27 + $0x2d0] sm:$0xf] %v515_v52  ;;  %518 = vst [vmem:[%s3462_s27 + $0x2d4] sm:$0xf] %v517_v53  ;;  %v519_v54 = vld [vmem:[%s3458_s26 + $0xb60] sm:$0xf] }
  0x8e   : > { %v521_v55 = vld [vmem:[%s3458_s26 + $0xb70] sm:$0xf]  ;;  %v523_v56 = vld [vmem:[%s3458_s26 + $0xb80] sm:$0xf]  ;;  %520 = vst [vmem:[%s3462_s27 + $0x2d8] sm:$0xf] %v519_v54 }
  0x8f   : > { %522 = vst [vmem:[%s3462_s27 + $0x2dc] sm:$0xf] %v521_v55  ;;  %524 = vst [vmem:[%s3462_s27 + $0x2e0] sm:$0xf] %v523_v56  ;;  %v525_v57 = vld [vmem:[%s3458_s26 + $0xb90] sm:$0xf] }
  0x90   : > { %v527_v58 = vld [vmem:[%s3458_s26 + $0xba0] sm:$0xf]  ;;  %v529_v59 = vld [vmem:[%s3458_s26 + $0xbb0] sm:$0xf]  ;;  %526 = vst [vmem:[%s3462_s27 + $0x2e4] sm:$0xf] %v525_v57 }
  0x91   : > { %528 = vst [vmem:[%s3462_s27 + $0x2e8] sm:$0xf] %v527_v58  ;;  %530 = vst [vmem:[%s3462_s27 + $0x2ec] sm:$0xf] %v529_v59  ;;  %v531_v60 = vld [vmem:[%s3458_s26 + $0xbc0] sm:$0xf] }
  0x92   : > { %v533_v61 = vld [vmem:[%s3458_s26 + $0xbd0] sm:$0xf]  ;;  %v535_v62 = vld [vmem:[%s3458_s26 + $0xbe0] sm:$0xf]  ;;  %532 = vst [vmem:[%s3462_s27 + $0x2f0] sm:$0xf] %v531_v60 }
  0x93   : > { %534 = vst [vmem:[%s3462_s27 + $0x2f4] sm:$0xf] %v533_v61  ;;  %536 = vst [vmem:[%s3462_s27 + $0x2f8] sm:$0xf] %v535_v62  ;;  %v537_v63 = vld [vmem:[%s3458_s26 + $0xbf0] sm:$0xf] }
  0x94   : > { %v539_v0 = vld [vmem:[%s3458_s26 + $0xc00] sm:$0xf]  ;;  %v541_v1 = vld [vmem:[%s3458_s26 + $0xc10] sm:$0xf]  ;;  %538 = vst [vmem:[%s3462_s27 + $0x2fc] sm:$0xf] %v537_v63 }
  0x95   : > { %540 = vst [vmem:[%s3462_s27 + $0x300] sm:$0xf] %v539_v0  ;;  %542 = vst [vmem:[%s3462_s27 + $0x304] sm:$0xf] %v541_v1  ;;  %v543_v2 = vld [vmem:[%s3458_s26 + $0xc20] sm:$0xf] }
  0x96   : > { %v545_v3 = vld [vmem:[%s3458_s26 + $0xc30] sm:$0xf]  ;;  %v547_v4 = vld [vmem:[%s3458_s26 + $0xc40] sm:$0xf]  ;;  %544 = vst [vmem:[%s3462_s27 + $0x308] sm:$0xf] %v543_v2 }
  0x97   : > { %546 = vst [vmem:[%s3462_s27 + $0x30c] sm:$0xf] %v545_v3  ;;  %548 = vst [vmem:[%s3462_s27 + $0x310] sm:$0xf] %v547_v4  ;;  %v549_v5 = vld [vmem:[%s3458_s26 + $0xc50] sm:$0xf] }
  0x98   : > { %v551_v6 = vld [vmem:[%s3458_s26 + $0xc60] sm:$0xf]  ;;  %v553_v7 = vld [vmem:[%s3458_s26 + $0xc70] sm:$0xf]  ;;  %550 = vst [vmem:[%s3462_s27 + $0x314] sm:$0xf] %v549_v5 }
  0x99   : > { %552 = vst [vmem:[%s3462_s27 + $0x318] sm:$0xf] %v551_v6  ;;  %554 = vst [vmem:[%s3462_s27 + $0x31c] sm:$0xf] %v553_v7  ;;  %v555_v8 = vld [vmem:[%s3458_s26 + $0xc80] sm:$0xf] }
  0x9a   : > { %v557_v9 = vld [vmem:[%s3458_s26 + $0xc90] sm:$0xf]  ;;  %v559_v10 = vld [vmem:[%s3458_s26 + $0xca0] sm:$0xf]  ;;  %556 = vst [vmem:[%s3462_s27 + $0x320] sm:$0xf] %v555_v8 }
  0x9b   : > { %558 = vst [vmem:[%s3462_s27 + $0x324] sm:$0xf] %v557_v9  ;;  %560 = vst [vmem:[%s3462_s27 + $0x328] sm:$0xf] %v559_v10  ;;  %v561_v11 = vld [vmem:[%s3458_s26 + $0xcb0] sm:$0xf] }
  0x9c   : > { %v563_v12 = vld [vmem:[%s3458_s26 + $0xcc0] sm:$0xf]  ;;  %v565_v13 = vld [vmem:[%s3458_s26 + $0xcd0] sm:$0xf]  ;;  %562 = vst [vmem:[%s3462_s27 + $0x32c] sm:$0xf] %v561_v11 }
  0x9d   : > { %564 = vst [vmem:[%s3462_s27 + $0x330] sm:$0xf] %v563_v12  ;;  %566 = vst [vmem:[%s3462_s27 + $0x334] sm:$0xf] %v565_v13  ;;  %v567_v14 = vld [vmem:[%s3458_s26 + $0xce0] sm:$0xf] }
  0x9e   : > { %v569_v15 = vld [vmem:[%s3458_s26 + $0xcf0] sm:$0xf]  ;;  %v571_v16 = vld [vmem:[%s3458_s26 + $0xd00] sm:$0xf]  ;;  %568 = vst [vmem:[%s3462_s27 + $0x338] sm:$0xf] %v567_v14 }
  0x9f   : > { %570 = vst [vmem:[%s3462_s27 + $0x33c] sm:$0xf] %v569_v15  ;;  %572 = vst [vmem:[%s3462_s27 + $0x340] sm:$0xf] %v571_v16  ;;  %v573_v17 = vld [vmem:[%s3458_s26 + $0xd10] sm:$0xf] }
  0xa0   : > { %v575_v18 = vld [vmem:[%s3458_s26 + $0xd20] sm:$0xf]  ;;  %v577_v19 = vld [vmem:[%s3458_s26 + $0xd30] sm:$0xf]  ;;  %574 = vst [vmem:[%s3462_s27 + $0x344] sm:$0xf] %v573_v17 }
  0xa1   : > { %576 = vst [vmem:[%s3462_s27 + $0x348] sm:$0xf] %v575_v18  ;;  %578 = vst [vmem:[%s3462_s27 + $0x34c] sm:$0xf] %v577_v19  ;;  %v579_v20 = vld [vmem:[%s3458_s26 + $0xd40] sm:$0xf] }
  0xa2   : > { %v581_v21 = vld [vmem:[%s3458_s26 + $0xd50] sm:$0xf]  ;;  %v583_v22 = vld [vmem:[%s3458_s26 + $0xd60] sm:$0xf]  ;;  %580 = vst [vmem:[%s3462_s27 + $0x350] sm:$0xf] %v579_v20 }
  0xa3   : > { %582 = vst [vmem:[%s3462_s27 + $0x354] sm:$0xf] %v581_v21  ;;  %584 = vst [vmem:[%s3462_s27 + $0x358] sm:$0xf] %v583_v22  ;;  %v585_v23 = vld [vmem:[%s3458_s26 + $0xd70] sm:$0xf] }
  0xa4   : > { %v587_v24 = vld [vmem:[%s3458_s26 + $0xd80] sm:$0xf]  ;;  %v589_v25 = vld [vmem:[%s3458_s26 + $0xd90] sm:$0xf]  ;;  %586 = vst [vmem:[%s3462_s27 + $0x35c] sm:$0xf] %v585_v23 }
  0xa5   : > { %588 = vst [vmem:[%s3462_s27 + $0x360] sm:$0xf] %v587_v24  ;;  %590 = vst [vmem:[%s3462_s27 + $0x364] sm:$0xf] %v589_v25  ;;  %v591_v26 = vld [vmem:[%s3458_s26 + $0xda0] sm:$0xf] }
  0xa6   : > { %v593_v27 = vld [vmem:[%s3458_s26 + $0xdb0] sm:$0xf]  ;;  %v595_v28 = vld [vmem:[%s3458_s26 + $0xdc0] sm:$0xf]  ;;  %592 = vst [vmem:[%s3462_s27 + $0x368] sm:$0xf] %v591_v26 }
  0xa7   : > { %594 = vst [vmem:[%s3462_s27 + $0x36c] sm:$0xf] %v593_v27  ;;  %596 = vst [vmem:[%s3462_s27 + $0x370] sm:$0xf] %v595_v28  ;;  %v597_v29 = vld [vmem:[%s3458_s26 + $0xdd0] sm:$0xf] }
  0xa8   : > { %v599_v30 = vld [vmem:[%s3458_s26 + $0xde0] sm:$0xf]  ;;  %v601_v31 = vld [vmem:[%s3458_s26 + $0xdf0] sm:$0xf]  ;;  %598 = vst [vmem:[%s3462_s27 + $0x374] sm:$0xf] %v597_v29 }
  0xa9   : > { %600 = vst [vmem:[%s3462_s27 + $0x378] sm:$0xf] %v599_v30  ;;  %602 = vst [vmem:[%s3462_s27 + $0x37c] sm:$0xf] %v601_v31  ;;  %v603_v32 = vld [vmem:[%s3458_s26 + $0xe00] sm:$0xf] }
  0xaa   : > { %v605_v33 = vld [vmem:[%s3458_s26 + $0xe10] sm:$0xf]  ;;  %v607_v34 = vld [vmem:[%s3458_s26 + $0xe20] sm:$0xf]  ;;  %604 = vst [vmem:[%s3462_s27 + $0x380] sm:$0xf] %v603_v32 }
  0xab   : > { %606 = vst [vmem:[%s3462_s27 + $0x384] sm:$0xf] %v605_v33  ;;  %608 = vst [vmem:[%s3462_s27 + $0x388] sm:$0xf] %v607_v34  ;;  %v609_v35 = vld [vmem:[%s3458_s26 + $0xe30] sm:$0xf] }
  0xac   : > { %v611_v36 = vld [vmem:[%s3458_s26 + $0xe40] sm:$0xf]  ;;  %v613_v37 = vld [vmem:[%s3458_s26 + $0xe50] sm:$0xf]  ;;  %610 = vst [vmem:[%s3462_s27 + $0x38c] sm:$0xf] %v609_v35 }
  0xad   : > { %612 = vst [vmem:[%s3462_s27 + $0x390] sm:$0xf] %v611_v36  ;;  %614 = vst [vmem:[%s3462_s27 + $0x394] sm:$0xf] %v613_v37  ;;  %v615_v38 = vld [vmem:[%s3458_s26 + $0xe60] sm:$0xf] }
  0xae   : > { %v617_v39 = vld [vmem:[%s3458_s26 + $0xe70] sm:$0xf]  ;;  %v619_v40 = vld [vmem:[%s3458_s26 + $0xe80] sm:$0xf]  ;;  %616 = vst [vmem:[%s3462_s27 + $0x398] sm:$0xf] %v615_v38 }
  0xaf   : > { %618 = vst [vmem:[%s3462_s27 + $0x39c] sm:$0xf] %v617_v39  ;;  %620 = vst [vmem:[%s3462_s27 + $0x3a0] sm:$0xf] %v619_v40  ;;  %v621_v41 = vld [vmem:[%s3458_s26 + $0xe90] sm:$0xf] }
  0xb0   : > { %v623_v42 = vld [vmem:[%s3458_s26 + $0xea0] sm:$0xf]  ;;  %v625_v43 = vld [vmem:[%s3458_s26 + $0xeb0] sm:$0xf]  ;;  %622 = vst [vmem:[%s3462_s27 + $0x3a4] sm:$0xf] %v621_v41 }
  0xb1   : > { %624 = vst [vmem:[%s3462_s27 + $0x3a8] sm:$0xf] %v623_v42  ;;  %626 = vst [vmem:[%s3462_s27 + $0x3ac] sm:$0xf] %v625_v43  ;;  %v627_v44 = vld [vmem:[%s3458_s26 + $0xec0] sm:$0xf] }
  0xb2   : > { %v629_v45 = vld [vmem:[%s3458_s26 + $0xed0] sm:$0xf]  ;;  %v631_v46 = vld [vmem:[%s3458_s26 + $0xee0] sm:$0xf]  ;;  %628 = vst [vmem:[%s3462_s27 + $0x3b0] sm:$0xf] %v627_v44 }
  0xb3   : > { %630 = vst [vmem:[%s3462_s27 + $0x3b4] sm:$0xf] %v629_v45  ;;  %632 = vst [vmem:[%s3462_s27 + $0x3b8] sm:$0xf] %v631_v46  ;;  %v633_v47 = vld [vmem:[%s3458_s26 + $0xef0] sm:$0xf] }
  0xb4   : > { %v635_v48 = vld [vmem:[%s3458_s26 + $0xf00] sm:$0xf]  ;;  %v637_v49 = vld [vmem:[%s3458_s26 + $0xf10] sm:$0xf]  ;;  %634 = vst [vmem:[%s3462_s27 + $0x3bc] sm:$0xf] %v633_v47 }
  0xb5   : > { %636 = vst [vmem:[%s3462_s27 + $0x3c0] sm:$0xf] %v635_v48  ;;  %638 = vst [vmem:[%s3462_s27 + $0x3c4] sm:$0xf] %v637_v49  ;;  %v639_v50 = vld [vmem:[%s3458_s26 + $0xf20] sm:$0xf] }
  0xb6   : > { %v641_v51 = vld [vmem:[%s3458_s26 + $0xf30] sm:$0xf]  ;;  %v643_v52 = vld [vmem:[%s3458_s26 + $0xf40] sm:$0xf]  ;;  %640 = vst [vmem:[%s3462_s27 + $0x3c8] sm:$0xf] %v639_v50 }
  0xb7   : > { %642 = vst [vmem:[%s3462_s27 + $0x3cc] sm:$0xf] %v641_v51  ;;  %644 = vst [vmem:[%s3462_s27 + $0x3d0] sm:$0xf] %v643_v52  ;;  %v645_v53 = vld [vmem:[%s3458_s26 + $0xf50] sm:$0xf] }
  0xb8   : > { %v647_v54 = vld [vmem:[%s3458_s26 + $0xf60] sm:$0xf]  ;;  %v649_v55 = vld [vmem:[%s3458_s26 + $0xf70] sm:$0xf]  ;;  %646 = vst [vmem:[%s3462_s27 + $0x3d4] sm:$0xf] %v645_v53 }
  0xb9   : > { %648 = vst [vmem:[%s3462_s27 + $0x3d8] sm:$0xf] %v647_v54  ;;  %650 = vst [vmem:[%s3462_s27 + $0x3dc] sm:$0xf] %v649_v55  ;;  %v651_v56 = vld [vmem:[%s3458_s26 + $0xf80] sm:$0xf] }
  0xba   : > { %v653_v57 = vld [vmem:[%s3458_s26 + $0xf90] sm:$0xf]  ;;  %v655_v58 = vld [vmem:[%s3458_s26 + $0xfa0] sm:$0xf]  ;;  %652 = vst [vmem:[%s3462_s27 + $0x3e0] sm:$0xf] %v651_v56 }
  0xbb   : > { %654 = vst [vmem:[%s3462_s27 + $0x3e4] sm:$0xf] %v653_v57  ;;  %656 = vst [vmem:[%s3462_s27 + $0x3e8] sm:$0xf] %v655_v58  ;;  %v657_v59 = vld [vmem:[%s3458_s26 + $0xfb0] sm:$0xf] }
  0xbc   : > { %v659_v60 = vld [vmem:[%s3458_s26 + $0xfc0] sm:$0xf]  ;;  %v661_v61 = vld [vmem:[%s3458_s26 + $0xfd0] sm:$0xf]  ;;  %658 = vst [vmem:[%s3462_s27 + $0x3ec] sm:$0xf] %v657_v59 }
  0xbd   : > { %660 = vst [vmem:[%s3462_s27 + $0x3f0] sm:$0xf] %v659_v60  ;;  %662 = vst [vmem:[%s3462_s27 + $0x3f4] sm:$0xf] %v661_v61  ;;  %v663_v62 = vld [vmem:[%s3458_s26 + $0xfe0] sm:$0xf] }
  0xbe   : > { %v665_v63 = vld [vmem:[%s3458_s26 + $0xff0] sm:$0xf]  ;;  %664 = vst [vmem:[%s3462_s27 + $0x3f8] sm:$0xf] %v663_v62 }
  0xbf   : > { %666 = vst [vmem:[%s3462_s27 + $0x3fc] sm:$0xf] %v665_v63 }
  0xc0 PF: > { %p2862_p7 = scmp.ge.s32.totalorder %s3393_s14, 1  ;;  %p1200_p8 = scmp.lt.s32.totalorder %s3393_s14, 5 }
  0xc2   : > { %p1201_p9 = pnand %p2862_p7, %p1200_p8 }
  0xc3   : > { %s1207_s28 = sand.u32 (!%p1201_p9), 1, %s3385_s12   ;;  %v3980_v0 = vld [vmem:[%s4205_s0] sm:$0xff] (!%p1201_p9)  ;;  %v3985_v1 = vld [vmem:[%s4205_s0 + $0x8] sm:$0xff] (!%p1201_p9)  ;;  %v4027_v33 = vld [vmem:[%s4205_s0 + $0x10] sm:$0xff] (!%p1201_p9)  ;;  %vm2656_vm0 = vcmask (!%p1201_p9), 1041408   ;;  %p1233_p10 = scmp.lt.s32.totalorder (!%p1201_p9), %s3433_s15, 3 }
  0xc4   : > { %1204 = sbr.rel (%p1201_p9) target bundleno = 770 (0x302), region = 65  ;;  %s2863_s6 = sshll.u32 (!%p1201_p9), %s1207_s28, 10  ;;  %v2867_v2 = vcombine.high (!%p1201_p9), %v3980_v0, %v3980_v0  ;;  %v2869_v3 = vcombine.high (!%p1201_p9), %v3985_v1, %v3985_v1  ;;  %v4033_v35 = vld [vmem:[%s4205_s0 + $0x18] sm:$0xff] (!%p1201_p9)  ;;  %v2866_v38 = vcombine.low (!%p1201_p9), %v3980_v0, %v3980_v0  ;;  %v2868_v39 = vcombine.low (!%p1201_p9), %v3985_v1, %v3985_v1 }
  0xc5   : > { %s3993_s7 = scalar_lea.vmem (!%p1201_p9), [#allocation2], %s2863_s6  ;;  %v2871_v42 = vcombine.high (!%p1201_p9), %v4027_v33, %v4027_v33  ;;  %v2873_v44 = vcombine.high (!%p1201_p9), %v4033_v35, %v4033_v35  ;;  %s2864_s26 = sshll.u32 (!%p1201_p9), %s1207_s28, 2 }
  0xc6   : > { %v3227_v4 = vld [vmem:[%s3993_s7 + $0x40] sm:$0xff] (!%p1201_p9)   ;;  %2358 = vmatprep.mubr.bf16.mxu0 (!%p1201_p9), %v2867_v2  ;;  %2398 = vmatprep.mubr.bf16.mxu1 (!%p1201_p9), %v2869_v3  ;;  %v3231_v8 = vld [vmem:[%s3993_s7 + $0x48] sm:$0xff] (!%p1201_p9)   ;;  %v3235_v12 = vld [vmem:[%s3993_s7 + $0x50] sm:$0xff] (!%p1201_p9)   ;;  %s4171_s27 = scalar_lea.vmem (!%p1201_p9), [#allocation3], %s2864_s26 }
  0xc7   : > { %v3228_v5 = vld [vmem:[%s3993_s7 + $0xc0] sm:$0xff] (!%p1201_p9)   ;;  %3019 = vmatprep.subr.bf16.mxu0 (!%p1201_p9), %v3227_v4  ;;  %v3232_v9 = vld [vmem:[%s3993_s7 + $0xc8] sm:$0xff] (!%p1201_p9)   ;;  %v3236_v13 = vld [vmem:[%s3993_s7 + $0xd0] sm:$0xff] (!%p1201_p9)  }
  0xc8   : > { %v3229_v6 = vld [vmem:[%s3993_s7] sm:$0xff] (!%p1201_p9)   ;;  %3041 = vmatprep.subr.bf16.mxu1 (!%p1201_p9), %v3228_v5  ;;  %v3233_v10 = vld [vmem:[%s3993_s7 + $0x8] sm:$0xff] (!%p1201_p9)   ;;  %v3237_v14 = vld [vmem:[%s3993_s7 + $0x10] sm:$0xff] (!%p1201_p9)  }
  0xc9   : > { %v3230_v7 = vld [vmem:[%s3993_s7 + $0x80] sm:$0xff] (!%p1201_p9)   ;;  %3020 = vmatpush3.bf16.msra.mxu0 (!%p1201_p9), %v3229_v6  ;;  %v3234_v11 = vld [vmem:[%s3993_s7 + $0x88] sm:$0xff] (!%p1201_p9)   ;;  %v3238_v15 = vld [vmem:[%s3993_s7 + $0x90] sm:$0xff] (!%p1201_p9)  }
  0xca   : > { %3042 = vmatpush3.bf16.msra.mxu1 (!%p1201_p9), %v3230_v7  ;;  %3021 = vmatprep.subr.bf16.mxu0 (!%p1201_p9), %v3231_v8  ;;  %v3239_v16 = vld [vmem:[%s3993_s7 + $0x58] sm:$0xff] (!%p1201_p9)   ;;  %v3243_v20 = vld [vmem:[%s3993_s7 + $0x60] sm:$0xff] (!%p1201_p9)   ;;  %v3247_v24 = vld [vmem:[%s3993_s7 + $0x68] sm:$0xff] (!%p1201_p9)  }
  0xcb   : > { %3043 = vmatprep.subr.bf16.mxu1 %v3232_v9  ;;  %v3240_v17 = vld [vmem:[%s3993_s7 + $0xd8] sm:$0xff]   ;;  %v3244_v21 = vld [vmem:[%s3993_s7 + $0xe0] sm:$0xff]   ;;  %v3248_v25 = vld [vmem:[%s3993_s7 + $0xe8] sm:$0xff]   ;;  %s1234_s12 = scalar_select %p1233_p10, %s3433_s15, 3 }
  0xcc   : > { %v3241_v18 = vld [vmem:[%s3993_s7 + $0x18] sm:$0xff]   ;;  %v3245_v22 = vld [vmem:[%s3993_s7 + $0x20] sm:$0xff]   ;;  %v3249_v26 = vld [vmem:[%s3993_s7 + $0x28] sm:$0xff]   ;;  %s2730_s14 = scalar_lea.vmem (%p3448_p5), %s4207_s2, %s3433_s15 }
  0xcd   : > { %3022 = vmatpush3.bf16.msra.mxu0 %v3233_v10  ;;  %v3242_v19 = vld [vmem:[%s3993_s7 + $0x98] sm:$0xff]   ;;  %v3246_v23 = vld [vmem:[%s3993_s7 + $0xa0] sm:$0xff]   ;;  %v3250_v27 = vld [vmem:[%s3993_s7 + $0xa8] sm:$0xff]   ;;  %s2865_s30 = sshll.u32 %s1234_s12, 3 }
  0xce   : > { %3044 = vmatpush3.bf16.msra.mxu1 %v3234_v11  ;;  %3023 = vmatprep.subr.bf16.mxu0 %v3235_v12  ;;  %v3251_v28 = vld [vmem:[%s3993_s7 + $0x70] sm:$0xff]   ;;  %v3255_v32 = vld [vmem:[%s3993_s7 + $0x78] sm:$0xff]   ;;  %v3263_v40 = vld [vmem:[%s3993_s7 + $0x140] sm:$0xff]   ;;  %v2870_v12 = vcombine.low %v4027_v33, %v4027_v33  ;;  %s1236_s8 = scalar_lea.vmem %s4208_s3, %s2865_s30 }
  0xcf   : > { %3045 = vmatprep.subr.bf16.mxu1 %v3236_v13  ;;  %v3252_v29 = vld [vmem:[%s3993_s7 + $0xf0] sm:$0xff]   ;;  %v3256_v34 = vld [vmem:[%s3993_s7 + $0xf8] sm:$0xff]   ;;  %v3264_v41 = vld [vmem:[%s3993_s7 + $0x1c0] sm:$0xff]   ;;  %v2872_v13 = vcombine.low %v4033_v35, %v4033_v35 }
  0xd0   : > { %v3253_v30 = vld [vmem:[%s3993_s7 + $0x30] sm:$0xff]   ;;  %v3257_v36 = vld [vmem:[%s3993_s7 + $0x38] sm:$0xff]   ;;  %v3265_v43 = vld [vmem:[%s3993_s7 + $0x100] sm:$0xff]  }
  0xd1   : > { %3024 = vmatpush3.bf16.msra.mxu0 %v3237_v14  ;;  %v3254_v31 = vld [vmem:[%s3993_s7 + $0xb0] sm:$0xff]   ;;  %v3258_v37 = vld [vmem:[%s3993_s7 + $0xb8] sm:$0xff]   ;;  %v3266_v45 = vld [vmem:[%s3993_s7 + $0x180] sm:$0xff]  }
  0xd2   : > { %3046 = vmatpush3.bf16.msra.mxu1 %v3238_v15  ;;  %3025 = vmatprep.subr.bf16.mxu0 %v3239_v16  ;;  %v3267_v46 = vld [vmem:[%s3993_s7 + $0x148] sm:$0xff]   ;;  %v3271_v50 = vld [vmem:[%s3993_s7 + $0x150] sm:$0xff]   ;;  %v3275_v54 = vld [vmem:[%s3993_s7 + $0x158] sm:$0xff]  }
  0xd3   : > { %3047 = vmatprep.subr.bf16.mxu1 %v3240_v17  ;;  %v3268_v47 = vld [vmem:[%s3993_s7 + $0x1c8] sm:$0xff]   ;;  %v3272_v51 = vld [vmem:[%s3993_s7 + $0x1d0] sm:$0xff]   ;;  %v3276_v55 = vld [vmem:[%s3993_s7 + $0x1d8] sm:$0xff]  }
  0xd4   : > { %v3269_v48 = vld [vmem:[%s3993_s7 + $0x108] sm:$0xff]   ;;  %v3273_v52 = vld [vmem:[%s3993_s7 + $0x110] sm:$0xff]   ;;  %v3277_v56 = vld [vmem:[%s3993_s7 + $0x118] sm:$0xff]  }
  0xd5   : > { %3026 = vmatpush3.bf16.msra.mxu0 %v3241_v18  ;;  %v3270_v49 = vld [vmem:[%s3993_s7 + $0x188] sm:$0xff]   ;;  %v3274_v53 = vld [vmem:[%s3993_s7 + $0x190] sm:$0xff]   ;;  %v3278_v57 = vld [vmem:[%s3993_s7 + $0x198] sm:$0xff]  }
  0xd6   : > { %3048 = vmatpush3.bf16.msra.mxu1 %v3242_v19  ;;  %3027 = vmatprep.subr.bf16.mxu0 %v3243_v20  ;;  %v3279_v58 = vld [vmem:[%s3993_s7 + $0x160] sm:$0xff]   ;;  %v3283_v62 = vld [vmem:[%s3993_s7 + $0x168] sm:$0xff]   ;;  %v3287_v2 = vld [vmem:[%s3993_s7 + $0x170] sm:$0xff]  }
  0xd7   : > { %3049 = vmatprep.subr.bf16.mxu1 %v3244_v21  ;;  %v3280_v59 = vld [vmem:[%s3993_s7 + $0x1e0] sm:$0xff]   ;;  %v3284_v63 = vld [vmem:[%s3993_s7 + $0x1e8] sm:$0xff]   ;;  %v3288_v3 = vld [vmem:[%s3993_s7 + $0x1f0] sm:$0xff]  }
  0xd8   : > { %v3281_v60 = vld [vmem:[%s3993_s7 + $0x120] sm:$0xff]   ;;  %v3285_v0 = vld [vmem:[%s3993_s7 + $0x128] sm:$0xff]   ;;  %v3289_v4 = vld [vmem:[%s3993_s7 + $0x130] sm:$0xff]  }
  0xd9   : > { %3028 = vmatpush3.bf16.msra.mxu0 %v3245_v22  ;;  %v3282_v61 = vld [vmem:[%s3993_s7 + $0x1a0] sm:$0xff]   ;;  %v3286_v1 = vld [vmem:[%s3993_s7 + $0x1a8] sm:$0xff]   ;;  %v3290_v5 = vld [vmem:[%s3993_s7 + $0x1b0] sm:$0xff]  }
  0xda   : > { %3050 = vmatpush3.bf16.msra.mxu1 %v3246_v23  ;;  %3029 = vmatprep.subr.bf16.mxu0 %v3247_v24  ;;  %v3291_v6 = vld [vmem:[%s3993_s7 + $0x178] sm:$0xff]   ;;  %v4077_v7 = vld [vmem:[%s4205_s0 + $0x20] sm:$0xff]  ;;  %v4083_v9 = vld [vmem:[%s4205_s0 + $0x28] sm:$0xff] }
  0xdb   : > { %3051 = vmatprep.subr.bf16.mxu1 %v3248_v25  ;;  %v3292_v8 = vld [vmem:[%s3993_s7 + $0x1f8] sm:$0xff]   ;;  %v3299_v14 = vld [vmem:[%s3993_s7 + $0x240] sm:$0xff]   ;;  %v2875_v16 = vcombine.high %v4077_v7, %v4077_v7  ;;  %v2877_v18 = vcombine.high %v4083_v9, %v4083_v9  ;;  %v3303_v20 = vld [vmem:[%s3993_s7 + $0x248] sm:$0xff]  }
  0xdc   : > { %v3293_v10 = vld [vmem:[%s3993_s7 + $0x138] sm:$0xff]   ;;  %v3300_v15 = vld [vmem:[%s3993_s7 + $0x2c0] sm:$0xff]   ;;  %v3304_v21 = vld [vmem:[%s3993_s7 + $0x2c8] sm:$0xff]  }
  0xdd   : > { %3030 = vmatpush3.bf16.msra.mxu0 %v3249_v26  ;;  %v3294_v11 = vld [vmem:[%s3993_s7 + $0x1b8] sm:$0xff]   ;;  %v3301_v17 = vld [vmem:[%s3993_s7 + $0x200] sm:$0xff]   ;;  %v3305_v22 = vld [vmem:[%s3993_s7 + $0x208] sm:$0xff]  }
  0xde   : > { %3052 = vmatpush3.bf16.msra.mxu1 %v3250_v27  ;;  %3031 = vmatprep.subr.bf16.mxu0 %v3251_v28  ;;  %v3302_v19 = vld [vmem:[%s3993_s7 + $0x280] sm:$0xff]   ;;  %v3306_v23 = vld [vmem:[%s3993_s7 + $0x288] sm:$0xff]   ;;  %v3307_v24 = vld [vmem:[%s3993_s7 + $0x250] sm:$0xff]  }
  0xdf   : > { %3053 = vmatprep.subr.bf16.mxu1 %v3252_v29  ;;  %v3308_v25 = vld [vmem:[%s3993_s7 + $0x2d0] sm:$0xff]   ;;  %v3311_v28 = vld [vmem:[%s3993_s7 + $0x258] sm:$0xff]   ;;  %v3316_v33 = vld [vmem:[%s3993_s7 + $0x2e0] sm:$0xff]  }
  0xe0   : > { %v3309_v26 = vld [vmem:[%s3993_s7 + $0x210] sm:$0xff]   ;;  %v3312_v29 = vld [vmem:[%s3993_s7 + $0x2d8] sm:$0xff]   ;;  %v3318_v35 = vld [vmem:[%s3993_s7 + $0x2a0] sm:$0xff]  }
  0xe1   : > { %3032 = vmatpush3.bf16.msra.mxu0 %v3253_v30  ;;  %v3310_v27 = vld [vmem:[%s3993_s7 + $0x290] sm:$0xff]   ;;  %v3313_v30 = vld [vmem:[%s3993_s7 + $0x218] sm:$0xff]  }
  0xe2   : > { %3054 = vmatpush3.bf16.msra.mxu1 %v3254_v31  ;;  %3033 = vmatprep.subr.bf16.mxu0 %v3255_v32  ;;  %v3314_v31 = vld [vmem:[%s3993_s7 + $0x298] sm:$0xff]   ;;  %v3315_v32 = vld [vmem:[%s3993_s7 + $0x260] sm:$0xff]  }
  0xe3   : > { %3055 = vmatprep.subr.bf16.mxu1 %v3256_v34  ;;  %v3317_v34 = vld [vmem:[%s3993_s7 + $0x220] sm:$0xff]  }
  0xe5   : > { %3034 = vmatpush3.bf16.msra.mxu0 %v3257_v36  ;;  %v3319_v36 = vld [vmem:[%s3993_s7 + $0x268] sm:$0xff]  }
  0xe6   : > { %3056 = vmatpush3.bf16.msra.mxu1 %v3258_v37  ;;  %3063 = vmatprep.subr.bf16.mxu0 %v3263_v40  ;;  %v3320_v37 = vld [vmem:[%s3993_s7 + $0x2e8] sm:$0xff]   ;;  %v3323_v40 = vld [vmem:[%s3993_s7 + $0x270] sm:$0xff]  }
  0xe7   : > { %3085 = vmatprep.subr.bf16.mxu1 %v3264_v41  ;;  %v3324_v41 = vld [vmem:[%s3993_s7 + $0x2f0] sm:$0xff]  }
  0xe8   : > { %2359 = vmatmul.mubr.bf16.vlgmr.msra.gmra.mrb[0].mxu0 %v2866_v38  ;;  %v3321_v38 = vld [vmem:[%s3993_s7 + $0x228] sm:$0xff]  }
  0xe9   : > { %2399 = vmatmul.mubr.bf16.vlgmr.msra.gmra.mrb[0].mxu1 %v2868_v39  ;;  %3064 = vmatpush3.bf16.msra.mxu0 %v3265_v43  ;;  %v3322_v39 = vld [vmem:[%s3993_s7 + $0x2a8] sm:$0xff]   ;;  %v3326_v43 = vld [vmem:[%s3993_s7 + $0x2b0] sm:$0xff]  }
  0xea   : > { %3086 = vmatpush3.bf16.msra.mxu1 %v3266_v45  ;;  %2438 = vmatprep.mubr.bf16.mxu0 %v2871_v42  ;;  %v3325_v42 = vld [vmem:[%s3993_s7 + $0x230] sm:$0xff]   ;;  %v3328_v45 = vld [vmem:[%s3993_s7 + $0x2f8] sm:$0xff]  }
  0xeb   : > { %3065 = vmatprep.subr.bf16.mxu0 %v3267_v46  ;;  %2478 = vmatprep.mubr.bf16.mxu1 %v2873_v44  ;;  %v3327_v44 = vld [vmem:[%s3993_s7 + $0x278] sm:$0xff]  }
  0xec   : > { %3087 = vmatprep.subr.bf16.mxu1 %v3268_v47  ;;  %v3329_v46 = vld [vmem:[%s3993_s7 + $0x238] sm:$0xff]  }
  0xed   : > { %3066 = vmatpush3.bf16.msra.mxu0 %v3269_v48  ;;  %v3330_v47 = vld [vmem:[%s3993_s7 + $0x2b8] sm:$0xff]   ;;  %v2874_v48 = vcombine.low %v4077_v7, %v4077_v7  ;;  %v3356_v7 = vld [vmem:[%s3993_s7 + $0x3e8] sm:$0xff]  }
  0xee   : > { %3088 = vmatpush3.bf16.msra.mxu1 %v3270_v49  ;;  %3067 = vmatprep.subr.bf16.mxu0 %v3271_v50  ;;  %v2876_v49 = vcombine.low %v4083_v9, %v4083_v9  ;;  %v3335_v50 = vld [vmem:[%s3993_s7 + $0x340] sm:$0xff]   ;;  %v3358_v9 = vld [vmem:[%s3993_s7 + $0x3a8] sm:$0xff]  }
  0xef   : > { %3089 = vmatprep.subr.bf16.mxu1 %v3272_v51  ;;  %v3336_v51 = vld [vmem:[%s3993_s7 + $0x3c0] sm:$0xff]  }
  0xf1   : > { %3068 = vmatpush3.bf16.msra.mxu0 %v3273_v52  ;;  %v3337_v52 = vld [vmem:[%s3993_s7 + $0x300] sm:$0xff]  }
  0xf2   : > { %3090 = vmatpush3.bf16.msra.mxu1 %v3274_v53  ;;  %3069 = vmatprep.subr.bf16.mxu0 %v3275_v54  ;;  %v3338_v53 = vld [vmem:[%s3993_s7 + $0x380] sm:$0xff]   ;;  %v3339_v54 = vld [vmem:[%s3993_s7 + $0x348] sm:$0xff]  }
  0xf3   : > { %3091 = vmatprep.subr.bf16.mxu1 %v3276_v55  ;;  %v3340_v55 = vld [vmem:[%s3993_s7 + $0x3c8] sm:$0xff]  }
  0xf5   : > { %3070 = vmatpush3.bf16.msra.mxu0 %v3277_v56  ;;  %v3341_v56 = vld [vmem:[%s3993_s7 + $0x308] sm:$0xff]  }
  0xf6   : > { %3092 = vmatpush3.bf16.msra.mxu1 %v3278_v57  ;;  %3071 = vmatprep.subr.bf16.mxu0 %v3279_v58  ;;  %v3342_v57 = vld [vmem:[%s3993_s7 + $0x388] sm:$0xff]   ;;  %v3343_v58 = vld [vmem:[%s3993_s7 + $0x350] sm:$0xff]  }
  0xf7   : > { %3093 = vmatprep.subr.bf16.mxu1 %v3280_v59  ;;  %v3344_v59 = vld [vmem:[%s3993_s7 + $0x3d0] sm:$0xff]  }
  0xf9   : > { %3072 = vmatpush3.bf16.msra.mxu0 %v3281_v60  ;;  %v3345_v60 = vld [vmem:[%s3993_s7 + $0x310] sm:$0xff]  }
  0xfa   : > { %3094 = vmatpush3.bf16.msra.mxu1 %v3282_v61  ;;  %3073 = vmatprep.subr.bf16.mxu0 %v3283_v62  ;;  %v3346_v61 = vld [vmem:[%s3993_s7 + $0x390] sm:$0xff]   ;;  %v3347_v62 = vld [vmem:[%s3993_s7 + $0x358] sm:$0xff]  }
  0xfb   : > { %3095 = vmatprep.subr.bf16.mxu1 %v3284_v63  ;;  %v3348_v63 = vld [vmem:[%s3993_s7 + $0x3d8] sm:$0xff]  }
  0xfd   : > { %3074 = vmatpush3.bf16.msra.mxu0 %v3285_v0  ;;  %v3349_v0 = vld [vmem:[%s3993_s7 + $0x318] sm:$0xff]  }
  0xfe   : > { %3096 = vmatpush3.bf16.msra.mxu1 %v3286_v1  ;;  %3075 = vmatprep.subr.bf16.mxu0 %v3287_v2  ;;  %v3350_v1 = vld [vmem:[%s3993_s7 + $0x398] sm:$0xff]   ;;  %v3351_v2 = vld [vmem:[%s3993_s7 + $0x360] sm:$0xff]  }
  0xff   : > { %3097 = vmatprep.subr.bf16.mxu1 %v3288_v3  ;;  %v3352_v3 = vld [vmem:[%s3993_s7 + $0x3e0] sm:$0xff]  }
 0x101   : > { %3076 = vmatpush3.bf16.msra.mxu0 %v3289_v4  ;;  %v3353_v4 = vld [vmem:[%s3993_s7 + $0x320] sm:$0xff]  }
 0x102   : > { %3098 = vmatpush3.bf16.msra.mxu1 %v3290_v5  ;;  %3077 = vmatprep.subr.bf16.mxu0 %v3291_v6  ;;  %v3354_v5 = vld [vmem:[%s3993_s7 + $0x3a0] sm:$0xff]   ;;  %v3355_v6 = vld [vmem:[%s3993_s7 + $0x368] sm:$0xff]  }
 0x103   : > { %3099 = vmatprep.subr.bf16.mxu1 %v3292_v8  ;;  %v3357_v8 = vld [vmem:[%s3993_s7 + $0x328] sm:$0xff]  }
 0x105   : > { %3078 = vmatpush3.bf16.msra.mxu0 %v3293_v10  ;;  %v3359_v10 = vld [vmem:[%s3993_s7 + $0x370] sm:$0xff]  }
 0x106   : > { %3100 = vmatpush3.bf16.msra.mxu1 %v3294_v11  ;;  %3107 = vmatprep.subr.bf16.mxu0 %v3299_v14  ;;  %v3360_v11 = vld [vmem:[%s3993_s7 + $0x3f0] sm:$0xff]   ;;  %v3363_v14 = vld [vmem:[%s3993_s7 + $0x378] sm:$0xff]  }
 0x107   : > { %3129 = vmatprep.subr.bf16.mxu1 %v3300_v15  ;;  %v3364_v15 = vld [vmem:[%s3993_s7 + $0x3f8] sm:$0xff]  }
 0x108   : > { %2439 = vmatmul.mubr.bf16.vlgmr.msra.gmra.mrb[4].mxu0 %v2870_v12  ;;  %v3361_v12 = vld [vmem:[%s3993_s7 + $0x330] sm:$0xff]  }
 0x109   : > { %2479 = vmatmul.mubr.bf16.vlgmr.msra.gmra.mrb[4].mxu1 %v2872_v13  ;;  %3108 = vmatpush3.bf16.msra.mxu0 %v3301_v17  ;;  %v3362_v13 = vld [vmem:[%s3993_s7 + $0x3b0] sm:$0xff]   ;;  %v3366_v17 = vld [vmem:[%s3993_s7 + $0x3b8] sm:$0xff]  }
 0x10a   : > { %3130 = vmatpush3.bf16.msra.mxu1 %v3302_v19  ;;  %2518 = vmatprep.mubr.bf16.mxu0 %v2875_v16  ;;  %v3365_v16 = vld [vmem:[%s3993_s7 + $0x338] sm:$0xff]  }
 0x10b   : > { %3109 = vmatprep.subr.bf16.mxu0 %v3303_v20  ;;  %2558 = vmatprep.mubr.bf16.mxu1 %v2877_v18  ;;  %v1244_v18 = vld [vmem:[%s4205_s0 + $0x30] sm:$0xff]  ;;  %v1245_v19 = vld [vmem:[%s4205_s0 + $0x38] sm:$0xff] }
 0x10c   : > { %3131 = vmatprep.subr.bf16.mxu1 %v3304_v21  ;;  %v2878_v20 = vcombine.low %v1244_v18, %v1244_v18  ;;  %v2879_v21 = vcombine.high %v1244_v18, %v1244_v18 }
 0x10d   : > { %3110 = vmatpush3.bf16.msra.mxu0 %v3305_v22  ;;  %v2880_v22 = vcombine.low %v1245_v19, %v1245_v19 }
 0x10e   : > { %3132 = vmatpush3.bf16.msra.mxu1 %v3306_v23  ;;  %3111 = vmatprep.subr.bf16.mxu0 %v3307_v24  ;;  %v2881_v23 = vcombine.high %v1245_v19, %v1245_v19  ;;  %v3395_v24 = vmov 0  }
 0x10f   : > { %3133 = vmatprep.subr.bf16.mxu1 %v3308_v25  ;;  %2646 = vst [vmem:[%s4171_s27] sm:$0x1] %v3395_v24 }
 0x111   : > { %3112 = vmatpush3.bf16.msra.mxu0 %v3309_v26 }
 0x112   : > { %3134 = vmatpush3.bf16.msra.mxu1 %v3310_v27  ;;  %3113 = vmatprep.subr.bf16.mxu0 %v3311_v28 }
 0x113   : > { %3135 = vmatprep.subr.bf16.mxu1 %v3312_v29 }
 0x115   : > { %3114 = vmatpush3.bf16.msra.mxu0 %v3313_v30 }
 0x116   : > { %3136 = vmatpush3.bf16.msra.mxu1 %v3314_v31  ;;  %3115 = vmatprep.subr.bf16.mxu0 %v3315_v32 }
 0x117   : > { %3137 = vmatprep.subr.bf16.mxu1 %v3316_v33 }
 0x119   : > { %3116 = vmatpush3.bf16.msra.mxu0 %v3317_v34 }
 0x11a   : > { %3138 = vmatpush3.bf16.msra.mxu1 %v3318_v35  ;;  %3117 = vmatprep.subr.bf16.mxu0 %v3319_v36 }
 0x11b   : > { %3139 = vmatprep.subr.bf16.mxu1 %v3320_v37 }
 0x11d   : > { %3118 = vmatpush3.bf16.msra.mxu0 %v3321_v38 }
 0x11e   : > { %3140 = vmatpush3.bf16.msra.mxu1 %v3322_v39  ;;  %3119 = vmatprep.subr.bf16.mxu0 %v3323_v40 }
 0x11f   : > { %3141 = vmatprep.subr.bf16.mxu1 %v3324_v41 }
 0x121   : > { %3120 = vmatpush3.bf16.msra.mxu0 %v3325_v42 }
 0x122   : > { %3142 = vmatpush3.bf16.msra.mxu1 %v3326_v43  ;;  %3121 = vmatprep.subr.bf16.mxu0 %v3327_v44 }
 0x123   : > { %3143 = vmatprep.subr.bf16.mxu1 %v3328_v45 }
 0x125   : > { %3122 = vmatpush3.bf16.msra.mxu0 %v3329_v46 }
 0x126   : > { %3144 = vmatpush3.bf16.msra.mxu1 %v3330_v47  ;;  %3151 = vmatprep.subr.bf16.mxu0 %v3335_v50 }
 0x127   : > { %3173 = vmatprep.subr.bf16.mxu1 %v3336_v51 }
 0x128   : > { %2519 = vmatmul.mubr.bf16.vlgmr.msra.gmra.mrb[8].mxu0 %v2874_v48 }
 0x129   : > { %2559 = vmatmul.mubr.bf16.vlgmr.msra.gmra.mrb[8].mxu1 %v2876_v49  ;;  %3152 = vmatpush3.bf16.msra.mxu0 %v3337_v52 }
 0x12a   : > { %3174 = vmatpush3.bf16.msra.mxu1 %v3338_v53  ;;  %3153 = vmatprep.subr.bf16.mxu0 %v3339_v54 }
 0x12b   : > { %3175 = vmatprep.subr.bf16.mxu1 %v3340_v55  ;;  %2598 = vmatprep.mubr.bf16.mxu0 %v2879_v21 }
 0x12c   : > { %2638 = vmatprep.mubr.bf16.mxu1 %v2881_v23 }
 0x12d   : > { %3154 = vmatpush3.bf16.msra.mxu0 %v3341_v56 }
 0x12e   : > { %3176 = vmatpush3.bf16.msra.mxu1 %v3342_v57  ;;  %3155 = vmatprep.subr.bf16.mxu0 %v3343_v58 }
 0x12f   : > { %3177 = vmatprep.subr.bf16.mxu1 %v3344_v59 }
 0x131   : > { %3156 = vmatpush3.bf16.msra.mxu0 %v3345_v60 }
 0x132   : > { %3178 = vmatpush3.bf16.msra.mxu1 %v3346_v61  ;;  %3157 = vmatprep.subr.bf16.mxu0 %v3347_v62 }
 0x133   : > { %3179 = vmatprep.subr.bf16.mxu1 %v3348_v63 }
 0x135   : > { %3158 = vmatpush3.bf16.msra.mxu0 %v3349_v0 }
 0x136   : > { %3180 = vmatpush3.bf16.msra.mxu1 %v3350_v1  ;;  %3159 = vmatprep.subr.bf16.mxu0 %v3351_v2 }
 0x137   : > { %3181 = vmatprep.subr.bf16.mxu1 %v3352_v3 }
 0x139   : > { %3160 = vmatpush3.bf16.msra.mxu0 %v3353_v4 }
 0x13a   : > { %3182 = vmatpush3.bf16.msra.mxu1 %v3354_v5  ;;  %3161 = vmatprep.subr.bf16.mxu0 %v3355_v6 }
 0x13b   : > { %3183 = vmatprep.subr.bf16.mxu1 %v3356_v7 }
 0x13d   : > { %3162 = vmatpush3.bf16.msra.mxu0 %v3357_v8 }
 0x13e   : > { %3184 = vmatpush3.bf16.msra.mxu1 %v3358_v9  ;;  %3163 = vmatprep.subr.bf16.mxu0 %v3359_v10  ;;  %v3396_v10 = vmov 0.0  }
 0x13f   : > { %3185 = vmatprep.subr.bf16.mxu1 %v3360_v11 }
 0x141   : > { %3164 = vmatpush3.bf16.msra.mxu0 %v3361_v12 }
 0x142   : > { %3186 = vmatpush3.bf16.msra.mxu1 %v3362_v13  ;;  %3165 = vmatprep.subr.bf16.mxu0 %v3363_v14 }
 0x143   : > { %3187 = vmatprep.subr.bf16.mxu1 %v3364_v15 }
 0x145   : > { %3166 = vmatpush3.bf16.msra.mxu0 %v3365_v16 }
 0x146   : > { %3188 = vmatpush3.bf16.msra.mxu1 %v3366_v17 }
 0x148   : > { %2599 = vmatmul.mubr.bf16.vlgmr.msra.gmra.mrb[12].mxu0 %v2878_v20 }
 0x149   : > { %2639 = vmatmul.mubr.bf16.vlgmr.msra.gmra.mrb[12].mxu1 %v2880_v22 }
 0x1bb   : > { %v3035_v25 = vpop.f32.mrb[0].mxu0 }
 0x1bc   : > { %v3057_v26 = vpop.f32.mrb[0].mxu1  ;;  %v3036_v27 = vpop.f32.mrb[1].mxu0 }
 0x1bd   : > { %v3037_v28 = vadd.f32 %v3036_v27, %v3035_v25  ;;  %v3058_v29 = vpop.f32.mrb[1].mxu1  ;;  %v3038_v30 = vpop.f32.mrb[2].mxu0 }
 0x1be   : > { %v3059_v31 = vadd.f32 %v3058_v29, %v3057_v26  ;;  %v3060_v32 = vpop.f32.mrb[2].mxu1  ;;  %v3039_v33 = vpop.f32.mrb[3].mxu0 }
 0x1bf   : > { %v3061_v34 = vpop.f32.mrb[3].mxu1 }
 0x1c0   : > { %v2401_v35 = vadd.f32 %v3059_v31, %v3037_v28 }
 0x1db   : > { %v3079_v36 = vpop.f32.mrb[4].mxu0 }
 0x1dc   : > { %v3101_v37 = vpop.f32.mrb[4].mxu1  ;;  %v3080_v38 = vpop.f32.mrb[5].mxu0 }
 0x1dd   : > { %v3081_v39 = vadd.f32 %v3080_v38, %v3079_v36  ;;  %v3102_v40 = vpop.f32.mrb[5].mxu1  ;;  %v3082_v41 = vpop.f32.mrb[6].mxu0 }
 0x1de   : > { %v3103_v42 = vadd.f32 %v3102_v40, %v3101_v37  ;;  %v3104_v43 = vpop.f32.mrb[6].mxu1  ;;  %v3083_v44 = vpop.f32.mrb[7].mxu0 }
 0x1df   : > { %v2441_v45 = vadd.f32 %v3081_v39, %v2401_v35  ;;  %v3105_v46 = vpop.f32.mrb[7].mxu1 }
 0x1e1   : > { %v2481_v47 = vadd.f32 %v3103_v42, %v2441_v45 }
 0x1fb   : > { %v3123_v48 = vpop.f32.mrb[8].mxu0 }
 0x1fc   : > { %v3145_v49 = vpop.f32.mrb[8].mxu1  ;;  %v3124_v50 = vpop.f32.mrb[9].mxu0 }
 0x1fd   : > { %v3125_v51 = vadd.f32 %v3124_v50, %v3123_v48  ;;  %v3146_v52 = vpop.f32.mrb[9].mxu1  ;;  %v3126_v53 = vpop.f32.mrb[10].mxu0 }
 0x1fe   : > { %v3147_v54 = vadd.f32 %v3146_v52, %v3145_v49  ;;  %v3148_v55 = vpop.f32.mrb[10].mxu1  ;;  %v3127_v56 = vpop.f32.mrb[11].mxu0  ;;  %v2746_v52 = vld [vmem:[%s4171_s27] sm:$0x1] (%p3448_p5) }
 0x1ff   : > { %v2521_v57 = vadd.f32 %v3125_v51, %v2481_v47  ;;  %v3149_v58 = vpop.f32.mrb[11].mxu1  ;;  %2747 = vst [vmem:[%s2730_s14] sm:$0x1] (%p3448_p5), %v2746_v52 }
 0x201   : > { %v2561_v59 = vadd.f32 %v3147_v54, %v2521_v57 }
 0x21b   : > { %v3167_v60 = vpop.f32.mrb[12].mxu0 }
 0x21c   : > { %v3189_v61 = vpop.f32.mrb[12].mxu1  ;;  %v3168_v62 = vpop.f32.mrb[13].mxu0 }
 0x21d   : > { %v3190_v63 = vpop.f32.mrb[13].mxu1  ;;  %v3169_v0 = vadd.f32 %v3168_v62, %v3167_v60  ;;  %v3170_v2 = vpop.f32.mrb[14].mxu0 }
 0x21e   : > { %v3191_v1 = vadd.f32 %v3190_v63, %v3189_v61  ;;  %v3192_v3 = vpop.f32.mrb[14].mxu1  ;;  %v3171_v4 = vpop.f32.mrb[15].mxu0 }
 0x21f   : > { %v3193_v5 = vpop.f32.mrb[15].mxu1  ;;  %v2601_v6 = vadd.f32 %v3169_v0, %v2561_v59 }
 0x221   : > { %v2641_v7 = vadd.f32 %v3191_v1, %v2601_v6 }
 0x223   : > { %vm2649_vm1 = vcmp.ge.f32.partialorder %v2641_v7, 1.25  ;;  %v2668_v8 = vmul.f32 0.75, %v2641_v7  ;;  %v2670_v9 = vrot.slane %v2641_v7, 2  ;;  %v2694_v19 = vrot.slane %v2641_v7, 4 }
 0x224   : > { %v3010_v11 = vsel %vm2649_vm1, 1.0, %v3396_v10  ;;  %v2650_v12 = vsel %vm2649_vm1, 0.0, %v2641_v7 }
 0x225   : > { %v2657_v13 = vsel %vm2656_vm0, %v3010_v11, 0.0  ;;  %v2653_v14 = vpack.c.bf16 %v3010_v11, %v3010_v11  ;;  %v2673_v15 = vmul.f32 0.9699707, %v2650_v12  ;;  %v2672_v16 = vadd.f32 %v2670_v9, %v2668_v8 }
 0x226   : > { %2658 = vadd.xlane.f32.xlu0 %v2657_v13 }
 0x227   : > { %3011 = vst [vmem:[%s4171_s27 + $0x1] sm:$0x1] %v2653_v14  ;;  %v2674_v17 = vadd.f32 %v2673_v15, %v2672_v16  ;;  %v2693_v18 = vmul.f32 0.75, %v2672_v16 }
 0x229   : > { %vm2675_vm2 = vcmp.ge.f32.partialorder %v2674_v17, 1.25  ;;  %v2696_v25 = vadd.f32 %v2694_v19, %v2693_v18 }
 0x22a   : > { %v3012_v20 = vsel %vm2675_vm2, 1.0, %v3396_v10  ;;  %v2676_v21 = vsel %vm2675_vm2, 0.0, %v2674_v17 }
 0x22b   : > { %v2682_v22 = vsel %vm2656_vm0, %v3012_v20, 0.0  ;;  %v2679_v23 = vpack.c.bf16 %v3012_v20, %v3012_v20  ;;  %v2697_v24 = vmul.f32 0.9699707, %v2676_v21 }
 0x22c   : > { %2683 = vadd.xlane.f32.xlu0 %v2682_v22 }
 0x22d   : > { %3013 = vst [vmem:[%s4171_s27 + $0x2] sm:$0x1] %v2679_v23  ;;  %v2698_v26 = vadd.f32 %v2697_v24, %v2696_v25 }
 0x22e   : > { %v2748_v53 = vld [vmem:[%s4171_s27 + $0x1] sm:$0x1] (%p3448_p5) }
 0x22f   : > { %vm2699_vm3 = vcmp.ge.f32.partialorder %v2698_v26, 1.25  ;;  %2749 = vst [vmem:[%s2730_s14 + $0x4] sm:$0x1] (%p3448_p5), %v2748_v53 }
 0x230   : > { %v3014_v27 = vsel %vm2699_vm3, 1.0, %v3396_v10 }
 0x231   : > { %v2705_v28 = vsel %vm2656_vm0, %v3014_v27, 0.0  ;;  %v2702_v29 = vpack.c.bf16 %v3014_v27, %v3014_v27 }
 0x232   : > { %2706 = vadd.xlane.f32.xlu1 %v2705_v28 }
 0x233   : > { %3015 = vst [vmem:[%s4171_s27 + $0x3] sm:$0x1] %v2702_v29 }
 0x234   : > { %v2750_v54 = vld [vmem:[%s4171_s27 + $0x2] sm:$0x1] (%p3448_p5) }
 0x235   : > { %2751 = vst [vmem:[%s2730_s14 + $0x8] sm:$0x1] (%p3448_p5), %v2750_v54 }
 0x23a   : > { %v2752_v55 = vld [vmem:[%s4171_s27 + $0x3] sm:$0x1] (%p3448_p5) }
 0x23b   : > { %2753 = vst [vmem:[%s2730_s14 + $0xc] sm:$0x1] (%p3448_p5), %v2752_v55 }
 0x2b3   : > { %v2659_v30 = vpop.xlane.xlu0 %2658 }
 0x2b4   : > { %v2660_v31 = vrot.slane %v2659_v30, 4 }
 0x2b6   : > { %v2661_v32 = vadd.f32 %v2660_v31, %v2659_v30 }
 0x2b8   : > { %v2662_v33 = vrot.slane %v2661_v32, 2 }
 0x2b9   : > { %v2684_v34 = vpop.xlane.xlu0 %2683 }
 0x2ba   : > { %v2685_v35 = vrot.slane %v2684_v34, 4  ;;  %v2663_v36 = vadd.f32 %v2662_v33, %v2661_v32 }
 0x2bc   : > { %v2686_v37 = vadd.f32 %v2685_v35, %v2684_v34  ;;  %v2664_v38 = vrot.slane %v2663_v36, 1 }
 0x2be   : > { %v2687_v39 = vrot.slane %v2686_v37, 2  ;;  %v2665_v40 = vadd.f32 %v2664_v38, %v2663_v36 }
 0x2bf   : > { %v2707_v41 = vpop.xlane.xlu1 %2706 }
 0x2c0   : > { %v2688_v42 = vadd.f32 %v2687_v39, %v2686_v37  ;;  %v2708_v43 = vrot.slane %v2707_v41, 4  ;;  %3195 = vpush %v2665_v40 }
 0x2c2   : > { %v2709_v44 = vadd.f32 %v2708_v43, %v2707_v41  ;;  %v2689_v45 = vrot.slane %v2688_v42, 1 }
 0x2c4   : > { %v2710_v46 = vrot.slane %v2709_v44, 2  ;;  %v2690_v47 = vadd.f32 %v2689_v45, %v2688_v42 }
 0x2c6   : > { %v2711_v48 = vadd.f32 %v2710_v46, %v2709_v44  ;;  %3197 = vpush %v2690_v47 }
 0x2c8   : > { %v2712_v49 = vrot.slane %v2711_v48, 1 }
 0x2ca   : > { %v2713_v50 = vadd.f32 %v2712_v49, %v2711_v48 }
 0x2cc   : > { %3199 = vpush %v2713_v50 }
 0x2f1   : > { %s3196_s28 = spop %3195 }
 0x2f7   : > { %s3198_s29 = spop %3197 }
 0x2f8   : > { %s2692_s4 = sadd.f32 %s3198_s29, %s3196_s28 }
 0x2fb   : > { %2729 = sbr.rel (!%p3448_p5) target bundleno = 770 (0x302), region = 73 }
 0x2fd   : > { %s3200_s5 = spop %3199 }
 0x2fe   : > { %s2715_s9 = sadd.f32 %s3200_s5, %s2692_s4 }
 0x300   : > { %v2716_v51 = vstv %s2715_s9 }
 0x301   : > { %2718 = vst [vmem:[%s1236_s8] sm:$0xff] %v2716_v51 }
 0x302 PF: > { %p11_p11 = scmp.ge.s32.totalorder %s3436_s16, 6   ;;  %s4210_s12 = smov %s3389_s13 }
 0x303   : > { %s4211_s13 = smov %s3446_s19  ;;  %s4212_s14 = smov %s3436_s16 }
 0x304   :  { %13 = sbr.rel (!%p11_p11) target bundleno = 2 (0x2), region = 153 }

// kernel: network_forward.13
= control target key start
LH: loop header
LB: loop body
LE: loop exit
PB: predicated region body
PF: predicated region fallthrough
CT: control target
= control target key end

     0   :  { %vm366_vm0 = vcmask 24576   ;;  %v578_v38 = vmov 0   ;;  %vm377_vm1 = vcmask 25600   ;;  %v579_v52 = vmov 0.0   ;;  %s724_s1 = inlined_call_operand.vmem [shape: bf16[512,4], index: 1, kind: input, shape index: {}]   ;;  %s725_s0 = inlined_call_operand.vmem [shape: bf16[8,512], index: 0, kind: input, shape index: {}]   ;;  %s726_s2 = inlined_call_operand.vmem [shape: bf16[4,2,4], index: 2, kind: output, shape index: {0}]   ;;  %s727_s3 = inlined_call_operand.vmem [shape: f32[1,8,128], index: 3, kind: output, shape index: {1}]  }
   0x1   :  { %v542_v0 = vld [vmem:[%s724_s1 + $0x40] sm:$0xff]   ;;  %v546_v4 = vld [vmem:[%s724_s1 + $0x48] sm:$0xff]   ;;  %v550_v8 = vld [vmem:[%s724_s1 + $0x50] sm:$0xff]   ;;  %367 = vst.msk [vmem:[%s726_s2] sm:$0x1] %vm366_vm0, %v578_v38 }
   0x2   :  { %v543_v1 = vld [vmem:[%s724_s1 + $0xc0] sm:$0xff]   ;;  %490 = vmatprep.subr.bf16.mxu0 %v542_v0  ;;  %v547_v5 = vld [vmem:[%s724_s1 + $0xc8] sm:$0xff]   ;;  %v551_v9 = vld [vmem:[%s724_s1 + $0xd0] sm:$0xff]  }
   0x3   :  { %v544_v2 = vld [vmem:[%s724_s1] sm:$0xff]   ;;  %512 = vmatprep.subr.bf16.mxu1 %v543_v1  ;;  %v548_v6 = vld [vmem:[%s724_s1 + $0x8] sm:$0xff]   ;;  %v552_v10 = vld [vmem:[%s724_s1 + $0x10] sm:$0xff]  }
   0x4   :  { %v545_v3 = vld [vmem:[%s724_s1 + $0x80] sm:$0xff]   ;;  %491 = vmatpush3.bf16.msra.mxu0 %v544_v2  ;;  %v549_v7 = vld [vmem:[%s724_s1 + $0x88] sm:$0xff]   ;;  %v553_v11 = vld [vmem:[%s724_s1 + $0x90] sm:$0xff]  }
   0x5   :  { %513 = vmatpush3.bf16.msra.mxu1 %v545_v3  ;;  %492 = vmatprep.subr.bf16.mxu0 %v546_v4  ;;  %v554_v12 = vld [vmem:[%s724_s1 + $0x58] sm:$0xff]   ;;  %v558_v16 = vld [vmem:[%s724_s1 + $0x60] sm:$0xff]   ;;  %v562_v20 = vld [vmem:[%s724_s1 + $0x68] sm:$0xff]  }
   0x6   :  { %514 = vmatprep.subr.bf16.mxu1 %v547_v5  ;;  %v555_v13 = vld [vmem:[%s724_s1 + $0xd8] sm:$0xff]   ;;  %v559_v17 = vld [vmem:[%s724_s1 + $0xe0] sm:$0xff]   ;;  %v563_v21 = vld [vmem:[%s724_s1 + $0xe8] sm:$0xff]  }
   0x7   :  { %v556_v14 = vld [vmem:[%s724_s1 + $0x18] sm:$0xff]   ;;  %v560_v18 = vld [vmem:[%s724_s1 + $0x20] sm:$0xff]   ;;  %v564_v22 = vld [vmem:[%s724_s1 + $0x28] sm:$0xff]  }
   0x8   :  { %493 = vmatpush3.bf16.msra.mxu0 %v548_v6  ;;  %v557_v15 = vld [vmem:[%s724_s1 + $0x98] sm:$0xff]   ;;  %v561_v19 = vld [vmem:[%s724_s1 + $0xa0] sm:$0xff]   ;;  %v565_v23 = vld [vmem:[%s724_s1 + $0xa8] sm:$0xff]  }
   0x9   :  { %515 = vmatpush3.bf16.msra.mxu1 %v549_v7  ;;  %494 = vmatprep.subr.bf16.mxu0 %v550_v8  ;;  %v566_v24 = vld [vmem:[%s724_s1 + $0x70] sm:$0xff]   ;;  %v570_v28 = vld [vmem:[%s724_s1 + $0x78] sm:$0xff]   ;;  %v14_v32 = vld [vmem:[%s725_s0] sm:$0xff] }
   0xa   :  { %516 = vmatprep.subr.bf16.mxu1 %v551_v9  ;;  %v567_v25 = vld [vmem:[%s724_s1 + $0xf0] sm:$0xff]   ;;  %v571_v29 = vld [vmem:[%s724_s1 + $0xf8] sm:$0xff]   ;;  %v15_v33 = vld [vmem:[%s725_s0 + $0x8] sm:$0xff]  ;;  %v448_v34 = vcombine.low %v14_v32, %v14_v32  ;;  %v449_v35 = vcombine.high %v14_v32, %v14_v32 }
   0xb   :  { %v568_v26 = vld [vmem:[%s724_s1 + $0x30] sm:$0xff]   ;;  %v572_v30 = vld [vmem:[%s724_s1 + $0x38] sm:$0xff]   ;;  %v450_v36 = vcombine.low %v15_v33, %v15_v33  ;;  %v451_v37 = vcombine.high %v15_v33, %v15_v33 }
   0xc   :  { %495 = vmatpush3.bf16.msra.mxu0 %v552_v10  ;;  %v569_v27 = vld [vmem:[%s724_s1 + $0xb0] sm:$0xff]   ;;  %v573_v31 = vld [vmem:[%s724_s1 + $0xb8] sm:$0xff]   ;;  %318 = vmatprep.mubr.bf16.mxu0 %v449_v35 }
   0xd   :  { %517 = vmatpush3.bf16.msra.mxu1 %v553_v11  ;;  %496 = vmatprep.subr.bf16.mxu0 %v554_v12 }
   0xe   :  { %518 = vmatprep.subr.bf16.mxu1 %v555_v13  ;;  %358 = vmatprep.mubr.bf16.mxu1 %v451_v37 }
  0x10   :  { %497 = vmatpush3.bf16.msra.mxu0 %v556_v14 }
  0x11   :  { %519 = vmatpush3.bf16.msra.mxu1 %v557_v15  ;;  %498 = vmatprep.subr.bf16.mxu0 %v558_v16 }
  0x12   :  { %520 = vmatprep.subr.bf16.mxu1 %v559_v17 }
  0x14   :  { %499 = vmatpush3.bf16.msra.mxu0 %v560_v18 }
  0x15   :  { %521 = vmatpush3.bf16.msra.mxu1 %v561_v19  ;;  %500 = vmatprep.subr.bf16.mxu0 %v562_v20 }
  0x16   :  { %522 = vmatprep.subr.bf16.mxu1 %v563_v21 }
  0x18   :  { %501 = vmatpush3.bf16.msra.mxu0 %v564_v22 }
  0x19   :  { %523 = vmatpush3.bf16.msra.mxu1 %v565_v23  ;;  %502 = vmatprep.subr.bf16.mxu0 %v566_v24 }
  0x1a   :  { %524 = vmatprep.subr.bf16.mxu1 %v567_v25 }
  0x1c   :  { %503 = vmatpush3.bf16.msra.mxu0 %v568_v26 }
  0x1d   :  { %525 = vmatpush3.bf16.msra.mxu1 %v569_v27  ;;  %504 = vmatprep.subr.bf16.mxu0 %v570_v28 }
  0x1e   :  { %526 = vmatprep.subr.bf16.mxu1 %v571_v29 }
  0x20   :  { %505 = vmatpush3.bf16.msra.mxu0 %v572_v30 }
  0x21   :  { %527 = vmatpush3.bf16.msra.mxu1 %v573_v31 }
  0x23   :  { %319 = vmatmul.mubr.bf16.vlgmr.msra.gmra.mrb[0].mxu0 %v448_v34 }
  0x24   :  { %359 = vmatmul.mubr.bf16.vlgmr.msra.gmra.mrb[0].mxu1 %v450_v36 }
  0xf6   :  { %v506_v39 = vpop.f32.mrb[0].mxu0 }
  0xf7   :  { %v528_v40 = vpop.f32.mrb[0].mxu1  ;;  %v507_v41 = vpop.f32.mrb[1].mxu0 }
  0xf8   :  { %v529_v42 = vpop.f32.mrb[1].mxu1  ;;  %v508_v43 = vadd.f32 %v507_v41, %v506_v39  ;;  %v509_v45 = vpop.f32.mrb[2].mxu0 }
  0xf9   :  { %v530_v44 = vadd.f32 %v529_v42, %v528_v40  ;;  %v531_v46 = vpop.f32.mrb[2].mxu1  ;;  %v510_v47 = vpop.f32.mrb[3].mxu0 }
  0xfa   :  { %v532_v48 = vpop.f32.mrb[3].mxu1 }
  0xfb   :  { %v361_v49 = vadd.f32 %v530_v44, %v508_v43 }
  0xfd   :  { %vm370_vm2 = vcmp.ge.f32.partialorder %v361_v49, 1.25  ;;  %v389_v50 = vmul.f32 0.75, %v361_v49  ;;  %v391_v51 = vrot.slane %v361_v49, 2  ;;  %v415_v61 = vrot.slane %v361_v49, 4 }
  0xfe   :  { %v484_v53 = vsel %vm370_vm2, 1.0, %v579_v52  ;;  %v371_v54 = vsel %vm370_vm2, 0.0, %v361_v49 }
  0xff   :  { %v378_v55 = vsel %vm377_vm1, %v484_v53, 0.0  ;;  %v374_v56 = vpack.c.bf16 %v484_v53, %v484_v53  ;;  %v394_v57 = vmul.f32 0.9699707, %v371_v54  ;;  %v393_v58 = vadd.f32 %v391_v51, %v389_v50 }
 0x100   :  { %379 = vadd.xlane.f32.xlu0 %v378_v55 }
 0x101   :  { %485 = vst.msk [vmem:[%s726_s2 + $0x1] sm:$0x1] %vm366_vm0, %v374_v56  ;;  %v395_v59 = vadd.f32 %v394_v57, %v393_v58  ;;  %v414_v60 = vmul.f32 0.75, %v393_v58 }
 0x103   :  { %vm396_vm3 = vcmp.ge.f32.partialorder %v395_v59, 1.25  ;;  %v417_v3 = vadd.f32 %v415_v61, %v414_v60 }
 0x104   :  { %v486_v62 = vsel %vm396_vm3, 1.0, %v579_v52  ;;  %v397_v63 = vsel %vm396_vm3, 0.0, %v395_v59 }
 0x105   :  { %v403_v0 = vsel %vm377_vm1, %v486_v62, 0.0  ;;  %v400_v1 = vpack.c.bf16 %v486_v62, %v486_v62  ;;  %v418_v2 = vmul.f32 0.9699707, %v397_v63 }
 0x106   :  { %404 = vadd.xlane.f32.xlu0 %v403_v0 }
 0x107   :  { %487 = vst.msk [vmem:[%s726_s2 + $0x2] sm:$0x1] %vm366_vm0, %v400_v1  ;;  %v419_v4 = vadd.f32 %v418_v2, %v417_v3 }
 0x109   :  { %vm420_vm4 = vcmp.ge.f32.partialorder %v419_v4, 1.25 }
 0x10a   :  { %v488_v5 = vsel %vm420_vm4, 1.0, %v579_v52 }
 0x10b   :  { %v426_v6 = vsel %vm377_vm1, %v488_v5, 0.0  ;;  %v423_v7 = vpack.c.bf16 %v488_v5, %v488_v5 }
 0x10c   :  { %427 = vadd.xlane.f32.xlu1 %v426_v6 }
 0x10d   :  { %489 = vst.msk [vmem:[%s726_s2 + $0x3] sm:$0x1] %vm366_vm0, %v423_v7 }
 0x18d   :  { %v380_v8 = vpop.xlane.xlu0 %379 }
 0x18e   :  { %v381_v9 = vrot.slane %v380_v8, 4 }
 0x190   :  { %v382_v10 = vadd.f32 %v381_v9, %v380_v8 }
 0x192   :  { %v383_v11 = vrot.slane %v382_v10, 2 }
 0x193   :  { %v405_v12 = vpop.xlane.xlu0 %404 }
 0x194   :  { %v406_v13 = vrot.slane %v405_v12, 4  ;;  %v384_v14 = vadd.f32 %v383_v11, %v382_v10 }
 0x196   :  { %v407_v15 = vadd.f32 %v406_v13, %v405_v12  ;;  %v385_v16 = vrot.slane %v384_v14, 1 }
 0x198   :  { %v408_v17 = vrot.slane %v407_v15, 2  ;;  %v386_v18 = vadd.f32 %v385_v16, %v384_v14 }
 0x199   :  { %v428_v19 = vpop.xlane.xlu1 %427 }
 0x19a   :  { %v409_v20 = vadd.f32 %v408_v17, %v407_v15  ;;  %v429_v21 = vrot.slane %v428_v19, 4  ;;  %534 = vpush %v386_v18 }
 0x19c   :  { %v430_v22 = vadd.f32 %v429_v21, %v428_v19  ;;  %v410_v23 = vrot.slane %v409_v20, 1 }
 0x19e   :  { %v431_v24 = vrot.slane %v430_v22, 2  ;;  %v411_v25 = vadd.f32 %v410_v23, %v409_v20 }
 0x1a0   :  { %v432_v26 = vadd.f32 %v431_v24, %v430_v22  ;;  %536 = vpush %v411_v25 }
 0x1a2   :  { %v433_v27 = vrot.slane %v432_v26, 1 }
 0x1a4   :  { %v434_v28 = vadd.f32 %v433_v27, %v432_v26 }
 0x1a6   :  { %538 = vpush %v434_v28 }
 0x1cb   :  { %s535_s2 = spop %534 }
 0x1d1   :  { %s537_s5 = spop %536 }
 0x1d2   :  { %s413_s6 = sadd.f32 %s537_s5, %s535_s2 }
 0x1d7   :  { %s539_s7 = spop %538 }
 0x1d8   :  { %s436_s8 = sadd.f32 %s539_s7, %s413_s6 }
 0x1da   :  { %v437_v29 = vstv %s436_s8 }
 0x1db   :  { %439 = vst [vmem:[%s727_s3] sm:$0xff] %v437_v29 }

</bundles_post_ra>
